<compile_context>
chip_gen: v6e
topology: v6e:2x2x1
jax: 0.10.0
libtpu: 0.0.40
codegen_flags: <defaults>
</compile_context>

<pallas_src>
import functools

import jax
import jax.numpy as jnp
from jax import lax
from jax.experimental import pallas as pl
from jax.experimental.pallas import tpu as pltpu


# --------------------------------- utilities ----------------------------------

def _round_up(x, m):
    return (x + m - 1) // m * m


def _pad_axis(x, axis, target):
    pad = target - x.shape[axis]
    if pad <= 0:
        return x
    widths = [(0, 0)] * x.ndim
    widths[axis] = (0, pad)
    return jnp.pad(x, widths)


# ----------------------------- conv + relu + pool ------------------------------

def _conv_kernel(p_ref, w_ref, b_ref, o_ref, *, nb, pp, hw):
    w = w_ref[...]                       # (C, KK)  bf16
    b = b_ref[...]                       # (C, 1)   f32
    for i in range(nb):                  # nb frames per grid step
        # one MXU push per frame: (C, KK) x (KK, pp*hw) -> (C, pp*hw), f32 acc
        y = jnp.dot(w, p_ref[i], preferred_element_type=jnp.float32)
        pooled = y[:, 0:hw]              # lane-aligned slices (hw multiple of 128
        for s in range(1, pp):           # at real sizes); max = 2x2 max-pool
            pooled = jnp.maximum(pooled, y[:, s * hw:(s + 1) * hw])
        # bias + ReLU (commute with max); store bf16 to halve writeback traffic
        o_ref[i] = jnp.maximum(pooled + b, 0.0).astype(o_ref.dtype)


def conv_relu_pool(patches, w_mat, b_col, hw, nb=16):
    """patches: (N, KK, PP*hw) bf16; w_mat: (C, KK) bf16; b_col: (C, 1) f32
    -> (N, C, hw) bf16  (channel-major, pooled-pixel axis in lanes)."""
    N, KK, pphw = patches.shape
    C = w_mat.shape[0]
    pp = pphw // hw
    n_pad = _round_up(N, nb)
    patches = _pad_axis(patches, 0, n_pad)
    kernel = functools.partial(_conv_kernel, nb=nb, pp=pp, hw=hw)
    out = pl.pallas_call(
        kernel,
        out_shape=jax.ShapeDtypeStruct((n_pad, C, hw), jnp.bfloat16),
        grid_spec=pltpu.PrefetchScalarGridSpec(
            num_scalar_prefetch=0,
            grid=(n_pad // nb,),
            in_specs=[
                pl.BlockSpec((nb, KK, pphw), lambda n: (n, 0, 0)),
                pl.BlockSpec((C, KK), lambda n: (0, 0)),
                pl.BlockSpec((C, 1), lambda n: (0, 0)),
            ],
            out_specs=pl.BlockSpec((nb, C, hw), lambda n: (n, 0, 0)),
        ),
        compiler_params=pltpu.CompilerParams(
            dimension_semantics=("parallel",),
            vmem_limit_bytes=40 * 1024 * 1024),
    )(patches, w_mat, b_col)
    return out[:N]


def extract_pool_patches(imgs, K, pool):
    """(N, H, W) f32 -> (N, K*K, pool*pool*Hp*Wp) bf16 im2col, pool-position major.
    Gather-free: only static strided slices + concat (pure DMA-friendly copies).
    TODO(synk): build the taps inside the conv kernel from raw (S,S) frames to
    remove the ~K*K im2col HBM blow-up entirely."""
    N, Hh, Ww = imgs.shape
    Ho, Wo = Hh - K + 1, Ww - K + 1
    Hp, Wp = Ho // pool, Wo // pool
    imgs = imgs.astype(jnp.bfloat16)
    # 36 decimated, shifted lattices: dec[(r,c)][n, pi*Wp+pj] = imgs[n, r+2*pi, c+2*pj]
    dec = {}
    for r in range(K + pool - 1):
        for c in range(K + pool - 1):
            sl = lax.slice(imgs,
                           (0, r, c),
                           (N, r + pool * (Hp - 1) + 1, c + pool * (Wp - 1) + 1),
                           (1, pool, pool))                      # (N, Hp, Wp)
            dec[(r, c)] = sl.reshape(N, Hp * Wp)
    taps = []
    for di in range(K):
        for dj in range(K):
            pos = [dec[(di + a, dj + b)] for a in range(pool) for b in range(pool)]
            taps.append(jnp.concatenate(pos, axis=1))            # (N, pp*hw)
    return jnp.stack(taps, axis=1)                               # (N, KK, pp*hw) bf16


# ----------------------- dense (hoisted LSTM x-projection) ---------------------

def _dense_kernel(x_ref, w_ref, b_ref, o_ref, acc_ref, *, tk):
    k = pl.program_id(1)

    @pl.when(k == 0)
    def _():
        acc_ref[...] = jnp.zeros_like(acc_ref)

    ks = pl.multiple_of(k * tk, tk)      # W is grid-resident; slice the K band here
    acc_ref[...] += jnp.dot(x_ref[...], w_ref[pl.ds(ks, tk), :],
                            preferred_element_type=jnp.float32)

    @pl.when(k == pl.num_programs(1) - 1)
    def _():
        o_ref[...] = acc_ref[...] + b_ref[...]


def dense_bias(x, w, b_row, tm_max=256, tk_max=512):
    """x: (M, K); w: (K, N); b_row: (1, N) -> f32 (M, N) = x @ w + b (bf16 MXU).
    W is held resident in VMEM (constant-index block) instead of being
    re-streamed once per M tile."""
    M, Kd = x.shape
    Nout = w.shape[1]
    x = x.astype(jnp.bfloat16)
    w = w.astype(jnp.bfloat16)
    b_row = b_row.astype(jnp.float32)

    tm = min(tm_max, _round_up(M, 8))
    m_pad = _round_up(M, tm)
    tk = min(tk_max, _round_up(Kd, 128))
    k_pad = _round_up(Kd, tk)
    n_pad = _round_up(Nout, 128)

    x = _pad_axis(_pad_axis(x, 0, m_pad), 1, k_pad)
    w = _pad_axis(_pad_axis(w, 0, k_pad), 1, n_pad)
    b_row = _pad_axis(b_row, 1, n_pad)

    kernel = functools.partial(_dense_kernel, tk=tk)
    out = pl.pallas_call(
        kernel,
        out_shape=jax.ShapeDtypeStruct((m_pad, n_pad), jnp.float32),
        grid_spec=pltpu.PrefetchScalarGridSpec(
            num_scalar_prefetch=0,
            grid=(m_pad // tm, k_pad // tk),
            in_specs=[
                pl.BlockSpec((tm, tk), lambda i, k: (i, k)),
                pl.BlockSpec((k_pad, n_pad), lambda i, k: (0, 0)),   # resident W
                pl.BlockSpec((1, n_pad), lambda i, k: (0, 0)),
            ],
            out_specs=pl.BlockSpec((tm, n_pad), lambda i, k: (i, 0)),
            scratch_shapes=[pltpu.VMEM((tm, n_pad), jnp.float32)],
        ),
        compiler_params=pltpu.CompilerParams(
            dimension_semantics=("parallel", "arbitrary"),
            vmem_limit_bytes=40 * 1024 * 1024),
    )(x, w, b_row)
    return out[:M, :Nout]


# ---------------------------- LSTM recurrence kernel ---------------------------

def _lstm_kernel(len_ref, gx_ref, whh_ref, o_ref, h_scr, c_scr, *, tb, hidden):
    t_blk = pl.program_id(1)
    G = 4 * hidden

    @pl.when(t_blk == 0)
    def _():
        h_scr[...] = jnp.zeros_like(h_scr)
        c_scr[...] = jnp.zeros_like(c_scr)

    whh = whh_ref[...]                   # (H, 4H) bf16, grid-constant (~8 KB)
    lens = len_ref[...]                  # (bb, 1) int32

    h = h_scr[...]
    c = c_scr[...]
    for s in range(tb):                  # static unroll, all slices lane-aligned
        # tiny recurrent matmul: (bb, H) x (H, 4H) -> (bb, 4H); 4H = 128 lanes
        z = gx_ref[:, s * G:(s + 1) * G] + jnp.dot(
            h.astype(jnp.bfloat16), whh, preferred_element_type=jnp.float32)
        # full 128-lane transcendentals once, then 32-lane band slices
        zs = 1.0 / (1.0 + jnp.exp(-z))           # exact sigmoid (no approx drift)
        zt = jnp.tanh(z)
        i_g = zs[:, 0 * hidden:1 * hidden]
        f_g = zs[:, 1 * hidden:2 * hidden]
        g_g = zt[:, 2 * hidden:3 * hidden]
        o_g = zs[:, 3 * hidden:4 * hidden]
        c_new = f_g * c + i_g * g_g
        h_new = o_g * jnp.tanh(c_new)
        valid = (t_blk * tb + s) < lens           # packed-sequence mask (bb, 1)
        h = jnp.where(valid, h_new, h)
        c = jnp.where(valid, c_new, c)
        # lane-slice write into the (bb, tb*H) output block (block writeback is
        # a single lane-dense 512-wide store per grid step)
        o_ref[:, s * hidden:(s + 1) * hidden] = jnp.where(valid, h_new, 0.0)
    h_scr[...] = h
    c_scr[...] = c


def lstm_layer(gx_bt, len_col, whh_fused, hidden, tb=16):
    """gx_bt: (B, T*4H) f32 gate pre-activations (x-proj + biases), batch-major,
    time concatenated along lanes.  len_col: (B, 1) int32.  whh_fused: (H, 4H).
    -> (B, T*H) f32 hidden states (zeros past each sequence length)."""
    B, TG = gx_bt.shape
    G = 4 * hidden
    T = TG // G
    t_pad = _round_up(T, tb)
    b_pad8 = _round_up(B, 8)
    bb = min(64, b_pad8)                 # batch block (parallel axis; 2 TCs on v7x)
    b_pad = _round_up(b_pad8, bb)

    gx = _pad_axis(_pad_axis(gx_bt, 0, b_pad), 1, t_pad * G)
    lens = _pad_axis(len_col, 0, b_pad)          # pad rows get len=0 -> stay masked
    whh = whh_fused.astype(jnp.bfloat16)
    kernel = functools.partial(_lstm_kernel, tb=tb, hidden=hidden)
    out = pl.pallas_call(
        kernel,
        out_shape=jax.ShapeDtypeStruct((b_pad, t_pad * hidden), jnp.float32),
        grid_spec=pltpu.PrefetchScalarGridSpec(
            num_scalar_prefetch=0,
            grid=(b_pad // bb, t_pad // tb),
            in_specs=[
                pl.BlockSpec((bb, 1), lambda b, t: (b, 0)),
                pl.BlockSpec((bb, tb * G), lambda b, t: (b, t)),
                pl.BlockSpec((hidden, G), lambda b, t: (0, 0)),
            ],
            out_specs=pl.BlockSpec((bb, tb * hidden), lambda b, t: (b, t)),
            scratch_shapes=[pltpu.VMEM((bb, hidden), jnp.float32),
                            pltpu.VMEM((bb, hidden), jnp.float32)],
        ),
        compiler_params=pltpu.CompilerParams(
            dimension_semantics=("parallel", "arbitrary")),
    )(lens, gx, whh)
    return out[:B, :T * hidden]


# --------------------------------- FC + softmax --------------------------------

def _fc_softmax_kernel(x_ref, w_ref, b_ref, o_ref):
    logits = jnp.dot(x_ref[...], w_ref[...],
                     preferred_element_type=jnp.float32) + b_ref[...]
    m = jnp.max(logits, axis=-1, keepdims=True)
    e = jnp.exp(logits - m)
    o_ref[...] = e * pl.reciprocal(jnp.sum(e, axis=-1, keepdims=True), approx=True)


def fc_softmax(x, w, b_row, tm_max=512):
    """x: (M, H); w: (H, O); b_row: (1, O) -> (M, O) softmax(x @ w + b).
    O is padded to 128 lanes (zero weight cols, -1e30 bias) so all stores and
    the row reduce are full-lane; padded lanes carry ~0 probability."""
    M, H = x.shape
    O = w.shape[1]
    o_pad = _round_up(O, 128)
    x = x.astype(jnp.bfloat16)
    w = _pad_axis(w.astype(jnp.bfloat16), 1, o_pad)
    b = _pad_axis(b_row.astype(jnp.float32), 1, o_pad)
    b = jnp.where(jnp.arange(o_pad)[None, :] < O, b, -1e30)

    tm = min(tm_max, _round_up(M, 8))
    m_pad = _round_up(M, tm)
    x = _pad_axis(x, 0, m_pad)
    out = pl.pallas_call(
        _fc_softmax_kernel,
        out_shape=jax.ShapeDtypeStruct((m_pad, o_pad), jnp.float32),
        grid_spec=pltpu.PrefetchScalarGridSpec(
            num_scalar_prefetch=0,
            grid=(m_pad // tm,),
            in_specs=[
                pl.BlockSpec((tm, H), lambda i: (i, 0)),
                pl.BlockSpec((H, o_pad), lambda i: (0, 0)),
                pl.BlockSpec((1, o_pad), lambda i: (0, 0)),
            ],
            out_specs=pl.BlockSpec((tm, o_pad), lambda i: (i, 0)),
        ),
        compiler_params=pltpu.CompilerParams(
            dimension_semantics=("parallel",)),
    )(x, w, b)
    return out[:M, :O]


# --------------------------------- parameters ----------------------------------

def fuse_lstm(w_ih, w_hh, b_ih, b_hh):
    """PyTorch (4H,in)/(4H,H)/(4H,)/(4H,) -> fused (in,4H), (H,4H), (1,4H)."""
    return dict(w_ih=w_ih.T, w_hh=w_hh.T, b=(b_ih + b_hh)[None, :])


def init_params(key, S, C, K, H, O, n_layers):
    Hp = (S - K + 1) // 2
    F = C * Hp * Hp

    def unif(k, shape, fan):
        bound = 1.0 / (fan ** 0.5)
        return jax.random.uniform(k, shape, jnp.float32, -bound, bound)

    ks = list(jax.random.split(key, 4 + 4 * n_layers))
    conv_w = unif(ks[0], (C, 1, K, K), K * K)     # torch Conv2d layout
    conv_b = unif(ks[1], (C,), K * K)
    fc_w = unif(ks[2], (O, H), H)                 # torch Linear layout
    fc_b = unif(ks[3], (O,), H)
    lstm, in_dim = [], F
    for l in range(n_layers):
        w_ih = unif(ks[4 + 4 * l + 0], (4 * H, in_dim), H)
        w_hh = unif(ks[4 + 4 * l + 1], (4 * H, H), H)
        b_ih = unif(ks[4 + 4 * l + 2], (4 * H,), H)
        b_hh = unif(ks[4 + 4 * l + 3], (4 * H,), H)
        lstm.append(fuse_lstm(w_ih, w_hh, b_ih, b_hh))
        in_dim = H
    return dict(conv_w=conv_w, conv_b=conv_b, lstm=lstm, fc_w=fc_w, fc_b=fc_b)


# ----------------------------------- forward -----------------------------------

def cnn_lstm_forward(x, seq_len, params):
    """x: (B, T, S, S) padded frame sequences; seq_len: (B,) int32 -> (B*T, O)."""
    B, T, S, _ = x.shape
    K, pool = 5, 2
    C = params["conv_b"].shape[0]
    Hp = (S - K + 1) // pool
    hw = Hp * Hp

    # conv + relu + maxpool: lane-dense (N, C, Hp*Wp) bf16 == torch flatten order
    imgs = x.reshape(B * T, S, S)
    patches = extract_pool_patches(imgs, K, pool)                 # gather-free, bf16
    w_mat = params["conv_w"].reshape(C, K * K).astype(jnp.bfloat16)   # (16, 25)
    b_col = params["conv_b"][:, None]                                 # (16, 1)
    pooled = conv_relu_pool(patches, w_mat, b_col, hw)            # (N, C, hw) bf16
    feats = pooled.reshape(B, T, C * hw)                          # (B, T, F) bf16

    len_col = seq_len.astype(jnp.int32)[:, None]                  # (B, 1)
    H = params["lstm"][0]["w_hh"].shape[0]
    layer_in = feats
    for lp in params["lstm"]:
        Fin = layer_in.shape[-1]
        # hoisted input projection: one parallel K-tiled matmul over all B*T rows
        gates = dense_bias(layer_in.reshape(B * T, Fin), lp["w_ih"], lp["b"])
        # batch-major, lane-concatenated over time: no wrapper transposes
        hs = lstm_layer(gates.reshape(B, T * 4 * H), len_col, lp["w_hh"], H)
        layer_in = hs.reshape(B, T, H)                            # (B, T, H)

    outs = layer_in.reshape(B * T, H)                             # view(-1, hidden)
    return fc_softmax(outs, params["fc_w"].T, params["fc_b"][None, :])


if __name__ == "__main__":
    B, T = 2, 4
    S = 36            # input_size (original: 100 -> 48*48*16 LSTM features)
    H = 32            # hidden_dim  (4H = 128 = one lane tile)
    O = 8             # output_size
    n_layers = 1

    key = jax.random.PRNGKey(0)
    kx, kp = jax.random.split(key)
    x = jax.random.normal(kx, (B, T, S, S), jnp.float32)
    seq_len = jnp.array([4, 3], jnp.int32)
    # emulate pad_sequence: frames past each sequence length are zero padding
    frame_mask = (jnp.arange(T)[None, :] < seq_len[:, None]).astype(jnp.float32)
    x = x * frame_mask[:, :, None, None]

    params = init_params(kp, S, 16, 5, H, O, n_layers)
    out = jax.jit(cnn_lstm_forward)(x, seq_len, params)
    jax.block_until_ready(out)
    assert out.shape == (B * T, O)
    assert bool(jnp.all(jnp.isfinite(out)))
    print("KERNEL_OK")
</pallas_src>

<mosaic_0001>
module attributes {stable_mosaic.version = 11 : i64} {
  func.func @_conv_kernel(%arg0: i32, %arg1: memref<16x25x1024xbf16, #tpu.memory_space<vmem>>, %arg2: memref<16x25xbf16, #tpu.memory_space<vmem>>, %arg3: memref<16x1xf32, #tpu.memory_space<vmem>>, %arg4: memref<16x16x256xbf16, #tpu.memory_space<vmem>>) attributes {dimension_semantics = [#tpu.dimension_semantics<parallel>], iteration_bounds = array<i64: 1>, scalar_prefetch = 0 : i64, scratch_operands = 0 : i64, tpu.core_type = #tpu.core_type<tc>, window_params = [{transform_indices = @transform_0, window_bounds = array<i64: 16, 25, 1024>}, {pipeline_mode = #tpu.pipeline_mode<synchronous>, transform_indices = @transform_1, window_bounds = array<i64: 16, 25>}, {pipeline_mode = #tpu.pipeline_mode<synchronous>, transform_indices = @transform_2, window_bounds = array<i64: 16, 1>}, {transform_indices = @transform_3, window_bounds = array<i64: 16, 16, 256>}]} {
    %c0 = arith.constant 0 : index
    %c0_0 = arith.constant 0 : index
    %0 = vector.load %arg2[%c0, %c0_0] : memref<16x25xbf16, #tpu.memory_space<vmem>>, vector<16x25xbf16>
    %c0_1 = arith.constant 0 : index
    %c0_2 = arith.constant 0 : index
    %1 = vector.load %arg3[%c0_1, %c0_2] : memref<16x1xf32, #tpu.memory_space<vmem>>, vector<16x1xf32>
    %c0_3 = arith.constant 0 : index
    %c0_4 = arith.constant 0 : index
    %c0_5 = arith.constant 0 : index
    %2 = vector.load %arg1[%c0_3, %c0_4, %c0_5] : memref<16x25x1024xbf16, #tpu.memory_space<vmem>>, vector<1x25x1024xbf16>
    %3 = vector.shape_cast %2 : vector<1x25x1024xbf16> to vector<25x1024xbf16>
    %cst = arith.constant dense<0.000000e+00> : vector<16x1024xf32>
    %4 = tpu.matmul %0, %3, %cst {dimension_numbers = #tpu.dot_dimension_numbers<[1], [0], [0], [1], [0, 0, 1, 1], [], []>} : vector<16x25xbf16>, vector<25x1024xbf16>, vector<16x1024xf32> -> vector<16x1024xf32>
    %5 = vector.extract_strided_slice %4 {offsets = [0, 0], sizes = [16, 256], strides = [1, 1]} : vector<16x1024xf32> to vector<16x256xf32>
    %6 = vector.extract_strided_slice %4 {offsets = [0, 256], sizes = [16, 256], strides = [1, 1]} : vector<16x1024xf32> to vector<16x256xf32>
    %7 = arith.maximumf %5, %6 : vector<16x256xf32>
    %8 = vector.extract_strided_slice %4 {offsets = [0, 512], sizes = [16, 256], strides = [1, 1]} : vector<16x1024xf32> to vector<16x256xf32>
    %9 = arith.maximumf %7, %8 : vector<16x256xf32>
    %10 = vector.extract_strided_slice %4 {offsets = [0, 768], sizes = [16, 256], strides = [1, 1]} : vector<16x1024xf32> to vector<16x256xf32>
    %11 = arith.maximumf %9, %10 : vector<16x256xf32>
    %12 = vector.broadcast %1 : vector<16x1xf32> to vector<16x256xf32>
    %13 = arith.addf %11, %12 : vector<16x256xf32>
    %cst_6 = arith.constant 0.000000e+00 : f32
    %14 = vector.broadcast %cst_6 : f32 to vector<16x256xf32>
    %15 = arith.maximumf %13, %14 : vector<16x256xf32>
    %16 = arith.truncf %15 : vector<16x256xf32> to vector<16x256xbf16>
    %c0_7 = arith.constant 0 : index
    %c0_8 = arith.constant 0 : index
    %c0_9 = arith.constant 0 : index
    %17 = vector.load %arg4[%c0_7, %c0_8, %c0_9] : memref<16x16x256xbf16, #tpu.memory_space<vmem>>, vector<1x16x256xbf16>
    %18 = vector.shape_cast %17 : vector<1x16x256xbf16> to vector<16x256xbf16>
    %19 = vector.shape_cast %16 : vector<16x256xbf16> to vector<1x16x256xbf16>
    tpu.vector_store %arg4[%c0_7, %c0_8, %c0_9], %19 {strides = array<i32>} : memref<16x16x256xbf16, #tpu.memory_space<vmem>>, vector<1x16x256xbf16>,
    %c1 = arith.constant 1 : index
    %c0_10 = arith.constant 0 : index
    %c0_11 = arith.constant 0 : index
    %20 = vector.load %arg1[%c1, %c0_10, %c0_11] : memref<16x25x1024xbf16, #tpu.memory_space<vmem>>, vector<1x25x1024xbf16>
    %21 = vector.shape_cast %20 : vector<1x25x1024xbf16> to vector<25x1024xbf16>
    %cst_12 = arith.constant dense<0.000000e+00> : vector<16x1024xf32>
    %22 = tpu.matmul %0, %21, %cst_12 {dimension_numbers = #tpu.dot_dimension_numbers<[1], [0], [0], [1], [0, 0, 1, 1], [], []>} : vector<16x25xbf16>, vector<25x1024xbf16>, vector<16x1024xf32> -> vector<16x1024xf32>
    %23 = vector.extract_strided_slice %22 {offsets = [0, 0], sizes = [16, 256], strides = [1, 1]} : vector<16x1024xf32> to vector<16x256xf32>
    %24 = vector.extract_strided_slice %22 {offsets = [0, 256], sizes = [16, 256], strides = [1, 1]} : vector<16x1024xf32> to vector<16x256xf32>
    %25 = arith.maximumf %23, %24 : vector<16x256xf32>
    %26 = vector.extract_strided_slice %22 {offsets = [0, 512], sizes = [16, 256], strides = [1, 1]} : vector<16x1024xf32> to vector<16x256xf32>
    %27 = arith.maximumf %25, %26 : vector<16x256xf32>
    %28 = vector.extract_strided_slice %22 {offsets = [0, 768], sizes = [16, 256], strides = [1, 1]} : vector<16x1024xf32> to vector<16x256xf32>
    %29 = arith.maximumf %27, %28 : vector<16x256xf32>
    %30 = vector.broadcast %1 : vector<16x1xf32> to vector<16x256xf32>
    %31 = arith.addf %29, %30 : vector<16x256xf32>
    %cst_13 = arith.constant 0.000000e+00 : f32
    %32 = vector.broadcast %cst_13 : f32 to vector<16x256xf32>
    %33 = arith.maximumf %31, %32 : vector<16x256xf32>
    %34 = arith.truncf %33 : vector<16x256xf32> to vector<16x256xbf16>
    %c1_14 = arith.constant 1 : index
    %c0_15 = arith.constant 0 : index
    %c0_16 = arith.constant 0 : index
    %35 = vector.load %arg4[%c1_14, %c0_15, %c0_16] : memref<16x16x256xbf16, #tpu.memory_space<vmem>>, vector<1x16x256xbf16>
    %36 = vector.shape_cast %35 : vector<1x16x256xbf16> to vector<16x256xbf16>
    %37 = vector.shape_cast %34 : vector<16x256xbf16> to vector<1x16x256xbf16>
    tpu.vector_store %arg4[%c1_14, %c0_15, %c0_16], %37 {strides = array<i32>} : memref<16x16x256xbf16, #tpu.memory_space<vmem>>, vector<1x16x256xbf16>,
    %c2 = arith.constant 2 : index
    %c0_17 = arith.constant 0 : index
    %c0_18 = arith.constant 0 : index
    %38 = vector.load %arg1[%c2, %c0_17, %c0_18] : memref<16x25x1024xbf16, #tpu.memory_space<vmem>>, vector<1x25x1024xbf16>
    %39 = vector.shape_cast %38 : vector<1x25x1024xbf16> to vector<25x1024xbf16>
    %cst_19 = arith.constant dense<0.000000e+00> : vector<16x1024xf32>
    %40 = tpu.matmul %0, %39, %cst_19 {dimension_numbers = #tpu.dot_dimension_numbers<[1], [0], [0], [1], [0, 0, 1, 1], [], []>} : vector<16x25xbf16>, vector<25x1024xbf16>, vector<16x1024xf32> -> vector<16x1024xf32>
    %41 = vector.extract_strided_slice %40 {offsets = [0, 0], sizes = [16, 256], strides = [1, 1]} : vector<16x1024xf32> to vector<16x256xf32>
    %42 = vector.extract_strided_slice %40 {offsets = [0, 256], sizes = [16, 256], strides = [1, 1]} : vector<16x1024xf32> to vector<16x256xf32>
    %43 = arith.maximumf %41, %42 : vector<16x256xf32>
    %44 = vector.extract_strided_slice %40 {offsets = [0, 512], sizes = [16, 256], strides = [1, 1]} : vector<16x1024xf32> to vector<16x256xf32>
    %45 = arith.maximumf %43, %44 : vector<16x256xf32>
    %46 = vector.extract_strided_slice %40 {offsets = [0, 768], sizes = [16, 256], strides = [1, 1]} : vector<16x1024xf32> to vector<16x256xf32>
    %47 = arith.maximumf %45, %46 : vector<16x256xf32>
    %48 = vector.broadcast %1 : vector<16x1xf32> to vector<16x256xf32>
    %49 = arith.addf %47, %48 : vector<16x256xf32>
    %cst_20 = arith.constant 0.000000e+00 : f32
    %50 = vector.broadcast %cst_20 : f32 to vector<16x256xf32>
    %51 = arith.maximumf %49, %50 : vector<16x256xf32>
    %52 = arith.truncf %51 : vector<16x256xf32> to vector<16x256xbf16>
    %c2_21 = arith.constant 2 : index
    %c0_22 = arith.constant 0 : index
    %c0_23 = arith.constant 0 : index
    %53 = vector.load %arg4[%c2_21, %c0_22, %c0_23] : memref<16x16x256xbf16, #tpu.memory_space<vmem>>, vector<1x16x256xbf16>
    %54 = vector.shape_cast %53 : vector<1x16x256xbf16> to vector<16x256xbf16>
    %55 = vector.shape_cast %52 : vector<16x256xbf16> to vector<1x16x256xbf16>
    tpu.vector_store %arg4[%c2_21, %c0_22, %c0_23], %55 {strides = array<i32>} : memref<16x16x256xbf16, #tpu.memory_space<vmem>>, vector<1x16x256xbf16>,
    %c3 = arith.constant 3 : index
    %c0_24 = arith.constant 0 : index
    %c0_25 = arith.constant 0 : index
    %56 = vector.load %arg1[%c3, %c0_24, %c0_25] : memref<16x25x1024xbf16, #tpu.memory_space<vmem>>, vector<1x25x1024xbf16>
    %57 = vector.shape_cast %56 : vector<1x25x1024xbf16> to vector<25x1024xbf16>
    %cst_26 = arith.constant dense<0.000000e+00> : vector<16x1024xf32>
    %58 = tpu.matmul %0, %57, %cst_26 {dimension_numbers = #tpu.dot_dimension_numbers<[1], [0], [0], [1], [0, 0, 1, 1], [], []>} : vector<16x25xbf16>, vector<25x1024xbf16>, vector<16x1024xf32> -> vector<16x1024xf32>
    %59 = vector.extract_strided_slice %58 {offsets = [0, 0], sizes = [16, 256], strides = [1, 1]} : vector<16x1024xf32> to vector<16x256xf32>
    %60 = vector.extract_strided_slice %58 {offsets = [0, 256], sizes = [16, 256], strides = [1, 1]} : vector<16x1024xf32> to vector<16x256xf32>
    %61 = arith.maximumf %59, %60 : vector<16x256xf32>
    %62 = vector.extract_strided_slice %58 {offsets = [0, 512], sizes = [16, 256], strides = [1, 1]} : vector<16x1024xf32> to vector<16x256xf32>
    %63 = arith.maximumf %61, %62 : vector<16x256xf32>
    %64 = vector.extract_strided_slice %58 {offsets = [0, 768], sizes = [16, 256], strides = [1, 1]} : vector<16x1024xf32> to vector<16x256xf32>
    %65 = arith.maximumf %63, %64 : vector<16x256xf32>
    %66 = vector.broadcast %1 : vector<16x1xf32> to vector<16x256xf32>
    %67 = arith.addf %65, %66 : vector<16x256xf32>
    %cst_27 = arith.constant 0.000000e+00 : f32
    %68 = vector.broadcast %cst_27 : f32 to vector<16x256xf32>
    %69 = arith.maximumf %67, %68 : vector<16x256xf32>
    %70 = arith.truncf %69 : vector<16x256xf32> to vector<16x256xbf16>
    %c3_28 = arith.constant 3 : index
    %c0_29 = arith.constant 0 : index
    %c0_30 = arith.constant 0 : index
    %71 = vector.load %arg4[%c3_28, %c0_29, %c0_30] : memref<16x16x256xbf16, #tpu.memory_space<vmem>>, vector<1x16x256xbf16>
    %72 = vector.shape_cast %71 : vector<1x16x256xbf16> to vector<16x256xbf16>
    %73 = vector.shape_cast %70 : vector<16x256xbf16> to vector<1x16x256xbf16>
    tpu.vector_store %arg4[%c3_28, %c0_29, %c0_30], %73 {strides = array<i32>} : memref<16x16x256xbf16, #tpu.memory_space<vmem>>, vector<1x16x256xbf16>,
    %c4 = arith.constant 4 : index
    %c0_31 = arith.constant 0 : index
    %c0_32 = arith.constant 0 : index
    %74 = vector.load %arg1[%c4, %c0_31, %c0_32] : memref<16x25x1024xbf16, #tpu.memory_space<vmem>>, vector<1x25x1024xbf16>
    %75 = vector.shape_cast %74 : vector<1x25x1024xbf16> to vector<25x1024xbf16>
    %cst_33 = arith.constant dense<0.000000e+00> : vector<16x1024xf32>
    %76 = tpu.matmul %0, %75, %cst_33 {dimension_numbers = #tpu.dot_dimension_numbers<[1], [0], [0], [1], [0, 0, 1, 1], [], []>} : vector<16x25xbf16>, vector<25x1024xbf16>, vector<16x1024xf32> -> vector<16x1024xf32>
    %77 = vector.extract_strided_slice %76 {offsets = [0, 0], sizes = [16, 256], strides = [1, 1]} : vector<16x1024xf32> to vector<16x256xf32>
    %78 = vector.extract_strided_slice %76 {offsets = [0, 256], sizes = [16, 256], strides = [1, 1]} : vector<16x1024xf32> to vector<16x256xf32>
    %79 = arith.maximumf %77, %78 : vector<16x256xf32>
    %80 = vector.extract_strided_slice %76 {offsets = [0, 512], sizes = [16, 256], strides = [1, 1]} : vector<16x1024xf32> to vector<16x256xf32>
    %81 = arith.maximumf %79, %80 : vector<16x256xf32>
    %82 = vector.extract_strided_slice %76 {offsets = [0, 768], sizes = [16, 256], strides = [1, 1]} : vector<16x1024xf32> to vector<16x256xf32>
    %83 = arith.maximumf %81, %82 : vector<16x256xf32>
    %84 = vector.broadcast %1 : vector<16x1xf32> to vector<16x256xf32>
    %85 = arith.addf %83, %84 : vector<16x256xf32>
    %cst_34 = arith.constant 0.000000e+00 : f32
    %86 = vector.broadcast %cst_34 : f32 to vector<16x256xf32>
    %87 = arith.maximumf %85, %86 : vector<16x256xf32>
    %88 = arith.truncf %87 : vector<16x256xf32> to vector<16x256xbf16>
    %c4_35 = arith.constant 4 : index
    %c0_36 = arith.constant 0 : index
    %c0_37 = arith.constant 0 : index
    %89 = vector.load %arg4[%c4_35, %c0_36, %c0_37] : memref<16x16x256xbf16, #tpu.memory_space<vmem>>, vector<1x16x256xbf16>
    %90 = vector.shape_cast %89 : vector<1x16x256xbf16> to vector<16x256xbf16>
    %91 = vector.shape_cast %88 : vector<16x256xbf16> to vector<1x16x256xbf16>
    tpu.vector_store %arg4[%c4_35, %c0_36, %c0_37], %91 {strides = array<i32>} : memref<16x16x256xbf16, #tpu.memory_space<vmem>>, vector<1x16x256xbf16>,
    %c5 = arith.constant 5 : index
    %c0_38 = arith.constant 0 : index
    %c0_39 = arith.constant 0 : index
    %92 = vector.load %arg1[%c5, %c0_38, %c0_39] : memref<16x25x1024xbf16, #tpu.memory_space<vmem>>, vector<1x25x1024xbf16>
    %93 = vector.shape_cast %92 : vector<1x25x1024xbf16> to vector<25x1024xbf16>
    %cst_40 = arith.constant dense<0.000000e+00> : vector<16x1024xf32>
    %94 = tpu.matmul %0, %93, %cst_40 {dimension_numbers = #tpu.dot_dimension_numbers<[1], [0], [0], [1], [0, 0, 1, 1], [], []>} : vector<16x25xbf16>, vector<25x1024xbf16>, vector<16x1024xf32> -> vector<16x1024xf32>
    %95 = vector.extract_strided_slice %94 {offsets = [0, 0], sizes = [16, 256], strides = [1, 1]} : vector<16x1024xf32> to vector<16x256xf32>
    %96 = vector.extract_strided_slice %94 {offsets = [0, 256], sizes = [16, 256], strides = [1, 1]} : vector<16x1024xf32> to vector<16x256xf32>
    %97 = arith.maximumf %95, %96 : vector<16x256xf32>
    %98 = vector.extract_strided_slice %94 {offsets = [0, 512], sizes = [16, 256], strides = [1, 1]} : vector<16x1024xf32> to vector<16x256xf32>
    %99 = arith.maximumf %97, %98 : vector<16x256xf32>
    %100 = vector.extract_strided_slice %94 {offsets = [0, 768], sizes = [16, 256], strides = [1, 1]} : vector<16x1024xf32> to vector<16x256xf32>
    %101 = arith.maximumf %99, %100 : vector<16x256xf32>
    %102 = vector.broadcast %1 : vector<16x1xf32> to vector<16x256xf32>
    %103 = arith.addf %101, %102 : vector<16x256xf32>
    %cst_41 = arith.constant 0.000000e+00 : f32
    %104 = vector.broadcast %cst_41 : f32 to vector<16x256xf32>
    %105 = arith.maximumf %103, %104 : vector<16x256xf32>
    %106 = arith.truncf %105 : vector<16x256xf32> to vector<16x256xbf16>
    %c5_42 = arith.constant 5 : index
    %c0_43 = arith.constant 0 : index
    %c0_44 = arith.constant 0 : index
    %107 = vector.load %arg4[%c5_42, %c0_43, %c0_44] : memref<16x16x256xbf16, #tpu.memory_space<vmem>>, vector<1x16x256xbf16>
    %108 = vector.shape_cast %107 : vector<1x16x256xbf16> to vector<16x256xbf16>
    %109 = vector.shape_cast %106 : vector<16x256xbf16> to vector<1x16x256xbf16>
    tpu.vector_store %arg4[%c5_42, %c0_43, %c0_44], %109 {strides = array<i32>} : memref<16x16x256xbf16, #tpu.memory_space<vmem>>, vector<1x16x256xbf16>,
    %c6 = arith.constant 6 : index
    %c0_45 = arith.constant 0 : index
    %c0_46 = arith.constant 0 : index
    %110 = vector.load %arg1[%c6, %c0_45, %c0_46] : memref<16x25x1024xbf16, #tpu.memory_space<vmem>>, vector<1x25x1024xbf16>
    %111 = vector.shape_cast %110 : vector<1x25x1024xbf16> to vector<25x1024xbf16>
    %cst_47 = arith.constant dense<0.000000e+00> : vector<16x1024xf32>
    %112 = tpu.matmul %0, %111, %cst_47 {dimension_numbers = #tpu.dot_dimension_numbers<[1], [0], [0], [1], [0, 0, 1, 1], [], []>} : vector<16x25xbf16>, vector<25x1024xbf16>, vector<16x1024xf32> -> vector<16x1024xf32>
    %113 = vector.extract_strided_slice %112 {offsets = [0, 0], sizes = [16, 256], strides = [1, 1]} : vector<16x1024xf32> to vector<16x256xf32>
    %114 = vector.extract_strided_slice %112 {offsets = [0, 256], sizes = [16, 256], strides = [1, 1]} : vector<16x1024xf32> to vector<16x256xf32>
    %115 = arith.maximumf %113, %114 : vector<16x256xf32>
    %116 = vector.extract_strided_slice %112 {offsets = [0, 512], sizes = [16, 256], strides = [1, 1]} : vector<16x1024xf32> to vector<16x256xf32>
    %117 = arith.maximumf %115, %116 : vector<16x256xf32>
    %118 = vector.extract_strided_slice %112 {offsets = [0, 768], sizes = [16, 256], strides = [1, 1]} : vector<16x1024xf32> to vector<16x256xf32>
    %119 = arith.maximumf %117, %118 : vector<16x256xf32>
    %120 = vector.broadcast %1 : vector<16x1xf32> to vector<16x256xf32>
    %121 = arith.addf %119, %120 : vector<16x256xf32>
    %cst_48 = arith.constant 0.000000e+00 : f32
    %122 = vector.broadcast %cst_48 : f32 to vector<16x256xf32>
    %123 = arith.maximumf %121, %122 : vector<16x256xf32>
    %124 = arith.truncf %123 : vector<16x256xf32> to vector<16x256xbf16>
    %c6_49 = arith.constant 6 : index
    %c0_50 = arith.constant 0 : index
    %c0_51 = arith.constant 0 : index
    %125 = vector.load %arg4[%c6_49, %c0_50, %c0_51] : memref<16x16x256xbf16, #tpu.memory_space<vmem>>, vector<1x16x256xbf16>
    %126 = vector.shape_cast %125 : vector<1x16x256xbf16> to vector<16x256xbf16>
    %127 = vector.shape_cast %124 : vector<16x256xbf16> to vector<1x16x256xbf16>
    tpu.vector_store %arg4[%c6_49, %c0_50, %c0_51], %127 {strides = array<i32>} : memref<16x16x256xbf16, #tpu.memory_space<vmem>>, vector<1x16x256xbf16>,
    %c7 = arith.constant 7 : index
    %c0_52 = arith.constant 0 : index
    %c0_53 = arith.constant 0 : index
    %128 = vector.load %arg1[%c7, %c0_52, %c0_53] : memref<16x25x1024xbf16, #tpu.memory_space<vmem>>, vector<1x25x1024xbf16>
    %129 = vector.shape_cast %128 : vector<1x25x1024xbf16> to vector<25x1024xbf16>
    %cst_54 = arith.constant dense<0.000000e+00> : vector<16x1024xf32>
    %130 = tpu.matmul %0, %129, %cst_54 {dimension_numbers = #tpu.dot_dimension_numbers<[1], [0], [0], [1], [0, 0, 1, 1], [], []>} : vector<16x25xbf16>, vector<25x1024xbf16>, vector<16x1024xf32> -> vector<16x1024xf32>
    %131 = vector.extract_strided_slice %130 {offsets = [0, 0], sizes = [16, 256], strides = [1, 1]} : vector<16x1024xf32> to vector<16x256xf32>
    %132 = vector.extract_strided_slice %130 {offsets = [0, 256], sizes = [16, 256], strides = [1, 1]} : vector<16x1024xf32> to vector<16x256xf32>
    %133 = arith.maximumf %131, %132 : vector<16x256xf32>
    %134 = vector.extract_strided_slice %130 {offsets = [0, 512], sizes = [16, 256], strides = [1, 1]} : vector<16x1024xf32> to vector<16x256xf32>
    %135 = arith.maximumf %133, %134 : vector<16x256xf32>
    %136 = vector.extract_strided_slice %130 {offsets = [0, 768], sizes = [16, 256], strides = [1, 1]} : vector<16x1024xf32> to vector<16x256xf32>
    %137 = arith.maximumf %135, %136 : vector<16x256xf32>
    %138 = vector.broadcast %1 : vector<16x1xf32> to vector<16x256xf32>
    %139 = arith.addf %137, %138 : vector<16x256xf32>
    %cst_55 = arith.constant 0.000000e+00 : f32
    %140 = vector.broadcast %cst_55 : f32 to vector<16x256xf32>
    %141 = arith.maximumf %139, %140 : vector<16x256xf32>
    %142 = arith.truncf %141 : vector<16x256xf32> to vector<16x256xbf16>
    %c7_56 = arith.constant 7 : index
    %c0_57 = arith.constant 0 : index
    %c0_58 = arith.constant 0 : index
    %143 = vector.load %arg4[%c7_56, %c0_57, %c0_58] : memref<16x16x256xbf16, #tpu.memory_space<vmem>>, vector<1x16x256xbf16>
    %144 = vector.shape_cast %143 : vector<1x16x256xbf16> to vector<16x256xbf16>
    %145 = vector.shape_cast %142 : vector<16x256xbf16> to vector<1x16x256xbf16>
    tpu.vector_store %arg4[%c7_56, %c0_57, %c0_58], %145 {strides = array<i32>} : memref<16x16x256xbf16, #tpu.memory_space<vmem>>, vector<1x16x256xbf16>,
    %c8 = arith.constant 8 : index
    %c0_59 = arith.constant 0 : index
    %c0_60 = arith.constant 0 : index
    %146 = vector.load %arg1[%c8, %c0_59, %c0_60] : memref<16x25x1024xbf16, #tpu.memory_space<vmem>>, vector<1x25x1024xbf16>
    %147 = vector.shape_cast %146 : vector<1x25x1024xbf16> to vector<25x1024xbf16>
    %cst_61 = arith.constant dense<0.000000e+00> : vector<16x1024xf32>
    %148 = tpu.matmul %0, %147, %cst_61 {dimension_numbers = #tpu.dot_dimension_numbers<[1], [0], [0], [1], [0, 0, 1, 1], [], []>} : vector<16x25xbf16>, vector<25x1024xbf16>, vector<16x1024xf32> -> vector<16x1024xf32>
    %149 = vector.extract_strided_slice %148 {offsets = [0, 0], sizes = [16, 256], strides = [1, 1]} : vector<16x1024xf32> to vector<16x256xf32>
    %150 = vector.extract_strided_slice %148 {offsets = [0, 256], sizes = [16, 256], strides = [1, 1]} : vector<16x1024xf32> to vector<16x256xf32>
    %151 = arith.maximumf %149, %150 : vector<16x256xf32>
    %152 = vector.extract_strided_slice %148 {offsets = [0, 512], sizes = [16, 256], strides = [1, 1]} : vector<16x1024xf32> to vector<16x256xf32>
    %153 = arith.maximumf %151, %152 : vector<16x256xf32>
    %154 = vector.extract_strided_slice %148 {offsets = [0, 768], sizes = [16, 256], strides = [1, 1]} : vector<16x1024xf32> to vector<16x256xf32>
    %155 = arith.maximumf %153, %154 : vector<16x256xf32>
    %156 = vector.broadcast %1 : vector<16x1xf32> to vector<16x256xf32>
    %157 = arith.addf %155, %156 : vector<16x256xf32>
    %cst_62 = arith.constant 0.000000e+00 : f32
    %158 = vector.broadcast %cst_62 : f32 to vector<16x256xf32>
    %159 = arith.maximumf %157, %158 : vector<16x256xf32>
    %160 = arith.truncf %159 : vector<16x256xf32> to vector<16x256xbf16>
    %c8_63 = arith.constant 8 : index
    %c0_64 = arith.constant 0 : index
    %c0_65 = arith.constant 0 : index
    %161 = vector.load %arg4[%c8_63, %c0_64, %c0_65] : memref<16x16x256xbf16, #tpu.memory_space<vmem>>, vector<1x16x256xbf16>
    %162 = vector.shape_cast %161 : vector<1x16x256xbf16> to vector<16x256xbf16>
    %163 = vector.shape_cast %160 : vector<16x256xbf16> to vector<1x16x256xbf16>
    tpu.vector_store %arg4[%c8_63, %c0_64, %c0_65], %163 {strides = array<i32>} : memref<16x16x256xbf16, #tpu.memory_space<vmem>>, vector<1x16x256xbf16>,
    %c9 = arith.constant 9 : index
    %c0_66 = arith.constant 0 : index
    %c0_67 = arith.constant 0 : index
    %164 = vector.load %arg1[%c9, %c0_66, %c0_67] : memref<16x25x1024xbf16, #tpu.memory_space<vmem>>, vector<1x25x1024xbf16>
    %165 = vector.shape_cast %164 : vector<1x25x1024xbf16> to vector<25x1024xbf16>
    %cst_68 = arith.constant dense<0.000000e+00> : vector<16x1024xf32>
    %166 = tpu.matmul %0, %165, %cst_68 {dimension_numbers = #tpu.dot_dimension_numbers<[1], [0], [0], [1], [0, 0, 1, 1], [], []>} : vector<16x25xbf16>, vector<25x1024xbf16>, vector<16x1024xf32> -> vector<16x1024xf32>
    %167 = vector.extract_strided_slice %166 {offsets = [0, 0], sizes = [16, 256], strides = [1, 1]} : vector<16x1024xf32> to vector<16x256xf32>
    %168 = vector.extract_strided_slice %166 {offsets = [0, 256], sizes = [16, 256], strides = [1, 1]} : vector<16x1024xf32> to vector<16x256xf32>
    %169 = arith.maximumf %167, %168 : vector<16x256xf32>
    %170 = vector.extract_strided_slice %166 {offsets = [0, 512], sizes = [16, 256], strides = [1, 1]} : vector<16x1024xf32> to vector<16x256xf32>
    %171 = arith.maximumf %169, %170 : vector<16x256xf32>
    %172 = vector.extract_strided_slice %166 {offsets = [0, 768], sizes = [16, 256], strides = [1, 1]} : vector<16x1024xf32> to vector<16x256xf32>
    %173 = arith.maximumf %171, %172 : vector<16x256xf32>
    %174 = vector.broadcast %1 : vector<16x1xf32> to vector<16x256xf32>
    %175 = arith.addf %173, %174 : vector<16x256xf32>
    %cst_69 = arith.constant 0.000000e+00 : f32
    %176 = vector.broadcast %cst_69 : f32 to vector<16x256xf32>
    %177 = arith.maximumf %175, %176 : vector<16x256xf32>
    %178 = arith.truncf %177 : vector<16x256xf32> to vector<16x256xbf16>
    %c9_70 = arith.constant 9 : index
    %c0_71 = arith.constant 0 : index
    %c0_72 = arith.constant 0 : index
    %179 = vector.load %arg4[%c9_70, %c0_71, %c0_72] : memref<16x16x256xbf16, #tpu.memory_space<vmem>>, vector<1x16x256xbf16>
    %180 = vector.shape_cast %179 : vector<1x16x256xbf16> to vector<16x256xbf16>
    %181 = vector.shape_cast %178 : vector<16x256xbf16> to vector<1x16x256xbf16>
    tpu.vector_store %arg4[%c9_70, %c0_71, %c0_72], %181 {strides = array<i32>} : memref<16x16x256xbf16, #tpu.memory_space<vmem>>, vector<1x16x256xbf16>,
    %c10 = arith.constant 10 : index
    %c0_73 = arith.constant 0 : index
    %c0_74 = arith.constant 0 : index
    %182 = vector.load %arg1[%c10, %c0_73, %c0_74] : memref<16x25x1024xbf16, #tpu.memory_space<vmem>>, vector<1x25x1024xbf16>
    %183 = vector.shape_cast %182 : vector<1x25x1024xbf16> to vector<25x1024xbf16>
    %cst_75 = arith.constant dense<0.000000e+00> : vector<16x1024xf32>
    %184 = tpu.matmul %0, %183, %cst_75 {dimension_numbers = #tpu.dot_dimension_numbers<[1], [0], [0], [1], [0, 0, 1, 1], [], []>} : vector<16x25xbf16>, vector<25x1024xbf16>, vector<16x1024xf32> -> vector<16x1024xf32>
    %185 = vector.extract_strided_slice %184 {offsets = [0, 0], sizes = [16, 256], strides = [1, 1]} : vector<16x1024xf32> to vector<16x256xf32>
    %186 = vector.extract_strided_slice %184 {offsets = [0, 256], sizes = [16, 256], strides = [1, 1]} : vector<16x1024xf32> to vector<16x256xf32>
    %187 = arith.maximumf %185, %186 : vector<16x256xf32>
    %188 = vector.extract_strided_slice %184 {offsets = [0, 512], sizes = [16, 256], strides = [1, 1]} : vector<16x1024xf32> to vector<16x256xf32>
    %189 = arith.maximumf %187, %188 : vector<16x256xf32>
    %190 = vector.extract_strided_slice %184 {offsets = [0, 768], sizes = [16, 256], strides = [1, 1]} : vector<16x1024xf32> to vector<16x256xf32>
    %191 = arith.maximumf %189, %190 : vector<16x256xf32>
    %192 = vector.broadcast %1 : vector<16x1xf32> to vector<16x256xf32>
    %193 = arith.addf %191, %192 : vector<16x256xf32>
    %cst_76 = arith.constant 0.000000e+00 : f32
    %194 = vector.broadcast %cst_76 : f32 to vector<16x256xf32>
    %195 = arith.maximumf %193, %194 : vector<16x256xf32>
    %196 = arith.truncf %195 : vector<16x256xf32> to vector<16x256xbf16>
    %c10_77 = arith.constant 10 : index
    %c0_78 = arith.constant 0 : index
    %c0_79 = arith.constant 0 : index
    %197 = vector.load %arg4[%c10_77, %c0_78, %c0_79] : memref<16x16x256xbf16, #tpu.memory_space<vmem>>, vector<1x16x256xbf16>
    %198 = vector.shape_cast %197 : vector<1x16x256xbf16> to vector<16x256xbf16>
    %199 = vector.shape_cast %196 : vector<16x256xbf16> to vector<1x16x256xbf16>
    tpu.vector_store %arg4[%c10_77, %c0_78, %c0_79], %199 {strides = array<i32>} : memref<16x16x256xbf16, #tpu.memory_space<vmem>>, vector<1x16x256xbf16>,
    %c11 = arith.constant 11 : index
    %c0_80 = arith.constant 0 : index
    %c0_81 = arith.constant 0 : index
    %200 = vector.load %arg1[%c11, %c0_80, %c0_81] : memref<16x25x1024xbf16, #tpu.memory_space<vmem>>, vector<1x25x1024xbf16>
    %201 = vector.shape_cast %200 : vector<1x25x1024xbf16> to vector<25x1024xbf16>
    %cst_82 = arith.constant dense<0.000000e+00> : vector<16x1024xf32>
    %202 = tpu.matmul %0, %201, %cst_82 {dimension_numbers = #tpu.dot_dimension_numbers<[1], [0], [0], [1], [0, 0, 1, 1], [], []>} : vector<16x25xbf16>, vector<25x1024xbf16>, vector<16x1024xf32> -> vector<16x1024xf32>
    %203 = vector.extract_strided_slice %202 {offsets = [0, 0], sizes = [16, 256], strides = [1, 1]} : vector<16x1024xf32> to vector<16x256xf32>
    %204 = vector.extract_strided_slice %202 {offsets = [0, 256], sizes = [16, 256], strides = [1, 1]} : vector<16x1024xf32> to vector<16x256xf32>
    %205 = arith.maximumf %203, %204 : vector<16x256xf32>
    %206 = vector.extract_strided_slice %202 {offsets = [0, 512], sizes = [16, 256], strides = [1, 1]} : vector<16x1024xf32> to vector<16x256xf32>
    %207 = arith.maximumf %205, %206 : vector<16x256xf32>
    %208 = vector.extract_strided_slice %202 {offsets = [0, 768], sizes = [16, 256], strides = [1, 1]} : vector<16x1024xf32> to vector<16x256xf32>
    %209 = arith.maximumf %207, %208 : vector<16x256xf32>
    %210 = vector.broadcast %1 : vector<16x1xf32> to vector<16x256xf32>
    %211 = arith.addf %209, %210 : vector<16x256xf32>
    %cst_83 = arith.constant 0.000000e+00 : f32
    %212 = vector.broadcast %cst_83 : f32 to vector<16x256xf32>
    %213 = arith.maximumf %211, %212 : vector<16x256xf32>
    %214 = arith.truncf %213 : vector<16x256xf32> to vector<16x256xbf16>
    %c11_84 = arith.constant 11 : index
    %c0_85 = arith.constant 0 : index
    %c0_86 = arith.constant 0 : index
    %215 = vector.load %arg4[%c11_84, %c0_85, %c0_86] : memref<16x16x256xbf16, #tpu.memory_space<vmem>>, vector<1x16x256xbf16>
    %216 = vector.shape_cast %215 : vector<1x16x256xbf16> to vector<16x256xbf16>
    %217 = vector.shape_cast %214 : vector<16x256xbf16> to vector<1x16x256xbf16>
    tpu.vector_store %arg4[%c11_84, %c0_85, %c0_86], %217 {strides = array<i32>} : memref<16x16x256xbf16, #tpu.memory_space<vmem>>, vector<1x16x256xbf16>,
    %c12 = arith.constant 12 : index
    %c0_87 = arith.constant 0 : index
    %c0_88 = arith.constant 0 : index
    %218 = vector.load %arg1[%c12, %c0_87, %c0_88] : memref<16x25x1024xbf16, #tpu.memory_space<vmem>>, vector<1x25x1024xbf16>
    %219 = vector.shape_cast %218 : vector<1x25x1024xbf16> to vector<25x1024xbf16>
    %cst_89 = arith.constant dense<0.000000e+00> : vector<16x1024xf32>
    %220 = tpu.matmul %0, %219, %cst_89 {dimension_numbers = #tpu.dot_dimension_numbers<[1], [0], [0], [1], [0, 0, 1, 1], [], []>} : vector<16x25xbf16>, vector<25x1024xbf16>, vector<16x1024xf32> -> vector<16x1024xf32>
    %221 = vector.extract_strided_slice %220 {offsets = [0, 0], sizes = [16, 256], strides = [1, 1]} : vector<16x1024xf32> to vector<16x256xf32>
    %222 = vector.extract_strided_slice %220 {offsets = [0, 256], sizes = [16, 256], strides = [1, 1]} : vector<16x1024xf32> to vector<16x256xf32>
    %223 = arith.maximumf %221, %222 : vector<16x256xf32>
    %224 = vector.extract_strided_slice %220 {offsets = [0, 512], sizes = [16, 256], strides = [1, 1]} : vector<16x1024xf32> to vector<16x256xf32>
    %225 = arith.maximumf %223, %224 : vector<16x256xf32>
    %226 = vector.extract_strided_slice %220 {offsets = [0, 768], sizes = [16, 256], strides = [1, 1]} : vector<16x1024xf32> to vector<16x256xf32>
    %227 = arith.maximumf %225, %226 : vector<16x256xf32>
    %228 = vector.broadcast %1 : vector<16x1xf32> to vector<16x256xf32>
    %229 = arith.addf %227, %228 : vector<16x256xf32>
    %cst_90 = arith.constant 0.000000e+00 : f32
    %230 = vector.broadcast %cst_90 : f32 to vector<16x256xf32>
    %231 = arith.maximumf %229, %230 : vector<16x256xf32>
    %232 = arith.truncf %231 : vector<16x256xf32> to vector<16x256xbf16>
    %c12_91 = arith.constant 12 : index
    %c0_92 = arith.constant 0 : index
    %c0_93 = arith.constant 0 : index
    %233 = vector.load %arg4[%c12_91, %c0_92, %c0_93] : memref<16x16x256xbf16, #tpu.memory_space<vmem>>, vector<1x16x256xbf16>
    %234 = vector.shape_cast %233 : vector<1x16x256xbf16> to vector<16x256xbf16>
    %235 = vector.shape_cast %232 : vector<16x256xbf16> to vector<1x16x256xbf16>
    tpu.vector_store %arg4[%c12_91, %c0_92, %c0_93], %235 {strides = array<i32>} : memref<16x16x256xbf16, #tpu.memory_space<vmem>>, vector<1x16x256xbf16>,
    %c13 = arith.constant 13 : index
    %c0_94 = arith.constant 0 : index
    %c0_95 = arith.constant 0 : index
    %236 = vector.load %arg1[%c13, %c0_94, %c0_95] : memref<16x25x1024xbf16, #tpu.memory_space<vmem>>, vector<1x25x1024xbf16>
    %237 = vector.shape_cast %236 : vector<1x25x1024xbf16> to vector<25x1024xbf16>
    %cst_96 = arith.constant dense<0.000000e+00> : vector<16x1024xf32>
    %238 = tpu.matmul %0, %237, %cst_96 {dimension_numbers = #tpu.dot_dimension_numbers<[1], [0], [0], [1], [0, 0, 1, 1], [], []>} : vector<16x25xbf16>, vector<25x1024xbf16>, vector<16x1024xf32> -> vector<16x1024xf32>
    %239 = vector.extract_strided_slice %238 {offsets = [0, 0], sizes = [16, 256], strides = [1, 1]} : vector<16x1024xf32> to vector<16x256xf32>
    %240 = vector.extract_strided_slice %238 {offsets = [0, 256], sizes = [16, 256], strides = [1, 1]} : vector<16x1024xf32> to vector<16x256xf32>
    %241 = arith.maximumf %239, %240 : vector<16x256xf32>
    %242 = vector.extract_strided_slice %238 {offsets = [0, 512], sizes = [16, 256], strides = [1, 1]} : vector<16x1024xf32> to vector<16x256xf32>
    %243 = arith.maximumf %241, %242 : vector<16x256xf32>
    %244 = vector.extract_strided_slice %238 {offsets = [0, 768], sizes = [16, 256], strides = [1, 1]} : vector<16x1024xf32> to vector<16x256xf32>
    %245 = arith.maximumf %243, %244 : vector<16x256xf32>
    %246 = vector.broadcast %1 : vector<16x1xf32> to vector<16x256xf32>
    %247 = arith.addf %245, %246 : vector<16x256xf32>
    %cst_97 = arith.constant 0.000000e+00 : f32
    %248 = vector.broadcast %cst_97 : f32 to vector<16x256xf32>
    %249 = arith.maximumf %247, %248 : vector<16x256xf32>
    %250 = arith.truncf %249 : vector<16x256xf32> to vector<16x256xbf16>
    %c13_98 = arith.constant 13 : index
    %c0_99 = arith.constant 0 : index
    %c0_100 = arith.constant 0 : index
    %251 = vector.load %arg4[%c13_98, %c0_99, %c0_100] : memref<16x16x256xbf16, #tpu.memory_space<vmem>>, vector<1x16x256xbf16>
    %252 = vector.shape_cast %251 : vector<1x16x256xbf16> to vector<16x256xbf16>
    %253 = vector.shape_cast %250 : vector<16x256xbf16> to vector<1x16x256xbf16>
    tpu.vector_store %arg4[%c13_98, %c0_99, %c0_100], %253 {strides = array<i32>} : memref<16x16x256xbf16, #tpu.memory_space<vmem>>, vector<1x16x256xbf16>,
    %c14 = arith.constant 14 : index
    %c0_101 = arith.constant 0 : index
    %c0_102 = arith.constant 0 : index
    %254 = vector.load %arg1[%c14, %c0_101, %c0_102] : memref<16x25x1024xbf16, #tpu.memory_space<vmem>>, vector<1x25x1024xbf16>
    %255 = vector.shape_cast %254 : vector<1x25x1024xbf16> to vector<25x1024xbf16>
    %cst_103 = arith.constant dense<0.000000e+00> : vector<16x1024xf32>
    %256 = tpu.matmul %0, %255, %cst_103 {dimension_numbers = #tpu.dot_dimension_numbers<[1], [0], [0], [1], [0, 0, 1, 1], [], []>} : vector<16x25xbf16>, vector<25x1024xbf16>, vector<16x1024xf32> -> vector<16x1024xf32>
    %257 = vector.extract_strided_slice %256 {offsets = [0, 0], sizes = [16, 256], strides = [1, 1]} : vector<16x1024xf32> to vector<16x256xf32>
    %258 = vector.extract_strided_slice %256 {offsets = [0, 256], sizes = [16, 256], strides = [1, 1]} : vector<16x1024xf32> to vector<16x256xf32>
    %259 = arith.maximumf %257, %258 : vector<16x256xf32>
    %260 = vector.extract_strided_slice %256 {offsets = [0, 512], sizes = [16, 256], strides = [1, 1]} : vector<16x1024xf32> to vector<16x256xf32>
    %261 = arith.maximumf %259, %260 : vector<16x256xf32>
    %262 = vector.extract_strided_slice %256 {offsets = [0, 768], sizes = [16, 256], strides = [1, 1]} : vector<16x1024xf32> to vector<16x256xf32>
    %263 = arith.maximumf %261, %262 : vector<16x256xf32>
    %264 = vector.broadcast %1 : vector<16x1xf32> to vector<16x256xf32>
    %265 = arith.addf %263, %264 : vector<16x256xf32>
    %cst_104 = arith.constant 0.000000e+00 : f32
    %266 = vector.broadcast %cst_104 : f32 to vector<16x256xf32>
    %267 = arith.maximumf %265, %266 : vector<16x256xf32>
    %268 = arith.truncf %267 : vector<16x256xf32> to vector<16x256xbf16>
    %c14_105 = arith.constant 14 : index
    %c0_106 = arith.constant 0 : index
    %c0_107 = arith.constant 0 : index
    %269 = vector.load %arg4[%c14_105, %c0_106, %c0_107] : memref<16x16x256xbf16, #tpu.memory_space<vmem>>, vector<1x16x256xbf16>
    %270 = vector.shape_cast %269 : vector<1x16x256xbf16> to vector<16x256xbf16>
    %271 = vector.shape_cast %268 : vector<16x256xbf16> to vector<1x16x256xbf16>
    tpu.vector_store %arg4[%c14_105, %c0_106, %c0_107], %271 {strides = array<i32>} : memref<16x16x256xbf16, #tpu.memory_space<vmem>>, vector<1x16x256xbf16>,
    %c15 = arith.constant 15 : index
    %c0_108 = arith.constant 0 : index
    %c0_109 = arith.constant 0 : index
    %272 = vector.load %arg1[%c15, %c0_108, %c0_109] : memref<16x25x1024xbf16, #tpu.memory_space<vmem>>, vector<1x25x1024xbf16>
    %273 = vector.shape_cast %272 : vector<1x25x1024xbf16> to vector<25x1024xbf16>
    %cst_110 = arith.constant dense<0.000000e+00> : vector<16x1024xf32>
    %274 = tpu.matmul %0, %273, %cst_110 {dimension_numbers = #tpu.dot_dimension_numbers<[1], [0], [0], [1], [0, 0, 1, 1], [], []>} : vector<16x25xbf16>, vector<25x1024xbf16>, vector<16x1024xf32> -> vector<16x1024xf32>
    %275 = vector.extract_strided_slice %274 {offsets = [0, 0], sizes = [16, 256], strides = [1, 1]} : vector<16x1024xf32> to vector<16x256xf32>
    %276 = vector.extract_strided_slice %274 {offsets = [0, 256], sizes = [16, 256], strides = [1, 1]} : vector<16x1024xf32> to vector<16x256xf32>
    %277 = arith.maximumf %275, %276 : vector<16x256xf32>
    %278 = vector.extract_strided_slice %274 {offsets = [0, 512], sizes = [16, 256], strides = [1, 1]} : vector<16x1024xf32> to vector<16x256xf32>
    %279 = arith.maximumf %277, %278 : vector<16x256xf32>
    %280 = vector.extract_strided_slice %274 {offsets = [0, 768], sizes = [16, 256], strides = [1, 1]} : vector<16x1024xf32> to vector<16x256xf32>
    %281 = arith.maximumf %279, %280 : vector<16x256xf32>
    %282 = vector.broadcast %1 : vector<16x1xf32> to vector<16x256xf32>
    %283 = arith.addf %281, %282 : vector<16x256xf32>
    %cst_111 = arith.constant 0.000000e+00 : f32
    %284 = vector.broadcast %cst_111 : f32 to vector<16x256xf32>
    %285 = arith.maximumf %283, %284 : vector<16x256xf32>
    %286 = arith.truncf %285 : vector<16x256xf32> to vector<16x256xbf16>
    %c15_112 = arith.constant 15 : index
    %c0_113 = arith.constant 0 : index
    %c0_114 = arith.constant 0 : index
    %287 = vector.load %arg4[%c15_112, %c0_113, %c0_114] : memref<16x16x256xbf16, #tpu.memory_space<vmem>>, vector<1x16x256xbf16>
    %288 = vector.shape_cast %287 : vector<1x16x256xbf16> to vector<16x256xbf16>
    %289 = vector.shape_cast %286 : vector<16x256xbf16> to vector<1x16x256xbf16>
    tpu.vector_store %arg4[%c15_112, %c0_113, %c0_114], %289 {strides = array<i32>} : memref<16x16x256xbf16, #tpu.memory_space<vmem>>, vector<1x16x256xbf16>,
    return
  }
  func.func @transform_0(%arg0: i32) -> (i32, i32, i32) {
    %c0_i32 = arith.constant 0 : i32
    %c0_i32_0 = arith.constant 0 : i32
    %c0_i32_1 = arith.constant 0 : i32
    return %arg0, %c0_i32, %c0_i32_0 : i32, i32, i32
  }
  func.func @transform_1(%arg0: i32) -> (i32, i32) {
    %c0_i32 = arith.constant 0 : i32
    %c0_i32_0 = arith.constant 0 : i32
    %c0_i32_1 = arith.constant 0 : i32
    return %c0_i32, %c0_i32_0 : i32, i32
  }
  func.func @transform_2(%arg0: i32) -> (i32, i32) {
    %c0_i32 = arith.constant 0 : i32
    %c0_i32_0 = arith.constant 0 : i32
    %c0_i32_1 = arith.constant 0 : i32
    return %c0_i32, %c0_i32_0 : i32, i32
  }
  func.func @transform_3(%arg0: i32) -> (i32, i32, i32) {
    %c0_i32 = arith.constant 0 : i32
    %c0_i32_0 = arith.constant 0 : i32
    %c0_i32_1 = arith.constant 0 : i32
    return %arg0, %c0_i32, %c0_i32_0 : i32, i32, i32
  }
}

module attributes {stable_mosaic.version = 11 : i64} {
  func.func @_dense_kernel(%arg0: i32, %arg1: i32, %arg2: memref<8x512xbf16, #tpu.memory_space<vmem>>, %arg3: memref<4096x128xbf16, #tpu.memory_space<vmem>>, %arg4: memref<1x128xf32, #tpu.memory_space<vmem>>, %arg5: memref<8x128xf32, #tpu.memory_space<vmem>>, %arg6: memref<8x128xf32, #tpu.memory_space<vmem>>) attributes {dimension_semantics = [#tpu.dimension_semantics<parallel>, #tpu.dimension_semantics<arbitrary>], iteration_bounds = array<i64: 1, 8>, scalar_prefetch = 0 : i64, scratch_operands = 1 : i64, tpu.core_type = #tpu.core_type<tc>, window_params = [{transform_indices = @transform_0, window_bounds = array<i64: 8, 512>}, {pipeline_mode = #tpu.pipeline_mode<synchronous>, transform_indices = @transform_1, window_bounds = array<i64: 4096, 128>}, {pipeline_mode = #tpu.pipeline_mode<synchronous>, transform_indices = @transform_2, window_bounds = array<i64: 1, 128>}, {transform_indices = @transform_3, window_bounds = array<i64: 8, 128>}]} {
    %c0_i32 = arith.constant 0 : i32
    %0 = arith.cmpi eq, %arg1, %c0_i32 : i32
    %1 = arith.extui %0 : i1 to i32
    %c0_i32_0 = arith.constant 0 : i32
    %2 = arith.cmpi ne, %1, %c0_i32_0 : i32
    scf.if %2 {
      %cst_8 = arith.constant 0.000000e+00 : f32
      %15 = vector.broadcast %cst_8 : f32 to vector<8x128xf32>
      %c0_9 = arith.constant 0 : index
      %c0_10 = arith.constant 0 : index
      %16 = vector.load %arg6[%c0_9, %c0_10] : memref<8x128xf32, #tpu.memory_space<vmem>>, vector<8x128xf32>
      tpu.vector_store %arg6[%c0_9, %c0_10], %15 {strides = array<i32>} : memref<8x128xf32, #tpu.memory_space<vmem>>, vector<8x128xf32>,
    } else {
    }
    %c512_i32 = arith.constant 512 : i32
    %3 = arith.muli %arg1, %c512_i32 : i32
    %4 = tpu.assume_multiple %3, 512 : i32
    %c0 = arith.constant 0 : index
    %c0_1 = arith.constant 0 : index
    %5 = vector.load %arg6[%c0, %c0_1] : memref<8x128xf32, #tpu.memory_space<vmem>>, vector<8x128xf32>
    %c0_2 = arith.constant 0 : index
    %c0_3 = arith.constant 0 : index
    %6 = vector.load %arg2[%c0_2, %c0_3] : memref<8x512xbf16, #tpu.memory_space<vmem>>, vector<8x512xbf16>
    %7 = arith.index_cast %4 : i32 to index
    %c0_4 = arith.constant 0 : index
    %8 = vector.load %arg3[%7, %c0_4] : memref<4096x128xbf16, #tpu.memory_space<vmem>>, vector<512x128xbf16>
    %cst = arith.constant dense<0.000000e+00> : vector<8x128xf32>
    %9 = tpu.matmul %6, %8, %cst {dimension_numbers = #tpu.dot_dimension_numbers<[1], [0], [0], [1], [0, 0, 1, 1], [], []>} : vector<8x512xbf16>, vector<512x128xbf16>, vector<8x128xf32> -> vector<8x128xf32>
    %10 = arith.addf %5, %9 : vector<8x128xf32>
    %c0_5 = arith.constant 0 : index
    %c0_6 = arith.constant 0 : index
    %11 = vector.load %arg6[%c0_5, %c0_6] : memref<8x128xf32, #tpu.memory_space<vmem>>, vector<8x128xf32>
    tpu.vector_store %arg6[%c0_5, %c0_6], %10 {strides = array<i32>} : memref<8x128xf32, #tpu.memory_space<vmem>>, vector<8x128xf32>,
    %c7_i32 = arith.constant 7 : i32
    %12 = arith.cmpi eq, %arg1, %c7_i32 : i32
    %13 = arith.extui %12 : i1 to i32
    %c0_i32_7 = arith.constant 0 : i32
    %14 = arith.cmpi ne, %13, %c0_i32_7 : i32
    scf.if %14 {
      %c0_8 = arith.constant 0 : index
      %c0_9 = arith.constant 0 : index
      %15 = vector.load %arg6[%c0_8, %c0_9] : memref<8x128xf32, #tpu.memory_space<vmem>>, vector<8x128xf32>
      %c0_10 = arith.constant 0 : index
      %c0_11 = arith.constant 0 : index
      %16 = vector.load %arg4[%c0_10, %c0_11] : memref<1x128xf32, #tpu.memory_space<vmem>>, vector<1x128xf32>
      %17 = vector.broadcast %16 : vector<1x128xf32> to vector<8x128xf32>
      %18 = arith.addf %15, %17 : vector<8x128xf32>
      %c0_12 = arith.constant 0 : index
      %c0_13 = arith.constant 0 : index
      %19 = vector.load %arg5[%c0_12, %c0_13] : memref<8x128xf32, #tpu.memory_space<vmem>>, vector<8x128xf32>
      tpu.vector_store %arg5[%c0_12, %c0_13], %18 {strides = array<i32>} : memref<8x128xf32, #tpu.memory_space<vmem>>, vector<8x128xf32>,
    } else {
    }
    return
  }
  func.func @transform_0(%arg0: i32, %arg1: i32) -> (i32, i32) {
    %c0_i32 = arith.constant 0 : i32
    return %arg0, %arg1 : i32, i32
  }
  func.func @transform_1(%arg0: i32, %arg1: i32) -> (i32, i32) {
    %c0_i32 = arith.constant 0 : i32
    %c0_i32_0 = arith.constant 0 : i32
    %c0_i32_1 = arith.constant 0 : i32
    return %c0_i32, %c0_i32_0 : i32, i32
  }
  func.func @transform_2(%arg0: i32, %arg1: i32) -> (i32, i32) {
    %c0_i32 = arith.constant 0 : i32
    %c0_i32_0 = arith.constant 0 : i32
    %c0_i32_1 = arith.constant 0 : i32
    return %c0_i32, %c0_i32_0 : i32, i32
  }
  func.func @transform_3(%arg0: i32, %arg1: i32) -> (i32, i32) {
    %c0_i32 = arith.constant 0 : i32
    %c0_i32_0 = arith.constant 0 : i32
    return %arg0, %c0_i32 : i32, i32
  }
}

module attributes {stable_mosaic.version = 11 : i64} {
  func.func @_lstm_kernel(%arg0: i32, %arg1: i32, %arg2: memref<8x1xi32, #tpu.memory_space<vmem>>, %arg3: memref<8x2048xf32, #tpu.memory_space<vmem>>, %arg4: memref<32x128xbf16, #tpu.memory_space<vmem>>, %arg5: memref<8x512xf32, #tpu.memory_space<vmem>>, %arg6: memref<8x32xf32, #tpu.memory_space<vmem>>, %arg7: memref<8x32xf32, #tpu.memory_space<vmem>>) attributes {dimension_semantics = [#tpu.dimension_semantics<parallel>, #tpu.dimension_semantics<arbitrary>], iteration_bounds = array<i64: 1, 1>, scalar_prefetch = 0 : i64, scratch_operands = 2 : i64, tpu.core_type = #tpu.core_type<tc>, window_params = [{transform_indices = @transform_0, window_bounds = array<i64: 8, 1>}, {transform_indices = @transform_1, window_bounds = array<i64: 8, 2048>}, {pipeline_mode = #tpu.pipeline_mode<synchronous>, transform_indices = @transform_2, window_bounds = array<i64: 32, 128>}, {transform_indices = @transform_3, window_bounds = array<i64: 8, 512>}]} {
    %c0_i32 = arith.constant 0 : i32
    %0 = arith.cmpi eq, %arg1, %c0_i32 : i32
    %1 = arith.extui %0 : i1 to i32
    %c0_i32_0 = arith.constant 0 : i32
    %2 = arith.cmpi ne, %1, %c0_i32_0 : i32
    scf.if %2 {
      %cst_144 = arith.constant 0.000000e+00 : f32
      %585 = vector.broadcast %cst_144 : f32 to vector<8x32xf32>
      %c0_145 = arith.constant 0 : index
      %c0_146 = arith.constant 0 : index
      %586 = vector.load %arg6[%c0_145, %c0_146] : memref<8x32xf32, #tpu.memory_space<vmem>>, vector<8x32xf32>
      tpu.vector_store %arg6[%c0_145, %c0_146], %585 {strides = array<i32>} : memref<8x32xf32, #tpu.memory_space<vmem>>, vector<8x32xf32>,
      %cst_147 = arith.constant 0.000000e+00 : f32
      %587 = vector.broadcast %cst_147 : f32 to vector<8x32xf32>
      %c0_148 = arith.constant 0 : index
      %c0_149 = arith.constant 0 : index
      %588 = vector.load %arg7[%c0_148, %c0_149] : memref<8x32xf32, #tpu.memory_space<vmem>>, vector<8x32xf32>
      tpu.vector_store %arg7[%c0_148, %c0_149], %587 {strides = array<i32>} : memref<8x32xf32, #tpu.memory_space<vmem>>, vector<8x32xf32>,
    } else {
    }
    %c0 = arith.constant 0 : index
    %c0_1 = arith.constant 0 : index
    %3 = vector.load %arg4[%c0, %c0_1] : memref<32x128xbf16, #tpu.memory_space<vmem>>, vector<32x128xbf16>
    %c0_2 = arith.constant 0 : index
    %c0_3 = arith.constant 0 : index
    %4 = vector.load %arg2[%c0_2, %c0_3] : memref<8x1xi32, #tpu.memory_space<vmem>>, vector<8x1xi32>
    %c0_4 = arith.constant 0 : index
    %c0_5 = arith.constant 0 : index
    %5 = vector.load %arg6[%c0_4, %c0_5] : memref<8x32xf32, #tpu.memory_space<vmem>>, vector<8x32xf32>
    %c0_6 = arith.constant 0 : index
    %c0_7 = arith.constant 0 : index
    %6 = vector.load %arg7[%c0_6, %c0_7] : memref<8x32xf32, #tpu.memory_space<vmem>>, vector<8x32xf32>
    %c0_8 = arith.constant 0 : index
    %c0_9 = arith.constant 0 : index
    %7 = vector.load %arg3[%c0_8, %c0_9] : memref<8x2048xf32, #tpu.memory_space<vmem>>, vector<8x128xf32>
    %8 = arith.truncf %5 : vector<8x32xf32> to vector<8x32xbf16>
    %cst = arith.constant dense<0.000000e+00> : vector<8x128xf32>
    %9 = tpu.matmul %8, %3, %cst {dimension_numbers = #tpu.dot_dimension_numbers<[1], [0], [0], [1], [0, 0, 1, 1], [], []>} : vector<8x32xbf16>, vector<32x128xbf16>, vector<8x128xf32> -> vector<8x128xf32>
    %10 = arith.addf %7, %9 : vector<8x128xf32>
    %cst_10 = arith.constant 0.000000e+00 : f32
    %11 = vector.broadcast %cst_10 : f32 to vector<8x128xf32>
    %12 = arith.subf %11, %10 : vector<8x128xf32>
    %13 = math.exp %12 : vector<8x128xf32>
    %cst_11 = arith.constant 1.000000e+00 : f32
    %14 = vector.broadcast %cst_11 : f32 to vector<8x128xf32>
    %15 = arith.addf %14, %13 : vector<8x128xf32>
    %cst_12 = arith.constant 1.000000e+00 : f32
    %16 = vector.broadcast %cst_12 : f32 to vector<8x128xf32>
    %17 = arith.divf %16, %15 : vector<8x128xf32>
    %18 = math.tanh %10 : vector<8x128xf32>
    %19 = vector.extract_strided_slice %17 {offsets = [0, 0], sizes = [8, 32], strides = [1, 1]} : vector<8x128xf32> to vector<8x32xf32>
    %20 = vector.extract_strided_slice %17 {offsets = [0, 32], sizes = [8, 32], strides = [1, 1]} : vector<8x128xf32> to vector<8x32xf32>
    %21 = vector.extract_strided_slice %18 {offsets = [0, 64], sizes = [8, 32], strides = [1, 1]} : vector<8x128xf32> to vector<8x32xf32>
    %22 = vector.extract_strided_slice %17 {offsets = [0, 96], sizes = [8, 32], strides = [1, 1]} : vector<8x128xf32> to vector<8x32xf32>
    %23 = arith.mulf %20, %6 : vector<8x32xf32>
    %24 = arith.mulf %19, %21 : vector<8x32xf32>
    %25 = arith.addf %23, %24 : vector<8x32xf32>
    %26 = math.tanh %25 : vector<8x32xf32>
    %27 = arith.mulf %22, %26 : vector<8x32xf32>
    %c16_i32 = arith.constant 16 : i32
    %28 = arith.muli %arg1, %c16_i32 : i32
    %c0_i32_13 = arith.constant 0 : i32
    %29 = arith.addi %28, %c0_i32_13 : i32
    %30 = vector.broadcast %29 : i32 to vector<8x1xi32>
    %31 = arith.cmpi slt, %30, %4 : vector<8x1xi32>
    %32 = vector.shape_cast %31 : vector<8x1xi1> to vector<8x1xi1>
    %33 = vector.broadcast %32 : vector<8x1xi1> to vector<8x32xi1>
    %34 = arith.select %33, %27, %5 : vector<8x32xi1>, vector<8x32xf32>
    %35 = vector.shape_cast %31 : vector<8x1xi1> to vector<8x1xi1>
    %36 = vector.broadcast %35 : vector<8x1xi1> to vector<8x32xi1>
    %37 = arith.select %36, %25, %6 : vector<8x32xi1>, vector<8x32xf32>
    %cst_14 = arith.constant 0.000000e+00 : f32
    %38 = vector.shape_cast %31 : vector<8x1xi1> to vector<8x1xi1>
    %39 = vector.broadcast %38 : vector<8x1xi1> to vector<8x32xi1>
    %40 = vector.broadcast %cst_14 : f32 to vector<8x32xf32>
    %41 = arith.select %39, %27, %40 : vector<8x32xi1>, vector<8x32xf32>
    %c0_15 = arith.constant 0 : index
    %c0_16 = arith.constant 0 : index
    %42 = vector.load %arg5[%c0_15, %c0_16] : memref<8x512xf32, #tpu.memory_space<vmem>>, vector<8x32xf32>
    tpu.vector_store %arg5[%c0_15, %c0_16], %41 {strides = array<i32>} : memref<8x512xf32, #tpu.memory_space<vmem>>, vector<8x32xf32>,
    %c0_17 = arith.constant 0 : index
    %c128 = arith.constant 128 : index
    %43 = vector.load %arg3[%c0_17, %c128] : memref<8x2048xf32, #tpu.memory_space<vmem>>, vector<8x128xf32>
    %44 = arith.truncf %34 : vector<8x32xf32> to vector<8x32xbf16>
    %cst_18 = arith.constant dense<0.000000e+00> : vector<8x128xf32>
    %45 = tpu.matmul %44, %3, %cst_18 {dimension_numbers = #tpu.dot_dimension_numbers<[1], [0], [0], [1], [0, 0, 1, 1], [], []>} : vector<8x32xbf16>, vector<32x128xbf16>, vector<8x128xf32> -> vector<8x128xf32>
    %46 = arith.addf %43, %45 : vector<8x128xf32>
    %cst_19 = arith.constant 0.000000e+00 : f32
    %47 = vector.broadcast %cst_19 : f32 to vector<8x128xf32>
    %48 = arith.subf %47, %46 : vector<8x128xf32>
    %49 = math.exp %48 : vector<8x128xf32>
    %cst_20 = arith.constant 1.000000e+00 : f32
    %50 = vector.broadcast %cst_20 : f32 to vector<8x128xf32>
    %51 = arith.addf %50, %49 : vector<8x128xf32>
    %cst_21 = arith.constant 1.000000e+00 : f32
    %52 = vector.broadcast %cst_21 : f32 to vector<8x128xf32>
    %53 = arith.divf %52, %51 : vector<8x128xf32>
    %54 = math.tanh %46 : vector<8x128xf32>
    %55 = vector.extract_strided_slice %53 {offsets = [0, 0], sizes = [8, 32], strides = [1, 1]} : vector<8x128xf32> to vector<8x32xf32>
    %56 = vector.extract_strided_slice %53 {offsets = [0, 32], sizes = [8, 32], strides = [1, 1]} : vector<8x128xf32> to vector<8x32xf32>
    %57 = vector.extract_strided_slice %54 {offsets = [0, 64], sizes = [8, 32], strides = [1, 1]} : vector<8x128xf32> to vector<8x32xf32>
    %58 = vector.extract_strided_slice %53 {offsets = [0, 96], sizes = [8, 32], strides = [1, 1]} : vector<8x128xf32> to vector<8x32xf32>
    %59 = arith.mulf %56, %37 : vector<8x32xf32>
    %60 = arith.mulf %55, %57 : vector<8x32xf32>
    %61 = arith.addf %59, %60 : vector<8x32xf32>
    %62 = math.tanh %61 : vector<8x32xf32>
    %63 = arith.mulf %58, %62 : vector<8x32xf32>
    %c16_i32_22 = arith.constant 16 : i32
    %64 = arith.muli %arg1, %c16_i32_22 : i32
    %c1_i32 = arith.constant 1 : i32
    %65 = arith.addi %64, %c1_i32 : i32
    %66 = vector.broadcast %65 : i32 to vector<8x1xi32>
    %67 = arith.cmpi slt, %66, %4 : vector<8x1xi32>
    %68 = vector.shape_cast %67 : vector<8x1xi1> to vector<8x1xi1>
    %69 = vector.broadcast %68 : vector<8x1xi1> to vector<8x32xi1>
    %70 = arith.select %69, %63, %34 : vector<8x32xi1>, vector<8x32xf32>
    %71 = vector.shape_cast %67 : vector<8x1xi1> to vector<8x1xi1>
    %72 = vector.broadcast %71 : vector<8x1xi1> to vector<8x32xi1>
    %73 = arith.select %72, %61, %37 : vector<8x32xi1>, vector<8x32xf32>
    %cst_23 = arith.constant 0.000000e+00 : f32
    %74 = vector.shape_cast %67 : vector<8x1xi1> to vector<8x1xi1>
    %75 = vector.broadcast %74 : vector<8x1xi1> to vector<8x32xi1>
    %76 = vector.broadcast %cst_23 : f32 to vector<8x32xf32>
    %77 = arith.select %75, %63, %76 : vector<8x32xi1>, vector<8x32xf32>
    %c0_24 = arith.constant 0 : index
    %c32 = arith.constant 32 : index
    %78 = vector.load %arg5[%c0_24, %c32] : memref<8x512xf32, #tpu.memory_space<vmem>>, vector<8x32xf32>
    tpu.vector_store %arg5[%c0_24, %c32], %77 {strides = array<i32>} : memref<8x512xf32, #tpu.memory_space<vmem>>, vector<8x32xf32>,
    %c0_25 = arith.constant 0 : index
    %c256 = arith.constant 256 : index
    %79 = vector.load %arg3[%c0_25, %c256] : memref<8x2048xf32, #tpu.memory_space<vmem>>, vector<8x128xf32>
    %80 = arith.truncf %70 : vector<8x32xf32> to vector<8x32xbf16>
    %cst_26 = arith.constant dense<0.000000e+00> : vector<8x128xf32>
    %81 = tpu.matmul %80, %3, %cst_26 {dimension_numbers = #tpu.dot_dimension_numbers<[1], [0], [0], [1], [0, 0, 1, 1], [], []>} : vector<8x32xbf16>, vector<32x128xbf16>, vector<8x128xf32> -> vector<8x128xf32>
    %82 = arith.addf %79, %81 : vector<8x128xf32>
    %cst_27 = arith.constant 0.000000e+00 : f32
    %83 = vector.broadcast %cst_27 : f32 to vector<8x128xf32>
    %84 = arith.subf %83, %82 : vector<8x128xf32>
    %85 = math.exp %84 : vector<8x128xf32>
    %cst_28 = arith.constant 1.000000e+00 : f32
    %86 = vector.broadcast %cst_28 : f32 to vector<8x128xf32>
    %87 = arith.addf %86, %85 : vector<8x128xf32>
    %cst_29 = arith.constant 1.000000e+00 : f32
    %88 = vector.broadcast %cst_29 : f32 to vector<8x128xf32>
    %89 = arith.divf %88, %87 : vector<8x128xf32>
    %90 = math.tanh %82 : vector<8x128xf32>
    %91 = vector.extract_strided_slice %89 {offsets = [0, 0], sizes = [8, 32], strides = [1, 1]} : vector<8x128xf32> to vector<8x32xf32>
    %92 = vector.extract_strided_slice %89 {offsets = [0, 32], sizes = [8, 32], strides = [1, 1]} : vector<8x128xf32> to vector<8x32xf32>
    %93 = vector.extract_strided_slice %90 {offsets = [0, 64], sizes = [8, 32], strides = [1, 1]} : vector<8x128xf32> to vector<8x32xf32>
    %94 = vector.extract_strided_slice %89 {offsets = [0, 96], sizes = [8, 32], strides = [1, 1]} : vector<8x128xf32> to vector<8x32xf32>
    %95 = arith.mulf %92, %73 : vector<8x32xf32>
    %96 = arith.mulf %91, %93 : vector<8x32xf32>
    %97 = arith.addf %95, %96 : vector<8x32xf32>
    %98 = math.tanh %97 : vector<8x32xf32>
    %99 = arith.mulf %94, %98 : vector<8x32xf32>
    %c16_i32_30 = arith.constant 16 : i32
    %100 = arith.muli %arg1, %c16_i32_30 : i32
    %c2_i32 = arith.constant 2 : i32
    %101 = arith.addi %100, %c2_i32 : i32
    %102 = vector.broadcast %101 : i32 to vector<8x1xi32>
    %103 = arith.cmpi slt, %102, %4 : vector<8x1xi32>
    %104 = vector.shape_cast %103 : vector<8x1xi1> to vector<8x1xi1>
    %105 = vector.broadcast %104 : vector<8x1xi1> to vector<8x32xi1>
    %106 = arith.select %105, %99, %70 : vector<8x32xi1>, vector<8x32xf32>
    %107 = vector.shape_cast %103 : vector<8x1xi1> to vector<8x1xi1>
    %108 = vector.broadcast %107 : vector<8x1xi1> to vector<8x32xi1>
    %109 = arith.select %108, %97, %73 : vector<8x32xi1>, vector<8x32xf32>
    %cst_31 = arith.constant 0.000000e+00 : f32
    %110 = vector.shape_cast %103 : vector<8x1xi1> to vector<8x1xi1>
    %111 = vector.broadcast %110 : vector<8x1xi1> to vector<8x32xi1>
    %112 = vector.broadcast %cst_31 : f32 to vector<8x32xf32>
    %113 = arith.select %111, %99, %112 : vector<8x32xi1>, vector<8x32xf32>
    %c0_32 = arith.constant 0 : index
    %c64 = arith.constant 64 : index
    %114 = vector.load %arg5[%c0_32, %c64] : memref<8x512xf32, #tpu.memory_space<vmem>>, vector<8x32xf32>
    tpu.vector_store %arg5[%c0_32, %c64], %113 {strides = array<i32>} : memref<8x512xf32, #tpu.memory_space<vmem>>, vector<8x32xf32>,
    %c0_33 = arith.constant 0 : index
    %c384 = arith.constant 384 : index
    %115 = vector.load %arg3[%c0_33, %c384] : memref<8x2048xf32, #tpu.memory_space<vmem>>, vector<8x128xf32>
    %116 = arith.truncf %106 : vector<8x32xf32> to vector<8x32xbf16>
    %cst_34 = arith.constant dense<0.000000e+00> : vector<8x128xf32>
    %117 = tpu.matmul %116, %3, %cst_34 {dimension_numbers = #tpu.dot_dimension_numbers<[1], [0], [0], [1], [0, 0, 1, 1], [], []>} : vector<8x32xbf16>, vector<32x128xbf16>, vector<8x128xf32> -> vector<8x128xf32>
    %118 = arith.addf %115, %117 : vector<8x128xf32>
    %cst_35 = arith.constant 0.000000e+00 : f32
    %119 = vector.broadcast %cst_35 : f32 to vector<8x128xf32>
    %120 = arith.subf %119, %118 : vector<8x128xf32>
    %121 = math.exp %120 : vector<8x128xf32>
    %cst_36 = arith.constant 1.000000e+00 : f32
    %122 = vector.broadcast %cst_36 : f32 to vector<8x128xf32>
    %123 = arith.addf %122, %121 : vector<8x128xf32>
    %cst_37 = arith.constant 1.000000e+00 : f32
    %124 = vector.broadcast %cst_37 : f32 to vector<8x128xf32>
    %125 = arith.divf %124, %123 : vector<8x128xf32>
    %126 = math.tanh %118 : vector<8x128xf32>
    %127 = vector.extract_strided_slice %125 {offsets = [0, 0], sizes = [8, 32], strides = [1, 1]} : vector<8x128xf32> to vector<8x32xf32>
    %128 = vector.extract_strided_slice %125 {offsets = [0, 32], sizes = [8, 32], strides = [1, 1]} : vector<8x128xf32> to vector<8x32xf32>
    %129 = vector.extract_strided_slice %126 {offsets = [0, 64], sizes = [8, 32], strides = [1, 1]} : vector<8x128xf32> to vector<8x32xf32>
    %130 = vector.extract_strided_slice %125 {offsets = [0, 96], sizes = [8, 32], strides = [1, 1]} : vector<8x128xf32> to vector<8x32xf32>
    %131 = arith.mulf %128, %109 : vector<8x32xf32>
    %132 = arith.mulf %127, %129 : vector<8x32xf32>
    %133 = arith.addf %131, %132 : vector<8x32xf32>
    %134 = math.tanh %133 : vector<8x32xf32>
    %135 = arith.mulf %130, %134 : vector<8x32xf32>
    %c16_i32_38 = arith.constant 16 : i32
    %136 = arith.muli %arg1, %c16_i32_38 : i32
    %c3_i32 = arith.constant 3 : i32
    %137 = arith.addi %136, %c3_i32 : i32
    %138 = vector.broadcast %137 : i32 to vector<8x1xi32>
    %139 = arith.cmpi slt, %138, %4 : vector<8x1xi32>
    %140 = vector.shape_cast %139 : vector<8x1xi1> to vector<8x1xi1>
    %141 = vector.broadcast %140 : vector<8x1xi1> to vector<8x32xi1>
    %142 = arith.select %141, %135, %106 : vector<8x32xi1>, vector<8x32xf32>
    %143 = vector.shape_cast %139 : vector<8x1xi1> to vector<8x1xi1>
    %144 = vector.broadcast %143 : vector<8x1xi1> to vector<8x32xi1>
    %145 = arith.select %144, %133, %109 : vector<8x32xi1>, vector<8x32xf32>
    %cst_39 = arith.constant 0.000000e+00 : f32
    %146 = vector.shape_cast %139 : vector<8x1xi1> to vector<8x1xi1>
    %147 = vector.broadcast %146 : vector<8x1xi1> to vector<8x32xi1>
    %148 = vector.broadcast %cst_39 : f32 to vector<8x32xf32>
    %149 = arith.select %147, %135, %148 : vector<8x32xi1>, vector<8x32xf32>
    %c0_40 = arith.constant 0 : index
    %c96 = arith.constant 96 : index
    %150 = vector.load %arg5[%c0_40, %c96] : memref<8x512xf32, #tpu.memory_space<vmem>>, vector<8x32xf32>
    tpu.vector_store %arg5[%c0_40, %c96], %149 {strides = array<i32>} : memref<8x512xf32, #tpu.memory_space<vmem>>, vector<8x32xf32>,
    %c0_41 = arith.constant 0 : index
    %c512 = arith.constant 512 : index
    %151 = vector.load %arg3[%c0_41, %c512] : memref<8x2048xf32, #tpu.memory_space<vmem>>, vector<8x128xf32>
    %152 = arith.truncf %142 : vector<8x32xf32> to vector<8x32xbf16>
    %cst_42 = arith.constant dense<0.000000e+00> : vector<8x128xf32>
    %153 = tpu.matmul %152, %3, %cst_42 {dimension_numbers = #tpu.dot_dimension_numbers<[1], [0], [0], [1], [0, 0, 1, 1], [], []>} : vector<8x32xbf16>, vector<32x128xbf16>, vector<8x128xf32> -> vector<8x128xf32>
    %154 = arith.addf %151, %153 : vector<8x128xf32>
    %cst_43 = arith.constant 0.000000e+00 : f32
    %155 = vector.broadcast %cst_43 : f32 to vector<8x128xf32>
    %156 = arith.subf %155, %154 : vector<8x128xf32>
    %157 = math.exp %156 : vector<8x128xf32>
    %cst_44 = arith.constant 1.000000e+00 : f32
    %158 = vector.broadcast %cst_44 : f32 to vector<8x128xf32>
    %159 = arith.addf %158, %157 : vector<8x128xf32>
    %cst_45 = arith.constant 1.000000e+00 : f32
    %160 = vector.broadcast %cst_45 : f32 to vector<8x128xf32>
    %161 = arith.divf %160, %159 : vector<8x128xf32>
    %162 = math.tanh %154 : vector<8x128xf32>
    %163 = vector.extract_strided_slice %161 {offsets = [0, 0], sizes = [8, 32], strides = [1, 1]} : vector<8x128xf32> to vector<8x32xf32>
    %164 = vector.extract_strided_slice %161 {offsets = [0, 32], sizes = [8, 32], strides = [1, 1]} : vector<8x128xf32> to vector<8x32xf32>
    %165 = vector.extract_strided_slice %162 {offsets = [0, 64], sizes = [8, 32], strides = [1, 1]} : vector<8x128xf32> to vector<8x32xf32>
    %166 = vector.extract_strided_slice %161 {offsets = [0, 96], sizes = [8, 32], strides = [1, 1]} : vector<8x128xf32> to vector<8x32xf32>
    %167 = arith.mulf %164, %145 : vector<8x32xf32>
    %168 = arith.mulf %163, %165 : vector<8x32xf32>
    %169 = arith.addf %167, %168 : vector<8x32xf32>
    %170 = math.tanh %169 : vector<8x32xf32>
    %171 = arith.mulf %166, %170 : vector<8x32xf32>
    %c16_i32_46 = arith.constant 16 : i32
    %172 = arith.muli %arg1, %c16_i32_46 : i32
    %c4_i32 = arith.constant 4 : i32
    %173 = arith.addi %172, %c4_i32 : i32
    %174 = vector.broadcast %173 : i32 to vector<8x1xi32>
    %175 = arith.cmpi slt, %174, %4 : vector<8x1xi32>
    %176 = vector.shape_cast %175 : vector<8x1xi1> to vector<8x1xi1>
    %177 = vector.broadcast %176 : vector<8x1xi1> to vector<8x32xi1>
    %178 = arith.select %177, %171, %142 : vector<8x32xi1>, vector<8x32xf32>
    %179 = vector.shape_cast %175 : vector<8x1xi1> to vector<8x1xi1>
    %180 = vector.broadcast %179 : vector<8x1xi1> to vector<8x32xi1>
    %181 = arith.select %180, %169, %145 : vector<8x32xi1>, vector<8x32xf32>
    %cst_47 = arith.constant 0.000000e+00 : f32
    %182 = vector.shape_cast %175 : vector<8x1xi1> to vector<8x1xi1>
    %183 = vector.broadcast %182 : vector<8x1xi1> to vector<8x32xi1>
    %184 = vector.broadcast %cst_47 : f32 to vector<8x32xf32>
    %185 = arith.select %183, %171, %184 : vector<8x32xi1>, vector<8x32xf32>
    %c0_48 = arith.constant 0 : index
    %c128_49 = arith.constant 128 : index
    %186 = vector.load %arg5[%c0_48, %c128_49] : memref<8x512xf32, #tpu.memory_space<vmem>>, vector<8x32xf32>
    tpu.vector_store %arg5[%c0_48, %c128_49], %185 {strides = array<i32>} : memref<8x512xf32, #tpu.memory_space<vmem>>, vector<8x32xf32>,
    %c0_50 = arith.constant 0 : index
    %c640 = arith.constant 640 : index
    %187 = vector.load %arg3[%c0_50, %c640] : memref<8x2048xf32, #tpu.memory_space<vmem>>, vector<8x128xf32>
    %188 = arith.truncf %178 : vector<8x32xf32> to vector<8x32xbf16>
    %cst_51 = arith.constant dense<0.000000e+00> : vector<8x128xf32>
    %189 = tpu.matmul %188, %3, %cst_51 {dimension_numbers = #tpu.dot_dimension_numbers<[1], [0], [0], [1], [0, 0, 1, 1], [], []>} : vector<8x32xbf16>, vector<32x128xbf16>, vector<8x128xf32> -> vector<8x128xf32>
    %190 = arith.addf %187, %189 : vector<8x128xf32>
    %cst_52 = arith.constant 0.000000e+00 : f32
    %191 = vector.broadcast %cst_52 : f32 to vector<8x128xf32>
    %192 = arith.subf %191, %190 : vector<8x128xf32>
    %193 = math.exp %192 : vector<8x128xf32>
    %cst_53 = arith.constant 1.000000e+00 : f32
    %194 = vector.broadcast %cst_53 : f32 to vector<8x128xf32>
    %195 = arith.addf %194, %193 : vector<8x128xf32>
    %cst_54 = arith.constant 1.000000e+00 : f32
    %196 = vector.broadcast %cst_54 : f32 to vector<8x128xf32>
    %197 = arith.divf %196, %195 : vector<8x128xf32>
    %198 = math.tanh %190 : vector<8x128xf32>
    %199 = vector.extract_strided_slice %197 {offsets = [0, 0], sizes = [8, 32], strides = [1, 1]} : vector<8x128xf32> to vector<8x32xf32>
    %200 = vector.extract_strided_slice %197 {offsets = [0, 32], sizes = [8, 32], strides = [1, 1]} : vector<8x128xf32> to vector<8x32xf32>
    %201 = vector.extract_strided_slice %198 {offsets = [0, 64], sizes = [8, 32], strides = [1, 1]} : vector<8x128xf32> to vector<8x32xf32>
    %202 = vector.extract_strided_slice %197 {offsets = [0, 96], sizes = [8, 32], strides = [1, 1]} : vector<8x128xf32> to vector<8x32xf32>
    %203 = arith.mulf %200, %181 : vector<8x32xf32>
    %204 = arith.mulf %199, %201 : vector<8x32xf32>
    %205 = arith.addf %203, %204 : vector<8x32xf32>
    %206 = math.tanh %205 : vector<8x32xf32>
    %207 = arith.mulf %202, %206 : vector<8x32xf32>
    %c16_i32_55 = arith.constant 16 : i32
    %208 = arith.muli %arg1, %c16_i32_55 : i32
    %c5_i32 = arith.constant 5 : i32
    %209 = arith.addi %208, %c5_i32 : i32
    %210 = vector.broadcast %209 : i32 to vector<8x1xi32>
    %211 = arith.cmpi slt, %210, %4 : vector<8x1xi32>
    %212 = vector.shape_cast %211 : vector<8x1xi1> to vector<8x1xi1>
    %213 = vector.broadcast %212 : vector<8x1xi1> to vector<8x32xi1>
    %214 = arith.select %213, %207, %178 : vector<8x32xi1>, vector<8x32xf32>
    %215 = vector.shape_cast %211 : vector<8x1xi1> to vector<8x1xi1>
    %216 = vector.broadcast %215 : vector<8x1xi1> to vector<8x32xi1>
    %217 = arith.select %216, %205, %181 : vector<8x32xi1>, vector<8x32xf32>
    %cst_56 = arith.constant 0.000000e+00 : f32
    %218 = vector.shape_cast %211 : vector<8x1xi1> to vector<8x1xi1>
    %219 = vector.broadcast %218 : vector<8x1xi1> to vector<8x32xi1>
    %220 = vector.broadcast %cst_56 : f32 to vector<8x32xf32>
    %221 = arith.select %219, %207, %220 : vector<8x32xi1>, vector<8x32xf32>
    %c0_57 = arith.constant 0 : index
    %c160 = arith.constant 160 : index
    %222 = vector.load %arg5[%c0_57, %c160] : memref<8x512xf32, #tpu.memory_space<vmem>>, vector<8x32xf32>
    tpu.vector_store %arg5[%c0_57, %c160], %221 {strides = array<i32>} : memref<8x512xf32, #tpu.memory_space<vmem>>, vector<8x32xf32>,
    %c0_58 = arith.constant 0 : index
    %c768 = arith.constant 768 : index
    %223 = vector.load %arg3[%c0_58, %c768] : memref<8x2048xf32, #tpu.memory_space<vmem>>, vector<8x128xf32>
    %224 = arith.truncf %214 : vector<8x32xf32> to vector<8x32xbf16>
    %cst_59 = arith.constant dense<0.000000e+00> : vector<8x128xf32>
    %225 = tpu.matmul %224, %3, %cst_59 {dimension_numbers = #tpu.dot_dimension_numbers<[1], [0], [0], [1], [0, 0, 1, 1], [], []>} : vector<8x32xbf16>, vector<32x128xbf16>, vector<8x128xf32> -> vector<8x128xf32>
    %226 = arith.addf %223, %225 : vector<8x128xf32>
    %cst_60 = arith.constant 0.000000e+00 : f32
    %227 = vector.broadcast %cst_60 : f32 to vector<8x128xf32>
    %228 = arith.subf %227, %226 : vector<8x128xf32>
    %229 = math.exp %228 : vector<8x128xf32>
    %cst_61 = arith.constant 1.000000e+00 : f32
    %230 = vector.broadcast %cst_61 : f32 to vector<8x128xf32>
    %231 = arith.addf %230, %229 : vector<8x128xf32>
    %cst_62 = arith.constant 1.000000e+00 : f32
    %232 = vector.broadcast %cst_62 : f32 to vector<8x128xf32>
    %233 = arith.divf %232, %231 : vector<8x128xf32>
    %234 = math.tanh %226 : vector<8x128xf32>
    %235 = vector.extract_strided_slice %233 {offsets = [0, 0], sizes = [8, 32], strides = [1, 1]} : vector<8x128xf32> to vector<8x32xf32>
    %236 = vector.extract_strided_slice %233 {offsets = [0, 32], sizes = [8, 32], strides = [1, 1]} : vector<8x128xf32> to vector<8x32xf32>
    %237 = vector.extract_strided_slice %234 {offsets = [0, 64], sizes = [8, 32], strides = [1, 1]} : vector<8x128xf32> to vector<8x32xf32>
    %238 = vector.extract_strided_slice %233 {offsets = [0, 96], sizes = [8, 32], strides = [1, 1]} : vector<8x128xf32> to vector<8x32xf32>
    %239 = arith.mulf %236, %217 : vector<8x32xf32>
    %240 = arith.mulf %235, %237 : vector<8x32xf32>
    %241 = arith.addf %239, %240 : vector<8x32xf32>
    %242 = math.tanh %241 : vector<8x32xf32>
    %243 = arith.mulf %238, %242 : vector<8x32xf32>
    %c16_i32_63 = arith.constant 16 : i32
    %244 = arith.muli %arg1, %c16_i32_63 : i32
    %c6_i32 = arith.constant 6 : i32
    %245 = arith.addi %244, %c6_i32 : i32
    %246 = vector.broadcast %245 : i32 to vector<8x1xi32>
    %247 = arith.cmpi slt, %246, %4 : vector<8x1xi32>
    %248 = vector.shape_cast %247 : vector<8x1xi1> to vector<8x1xi1>
    %249 = vector.broadcast %248 : vector<8x1xi1> to vector<8x32xi1>
    %250 = arith.select %249, %243, %214 : vector<8x32xi1>, vector<8x32xf32>
    %251 = vector.shape_cast %247 : vector<8x1xi1> to vector<8x1xi1>
    %252 = vector.broadcast %251 : vector<8x1xi1> to vector<8x32xi1>
    %253 = arith.select %252, %241, %217 : vector<8x32xi1>, vector<8x32xf32>
    %cst_64 = arith.constant 0.000000e+00 : f32
    %254 = vector.shape_cast %247 : vector<8x1xi1> to vector<8x1xi1>
    %255 = vector.broadcast %254 : vector<8x1xi1> to vector<8x32xi1>
    %256 = vector.broadcast %cst_64 : f32 to vector<8x32xf32>
    %257 = arith.select %255, %243, %256 : vector<8x32xi1>, vector<8x32xf32>
    %c0_65 = arith.constant 0 : index
    %c192 = arith.constant 192 : index
    %258 = vector.load %arg5[%c0_65, %c192] : memref<8x512xf32, #tpu.memory_space<vmem>>, vector<8x32xf32>
    tpu.vector_store %arg5[%c0_65, %c192], %257 {strides = array<i32>} : memref<8x512xf32, #tpu.memory_space<vmem>>, vector<8x32xf32>,
    %c0_66 = arith.constant 0 : index
    %c896 = arith.constant 896 : index
    %259 = vector.load %arg3[%c0_66, %c896] : memref<8x2048xf32, #tpu.memory_space<vmem>>, vector<8x128xf32>
    %260 = arith.truncf %250 : vector<8x32xf32> to vector<8x32xbf16>
    %cst_67 = arith.constant dense<0.000000e+00> : vector<8x128xf32>
    %261 = tpu.matmul %260, %3, %cst_67 {dimension_numbers = #tpu.dot_dimension_numbers<[1], [0], [0], [1], [0, 0, 1, 1], [], []>} : vector<8x32xbf16>, vector<32x128xbf16>, vector<8x128xf32> -> vector<8x128xf32>
    %262 = arith.addf %259, %261 : vector<8x128xf32>
    %cst_68 = arith.constant 0.000000e+00 : f32
    %263 = vector.broadcast %cst_68 : f32 to vector<8x128xf32>
    %264 = arith.subf %263, %262 : vector<8x128xf32>
    %265 = math.exp %264 : vector<8x128xf32>
    %cst_69 = arith.constant 1.000000e+00 : f32
    %266 = vector.broadcast %cst_69 : f32 to vector<8x128xf32>
    %267 = arith.addf %266, %265 : vector<8x128xf32>
    %cst_70 = arith.constant 1.000000e+00 : f32
    %268 = vector.broadcast %cst_70 : f32 to vector<8x128xf32>
    %269 = arith.divf %268, %267 : vector<8x128xf32>
    %270 = math.tanh %262 : vector<8x128xf32>
    %271 = vector.extract_strided_slice %269 {offsets = [0, 0], sizes = [8, 32], strides = [1, 1]} : vector<8x128xf32> to vector<8x32xf32>
    %272 = vector.extract_strided_slice %269 {offsets = [0, 32], sizes = [8, 32], strides = [1, 1]} : vector<8x128xf32> to vector<8x32xf32>
    %273 = vector.extract_strided_slice %270 {offsets = [0, 64], sizes = [8, 32], strides = [1, 1]} : vector<8x128xf32> to vector<8x32xf32>
    %274 = vector.extract_strided_slice %269 {offsets = [0, 96], sizes = [8, 32], strides = [1, 1]} : vector<8x128xf32> to vector<8x32xf32>
    %275 = arith.mulf %272, %253 : vector<8x32xf32>
    %276 = arith.mulf %271, %273 : vector<8x32xf32>
    %277 = arith.addf %275, %276 : vector<8x32xf32>
    %278 = math.tanh %277 : vector<8x32xf32>
    %279 = arith.mulf %274, %278 : vector<8x32xf32>
    %c16_i32_71 = arith.constant 16 : i32
    %280 = arith.muli %arg1, %c16_i32_71 : i32
    %c7_i32 = arith.constant 7 : i32
    %281 = arith.addi %280, %c7_i32 : i32
    %282 = vector.broadcast %281 : i32 to vector<8x1xi32>
    %283 = arith.cmpi slt, %282, %4 : vector<8x1xi32>
    %284 = vector.shape_cast %283 : vector<8x1xi1> to vector<8x1xi1>
    %285 = vector.broadcast %284 : vector<8x1xi1> to vector<8x32xi1>
    %286 = arith.select %285, %279, %250 : vector<8x32xi1>, vector<8x32xf32>
    %287 = vector.shape_cast %283 : vector<8x1xi1> to vector<8x1xi1>
    %288 = vector.broadcast %287 : vector<8x1xi1> to vector<8x32xi1>
    %289 = arith.select %288, %277, %253 : vector<8x32xi1>, vector<8x32xf32>
    %cst_72 = arith.constant 0.000000e+00 : f32
    %290 = vector.shape_cast %283 : vector<8x1xi1> to vector<8x1xi1>
    %291 = vector.broadcast %290 : vector<8x1xi1> to vector<8x32xi1>
    %292 = vector.broadcast %cst_72 : f32 to vector<8x32xf32>
    %293 = arith.select %291, %279, %292 : vector<8x32xi1>, vector<8x32xf32>
    %c0_73 = arith.constant 0 : index
    %c224 = arith.constant 224 : index
    %294 = vector.load %arg5[%c0_73, %c224] : memref<8x512xf32, #tpu.memory_space<vmem>>, vector<8x32xf32>
    tpu.vector_store %arg5[%c0_73, %c224], %293 {strides = array<i32>} : memref<8x512xf32, #tpu.memory_space<vmem>>, vector<8x32xf32>,
    %c0_74 = arith.constant 0 : index
    %c1024 = arith.constant 1024 : index
    %295 = vector.load %arg3[%c0_74, %c1024] : memref<8x2048xf32, #tpu.memory_space<vmem>>, vector<8x128xf32>
    %296 = arith.truncf %286 : vector<8x32xf32> to vector<8x32xbf16>
    %cst_75 = arith.constant dense<0.000000e+00> : vector<8x128xf32>
    %297 = tpu.matmul %296, %3, %cst_75 {dimension_numbers = #tpu.dot_dimension_numbers<[1], [0], [0], [1], [0, 0, 1, 1], [], []>} : vector<8x32xbf16>, vector<32x128xbf16>, vector<8x128xf32> -> vector<8x128xf32>
    %298 = arith.addf %295, %297 : vector<8x128xf32>
    %cst_76 = arith.constant 0.000000e+00 : f32
    %299 = vector.broadcast %cst_76 : f32 to vector<8x128xf32>
    %300 = arith.subf %299, %298 : vector<8x128xf32>
    %301 = math.exp %300 : vector<8x128xf32>
    %cst_77 = arith.constant 1.000000e+00 : f32
    %302 = vector.broadcast %cst_77 : f32 to vector<8x128xf32>
    %303 = arith.addf %302, %301 : vector<8x128xf32>
    %cst_78 = arith.constant 1.000000e+00 : f32
    %304 = vector.broadcast %cst_78 : f32 to vector<8x128xf32>
    %305 = arith.divf %304, %303 : vector<8x128xf32>
    %306 = math.tanh %298 : vector<8x128xf32>
    %307 = vector.extract_strided_slice %305 {offsets = [0, 0], sizes = [8, 32], strides = [1, 1]} : vector<8x128xf32> to vector<8x32xf32>
    %308 = vector.extract_strided_slice %305 {offsets = [0, 32], sizes = [8, 32], strides = [1, 1]} : vector<8x128xf32> to vector<8x32xf32>
    %309 = vector.extract_strided_slice %306 {offsets = [0, 64], sizes = [8, 32], strides = [1, 1]} : vector<8x128xf32> to vector<8x32xf32>
    %310 = vector.extract_strided_slice %305 {offsets = [0, 96], sizes = [8, 32], strides = [1, 1]} : vector<8x128xf32> to vector<8x32xf32>
    %311 = arith.mulf %308, %289 : vector<8x32xf32>
    %312 = arith.mulf %307, %309 : vector<8x32xf32>
    %313 = arith.addf %311, %312 : vector<8x32xf32>
    %314 = math.tanh %313 : vector<8x32xf32>
    %315 = arith.mulf %310, %314 : vector<8x32xf32>
    %c16_i32_79 = arith.constant 16 : i32
    %316 = arith.muli %arg1, %c16_i32_79 : i32
    %c8_i32 = arith.constant 8 : i32
    %317 = arith.addi %316, %c8_i32 : i32
    %318 = vector.broadcast %317 : i32 to vector<8x1xi32>
    %319 = arith.cmpi slt, %318, %4 : vector<8x1xi32>
    %320 = vector.shape_cast %319 : vector<8x1xi1> to vector<8x1xi1>
    %321 = vector.broadcast %320 : vector<8x1xi1> to vector<8x32xi1>
    %322 = arith.select %321, %315, %286 : vector<8x32xi1>, vector<8x32xf32>
    %323 = vector.shape_cast %319 : vector<8x1xi1> to vector<8x1xi1>
    %324 = vector.broadcast %323 : vector<8x1xi1> to vector<8x32xi1>
    %325 = arith.select %324, %313, %289 : vector<8x32xi1>, vector<8x32xf32>
    %cst_80 = arith.constant 0.000000e+00 : f32
    %326 = vector.shape_cast %319 : vector<8x1xi1> to vector<8x1xi1>
    %327 = vector.broadcast %326 : vector<8x1xi1> to vector<8x32xi1>
    %328 = vector.broadcast %cst_80 : f32 to vector<8x32xf32>
    %329 = arith.select %327, %315, %328 : vector<8x32xi1>, vector<8x32xf32>
    %c0_81 = arith.constant 0 : index
    %c256_82 = arith.constant 256 : index
    %330 = vector.load %arg5[%c0_81, %c256_82] : memref<8x512xf32, #tpu.memory_space<vmem>>, vector<8x32xf32>
    tpu.vector_store %arg5[%c0_81, %c256_82], %329 {strides = array<i32>} : memref<8x512xf32, #tpu.memory_space<vmem>>, vector<8x32xf32>,
    %c0_83 = arith.constant 0 : index
    %c1152 = arith.constant 1152 : index
    %331 = vector.load %arg3[%c0_83, %c1152] : memref<8x2048xf32, #tpu.memory_space<vmem>>, vector<8x128xf32>
    %332 = arith.truncf %322 : vector<8x32xf32> to vector<8x32xbf16>
    %cst_84 = arith.constant dense<0.000000e+00> : vector<8x128xf32>
    %333 = tpu.matmul %332, %3, %cst_84 {dimension_numbers = #tpu.dot_dimension_numbers<[1], [0], [0], [1], [0, 0, 1, 1], [], []>} : vector<8x32xbf16>, vector<32x128xbf16>, vector<8x128xf32> -> vector<8x128xf32>
    %334 = arith.addf %331, %333 : vector<8x128xf32>
    %cst_85 = arith.constant 0.000000e+00 : f32
    %335 = vector.broadcast %cst_85 : f32 to vector<8x128xf32>
    %336 = arith.subf %335, %334 : vector<8x128xf32>
    %337 = math.exp %336 : vector<8x128xf32>
    %cst_86 = arith.constant 1.000000e+00 : f32
    %338 = vector.broadcast %cst_86 : f32 to vector<8x128xf32>
    %339 = arith.addf %338, %337 : vector<8x128xf32>
    %cst_87 = arith.constant 1.000000e+00 : f32
    %340 = vector.broadcast %cst_87 : f32 to vector<8x128xf32>
    %341 = arith.divf %340, %339 : vector<8x128xf32>
    %342 = math.tanh %334 : vector<8x128xf32>
    %343 = vector.extract_strided_slice %341 {offsets = [0, 0], sizes = [8, 32], strides = [1, 1]} : vector<8x128xf32> to vector<8x32xf32>
    %344 = vector.extract_strided_slice %341 {offsets = [0, 32], sizes = [8, 32], strides = [1, 1]} : vector<8x128xf32> to vector<8x32xf32>
    %345 = vector.extract_strided_slice %342 {offsets = [0, 64], sizes = [8, 32], strides = [1, 1]} : vector<8x128xf32> to vector<8x32xf32>
    %346 = vector.extract_strided_slice %341 {offsets = [0, 96], sizes = [8, 32], strides = [1, 1]} : vector<8x128xf32> to vector<8x32xf32>
    %347 = arith.mulf %344, %325 : vector<8x32xf32>
    %348 = arith.mulf %343, %345 : vector<8x32xf32>
    %349 = arith.addf %347, %348 : vector<8x32xf32>
    %350 = math.tanh %349 : vector<8x32xf32>
    %351 = arith.mulf %346, %350 : vector<8x32xf32>
    %c16_i32_88 = arith.constant 16 : i32
    %352 = arith.muli %arg1, %c16_i32_88 : i32
    %c9_i32 = arith.constant 9 : i32
    %353 = arith.addi %352, %c9_i32 : i32
    %354 = vector.broadcast %353 : i32 to vector<8x1xi32>
    %355 = arith.cmpi slt, %354, %4 : vector<8x1xi32>
    %356 = vector.shape_cast %355 : vector<8x1xi1> to vector<8x1xi1>
    %357 = vector.broadcast %356 : vector<8x1xi1> to vector<8x32xi1>
    %358 = arith.select %357, %351, %322 : vector<8x32xi1>, vector<8x32xf32>
    %359 = vector.shape_cast %355 : vector<8x1xi1> to vector<8x1xi1>
    %360 = vector.broadcast %359 : vector<8x1xi1> to vector<8x32xi1>
    %361 = arith.select %360, %349, %325 : vector<8x32xi1>, vector<8x32xf32>
    %cst_89 = arith.constant 0.000000e+00 : f32
    %362 = vector.shape_cast %355 : vector<8x1xi1> to vector<8x1xi1>
    %363 = vector.broadcast %362 : vector<8x1xi1> to vector<8x32xi1>
    %364 = vector.broadcast %cst_89 : f32 to vector<8x32xf32>
    %365 = arith.select %363, %351, %364 : vector<8x32xi1>, vector<8x32xf32>
    %c0_90 = arith.constant 0 : index
    %c288 = arith.constant 288 : index
    %366 = vector.load %arg5[%c0_90, %c288] : memref<8x512xf32, #tpu.memory_space<vmem>>, vector<8x32xf32>
    tpu.vector_store %arg5[%c0_90, %c288], %365 {strides = array<i32>} : memref<8x512xf32, #tpu.memory_space<vmem>>, vector<8x32xf32>,
    %c0_91 = arith.constant 0 : index
    %c1280 = arith.constant 1280 : index
    %367 = vector.load %arg3[%c0_91, %c1280] : memref<8x2048xf32, #tpu.memory_space<vmem>>, vector<8x128xf32>
    %368 = arith.truncf %358 : vector<8x32xf32> to vector<8x32xbf16>
    %cst_92 = arith.constant dense<0.000000e+00> : vector<8x128xf32>
    %369 = tpu.matmul %368, %3, %cst_92 {dimension_numbers = #tpu.dot_dimension_numbers<[1], [0], [0], [1], [0, 0, 1, 1], [], []>} : vector<8x32xbf16>, vector<32x128xbf16>, vector<8x128xf32> -> vector<8x128xf32>
    %370 = arith.addf %367, %369 : vector<8x128xf32>
    %cst_93 = arith.constant 0.000000e+00 : f32
    %371 = vector.broadcast %cst_93 : f32 to vector<8x128xf32>
    %372 = arith.subf %371, %370 : vector<8x128xf32>
    %373 = math.exp %372 : vector<8x128xf32>
    %cst_94 = arith.constant 1.000000e+00 : f32
    %374 = vector.broadcast %cst_94 : f32 to vector<8x128xf32>
    %375 = arith.addf %374, %373 : vector<8x128xf32>
    %cst_95 = arith.constant 1.000000e+00 : f32
    %376 = vector.broadcast %cst_95 : f32 to vector<8x128xf32>
    %377 = arith.divf %376, %375 : vector<8x128xf32>
    %378 = math.tanh %370 : vector<8x128xf32>
    %379 = vector.extract_strided_slice %377 {offsets = [0, 0], sizes = [8, 32], strides = [1, 1]} : vector<8x128xf32> to vector<8x32xf32>
    %380 = vector.extract_strided_slice %377 {offsets = [0, 32], sizes = [8, 32], strides = [1, 1]} : vector<8x128xf32> to vector<8x32xf32>
    %381 = vector.extract_strided_slice %378 {offsets = [0, 64], sizes = [8, 32], strides = [1, 1]} : vector<8x128xf32> to vector<8x32xf32>
    %382 = vector.extract_strided_slice %377 {offsets = [0, 96], sizes = [8, 32], strides = [1, 1]} : vector<8x128xf32> to vector<8x32xf32>
    %383 = arith.mulf %380, %361 : vector<8x32xf32>
    %384 = arith.mulf %379, %381 : vector<8x32xf32>
    %385 = arith.addf %383, %384 : vector<8x32xf32>
    %386 = math.tanh %385 : vector<8x32xf32>
    %387 = arith.mulf %382, %386 : vector<8x32xf32>
    %c16_i32_96 = arith.constant 16 : i32
    %388 = arith.muli %arg1, %c16_i32_96 : i32
    %c10_i32 = arith.constant 10 : i32
    %389 = arith.addi %388, %c10_i32 : i32
    %390 = vector.broadcast %389 : i32 to vector<8x1xi32>
    %391 = arith.cmpi slt, %390, %4 : vector<8x1xi32>
    %392 = vector.shape_cast %391 : vector<8x1xi1> to vector<8x1xi1>
    %393 = vector.broadcast %392 : vector<8x1xi1> to vector<8x32xi1>
    %394 = arith.select %393, %387, %358 : vector<8x32xi1>, vector<8x32xf32>
    %395 = vector.shape_cast %391 : vector<8x1xi1> to vector<8x1xi1>
    %396 = vector.broadcast %395 : vector<8x1xi1> to vector<8x32xi1>
    %397 = arith.select %396, %385, %361 : vector<8x32xi1>, vector<8x32xf32>
    %cst_97 = arith.constant 0.000000e+00 : f32
    %398 = vector.shape_cast %391 : vector<8x1xi1> to vector<8x1xi1>
    %399 = vector.broadcast %398 : vector<8x1xi1> to vector<8x32xi1>
    %400 = vector.broadcast %cst_97 : f32 to vector<8x32xf32>
    %401 = arith.select %399, %387, %400 : vector<8x32xi1>, vector<8x32xf32>
    %c0_98 = arith.constant 0 : index
    %c320 = arith.constant 320 : index
    %402 = vector.load %arg5[%c0_98, %c320] : memref<8x512xf32, #tpu.memory_space<vmem>>, vector<8x32xf32>
    tpu.vector_store %arg5[%c0_98, %c320], %401 {strides = array<i32>} : memref<8x512xf32, #tpu.memory_space<vmem>>, vector<8x32xf32>,
    %c0_99 = arith.constant 0 : index
    %c1408 = arith.constant 1408 : index
    %403 = vector.load %arg3[%c0_99, %c1408] : memref<8x2048xf32, #tpu.memory_space<vmem>>, vector<8x128xf32>
    %404 = arith.truncf %394 : vector<8x32xf32> to vector<8x32xbf16>
    %cst_100 = arith.constant dense<0.000000e+00> : vector<8x128xf32>
    %405 = tpu.matmul %404, %3, %cst_100 {dimension_numbers = #tpu.dot_dimension_numbers<[1], [0], [0], [1], [0, 0, 1, 1], [], []>} : vector<8x32xbf16>, vector<32x128xbf16>, vector<8x128xf32> -> vector<8x128xf32>
    %406 = arith.addf %403, %405 : vector<8x128xf32>
    %cst_101 = arith.constant 0.000000e+00 : f32
    %407 = vector.broadcast %cst_101 : f32 to vector<8x128xf32>
    %408 = arith.subf %407, %406 : vector<8x128xf32>
    %409 = math.exp %408 : vector<8x128xf32>
    %cst_102 = arith.constant 1.000000e+00 : f32
    %410 = vector.broadcast %cst_102 : f32 to vector<8x128xf32>
    %411 = arith.addf %410, %409 : vector<8x128xf32>
    %cst_103 = arith.constant 1.000000e+00 : f32
    %412 = vector.broadcast %cst_103 : f32 to vector<8x128xf32>
    %413 = arith.divf %412, %411 : vector<8x128xf32>
    %414 = math.tanh %406 : vector<8x128xf32>
    %415 = vector.extract_strided_slice %413 {offsets = [0, 0], sizes = [8, 32], strides = [1, 1]} : vector<8x128xf32> to vector<8x32xf32>
    %416 = vector.extract_strided_slice %413 {offsets = [0, 32], sizes = [8, 32], strides = [1, 1]} : vector<8x128xf32> to vector<8x32xf32>
    %417 = vector.extract_strided_slice %414 {offsets = [0, 64], sizes = [8, 32], strides = [1, 1]} : vector<8x128xf32> to vector<8x32xf32>
    %418 = vector.extract_strided_slice %413 {offsets = [0, 96], sizes = [8, 32], strides = [1, 1]} : vector<8x128xf32> to vector<8x32xf32>
    %419 = arith.mulf %416, %397 : vector<8x32xf32>
    %420 = arith.mulf %415, %417 : vector<8x32xf32>
    %421 = arith.addf %419, %420 : vector<8x32xf32>
    %422 = math.tanh %421 : vector<8x32xf32>
    %423 = arith.mulf %418, %422 : vector<8x32xf32>
    %c16_i32_104 = arith.constant 16 : i32
    %424 = arith.muli %arg1, %c16_i32_104 : i32
    %c11_i32 = arith.constant 11 : i32
    %425 = arith.addi %424, %c11_i32 : i32
    %426 = vector.broadcast %425 : i32 to vector<8x1xi32>
    %427 = arith.cmpi slt, %426, %4 : vector<8x1xi32>
    %428 = vector.shape_cast %427 : vector<8x1xi1> to vector<8x1xi1>
    %429 = vector.broadcast %428 : vector<8x1xi1> to vector<8x32xi1>
    %430 = arith.select %429, %423, %394 : vector<8x32xi1>, vector<8x32xf32>
    %431 = vector.shape_cast %427 : vector<8x1xi1> to vector<8x1xi1>
    %432 = vector.broadcast %431 : vector<8x1xi1> to vector<8x32xi1>
    %433 = arith.select %432, %421, %397 : vector<8x32xi1>, vector<8x32xf32>
    %cst_105 = arith.constant 0.000000e+00 : f32
    %434 = vector.shape_cast %427 : vector<8x1xi1> to vector<8x1xi1>
    %435 = vector.broadcast %434 : vector<8x1xi1> to vector<8x32xi1>
    %436 = vector.broadcast %cst_105 : f32 to vector<8x32xf32>
    %437 = arith.select %435, %423, %436 : vector<8x32xi1>, vector<8x32xf32>
    %c0_106 = arith.constant 0 : index
    %c352 = arith.constant 352 : index
    %438 = vector.load %arg5[%c0_106, %c352] : memref<8x512xf32, #tpu.memory_space<vmem>>, vector<8x32xf32>
    tpu.vector_store %arg5[%c0_106, %c352], %437 {strides = array<i32>} : memref<8x512xf32, #tpu.memory_space<vmem>>, vector<8x32xf32>,
    %c0_107 = arith.constant 0 : index
    %c1536 = arith.constant 1536 : index
    %439 = vector.load %arg3[%c0_107, %c1536] : memref<8x2048xf32, #tpu.memory_space<vmem>>, vector<8x128xf32>
    %440 = arith.truncf %430 : vector<8x32xf32> to vector<8x32xbf16>
    %cst_108 = arith.constant dense<0.000000e+00> : vector<8x128xf32>
    %441 = tpu.matmul %440, %3, %cst_108 {dimension_numbers = #tpu.dot_dimension_numbers<[1], [0], [0], [1], [0, 0, 1, 1], [], []>} : vector<8x32xbf16>, vector<32x128xbf16>, vector<8x128xf32> -> vector<8x128xf32>
    %442 = arith.addf %439, %441 : vector<8x128xf32>
    %cst_109 = arith.constant 0.000000e+00 : f32
    %443 = vector.broadcast %cst_109 : f32 to vector<8x128xf32>
    %444 = arith.subf %443, %442 : vector<8x128xf32>
    %445 = math.exp %444 : vector<8x128xf32>
    %cst_110 = arith.constant 1.000000e+00 : f32
    %446 = vector.broadcast %cst_110 : f32 to vector<8x128xf32>
    %447 = arith.addf %446, %445 : vector<8x128xf32>
    %cst_111 = arith.constant 1.000000e+00 : f32
    %448 = vector.broadcast %cst_111 : f32 to vector<8x128xf32>
    %449 = arith.divf %448, %447 : vector<8x128xf32>
    %450 = math.tanh %442 : vector<8x128xf32>
    %451 = vector.extract_strided_slice %449 {offsets = [0, 0], sizes = [8, 32], strides = [1, 1]} : vector<8x128xf32> to vector<8x32xf32>
    %452 = vector.extract_strided_slice %449 {offsets = [0, 32], sizes = [8, 32], strides = [1, 1]} : vector<8x128xf32> to vector<8x32xf32>
    %453 = vector.extract_strided_slice %450 {offsets = [0, 64], sizes = [8, 32], strides = [1, 1]} : vector<8x128xf32> to vector<8x32xf32>
    %454 = vector.extract_strided_slice %449 {offsets = [0, 96], sizes = [8, 32], strides = [1, 1]} : vector<8x128xf32> to vector<8x32xf32>
    %455 = arith.mulf %452, %433 : vector<8x32xf32>
    %456 = arith.mulf %451, %453 : vector<8x32xf32>
    %457 = arith.addf %455, %456 : vector<8x32xf32>
    %458 = math.tanh %457 : vector<8x32xf32>
    %459 = arith.mulf %454, %458 : vector<8x32xf32>
    %c16_i32_112 = arith.constant 16 : i32
    %460 = arith.muli %arg1, %c16_i32_112 : i32
    %c12_i32 = arith.constant 12 : i32
    %461 = arith.addi %460, %c12_i32 : i32
    %462 = vector.broadcast %461 : i32 to vector<8x1xi32>
    %463 = arith.cmpi slt, %462, %4 : vector<8x1xi32>
    %464 = vector.shape_cast %463 : vector<8x1xi1> to vector<8x1xi1>
    %465 = vector.broadcast %464 : vector<8x1xi1> to vector<8x32xi1>
    %466 = arith.select %465, %459, %430 : vector<8x32xi1>, vector<8x32xf32>
    %467 = vector.shape_cast %463 : vector<8x1xi1> to vector<8x1xi1>
    %468 = vector.broadcast %467 : vector<8x1xi1> to vector<8x32xi1>
    %469 = arith.select %468, %457, %433 : vector<8x32xi1>, vector<8x32xf32>
    %cst_113 = arith.constant 0.000000e+00 : f32
    %470 = vector.shape_cast %463 : vector<8x1xi1> to vector<8x1xi1>
    %471 = vector.broadcast %470 : vector<8x1xi1> to vector<8x32xi1>
    %472 = vector.broadcast %cst_113 : f32 to vector<8x32xf32>
    %473 = arith.select %471, %459, %472 : vector<8x32xi1>, vector<8x32xf32>
    %c0_114 = arith.constant 0 : index
    %c384_115 = arith.constant 384 : index
    %474 = vector.load %arg5[%c0_114, %c384_115] : memref<8x512xf32, #tpu.memory_space<vmem>>, vector<8x32xf32>
    tpu.vector_store %arg5[%c0_114, %c384_115], %473 {strides = array<i32>} : memref<8x512xf32, #tpu.memory_space<vmem>>, vector<8x32xf32>,
    %c0_116 = arith.constant 0 : index
    %c1664 = arith.constant 1664 : index
    %475 = vector.load %arg3[%c0_116, %c1664] : memref<8x2048xf32, #tpu.memory_space<vmem>>, vector<8x128xf32>
    %476 = arith.truncf %466 : vector<8x32xf32> to vector<8x32xbf16>
    %cst_117 = arith.constant dense<0.000000e+00> : vector<8x128xf32>
    %477 = tpu.matmul %476, %3, %cst_117 {dimension_numbers = #tpu.dot_dimension_numbers<[1], [0], [0], [1], [0, 0, 1, 1], [], []>} : vector<8x32xbf16>, vector<32x128xbf16>, vector<8x128xf32> -> vector<8x128xf32>
    %478 = arith.addf %475, %477 : vector<8x128xf32>
    %cst_118 = arith.constant 0.000000e+00 : f32
    %479 = vector.broadcast %cst_118 : f32 to vector<8x128xf32>
    %480 = arith.subf %479, %478 : vector<8x128xf32>
    %481 = math.exp %480 : vector<8x128xf32>
    %cst_119 = arith.constant 1.000000e+00 : f32
    %482 = vector.broadcast %cst_119 : f32 to vector<8x128xf32>
    %483 = arith.addf %482, %481 : vector<8x128xf32>
    %cst_120 = arith.constant 1.000000e+00 : f32
    %484 = vector.broadcast %cst_120 : f32 to vector<8x128xf32>
    %485 = arith.divf %484, %483 : vector<8x128xf32>
    %486 = math.tanh %478 : vector<8x128xf32>
    %487 = vector.extract_strided_slice %485 {offsets = [0, 0], sizes = [8, 32], strides = [1, 1]} : vector<8x128xf32> to vector<8x32xf32>
    %488 = vector.extract_strided_slice %485 {offsets = [0, 32], sizes = [8, 32], strides = [1, 1]} : vector<8x128xf32> to vector<8x32xf32>
    %489 = vector.extract_strided_slice %486 {offsets = [0, 64], sizes = [8, 32], strides = [1, 1]} : vector<8x128xf32> to vector<8x32xf32>
    %490 = vector.extract_strided_slice %485 {offsets = [0, 96], sizes = [8, 32], strides = [1, 1]} : vector<8x128xf32> to vector<8x32xf32>
    %491 = arith.mulf %488, %469 : vector<8x32xf32>
    %492 = arith.mulf %487, %489 : vector<8x32xf32>
    %493 = arith.addf %491, %492 : vector<8x32xf32>
    %494 = math.tanh %493 : vector<8x32xf32>
    %495 = arith.mulf %490, %494 : vector<8x32xf32>
    %c16_i32_121 = arith.constant 16 : i32
    %496 = arith.muli %arg1, %c16_i32_121 : i32
    %c13_i32 = arith.constant 13 : i32
    %497 = arith.addi %496, %c13_i32 : i32
    %498 = vector.broadcast %497 : i32 to vector<8x1xi32>
    %499 = arith.cmpi slt, %498, %4 : vector<8x1xi32>
    %500 = vector.shape_cast %499 : vector<8x1xi1> to vector<8x1xi1>
    %501 = vector.broadcast %500 : vector<8x1xi1> to vector<8x32xi1>
    %502 = arith.select %501, %495, %466 : vector<8x32xi1>, vector<8x32xf32>
    %503 = vector.shape_cast %499 : vector<8x1xi1> to vector<8x1xi1>
    %504 = vector.broadcast %503 : vector<8x1xi1> to vector<8x32xi1>
    %505 = arith.select %504, %493, %469 : vector<8x32xi1>, vector<8x32xf32>
    %cst_122 = arith.constant 0.000000e+00 : f32
    %506 = vector.shape_cast %499 : vector<8x1xi1> to vector<8x1xi1>
    %507 = vector.broadcast %506 : vector<8x1xi1> to vector<8x32xi1>
    %508 = vector.broadcast %cst_122 : f32 to vector<8x32xf32>
    %509 = arith.select %507, %495, %508 : vector<8x32xi1>, vector<8x32xf32>
    %c0_123 = arith.constant 0 : index
    %c416 = arith.constant 416 : index
    %510 = vector.load %arg5[%c0_123, %c416] : memref<8x512xf32, #tpu.memory_space<vmem>>, vector<8x32xf32>
    tpu.vector_store %arg5[%c0_123, %c416], %509 {strides = array<i32>} : memref<8x512xf32, #tpu.memory_space<vmem>>, vector<8x32xf32>,
    %c0_124 = arith.constant 0 : index
    %c1792 = arith.constant 1792 : index
    %511 = vector.load %arg3[%c0_124, %c1792] : memref<8x2048xf32, #tpu.memory_space<vmem>>, vector<8x128xf32>
    %512 = arith.truncf %502 : vector<8x32xf32> to vector<8x32xbf16>
    %cst_125 = arith.constant dense<0.000000e+00> : vector<8x128xf32>
    %513 = tpu.matmul %512, %3, %cst_125 {dimension_numbers = #tpu.dot_dimension_numbers<[1], [0], [0], [1], [0, 0, 1, 1], [], []>} : vector<8x32xbf16>, vector<32x128xbf16>, vector<8x128xf32> -> vector<8x128xf32>
    %514 = arith.addf %511, %513 : vector<8x128xf32>
    %cst_126 = arith.constant 0.000000e+00 : f32
    %515 = vector.broadcast %cst_126 : f32 to vector<8x128xf32>
    %516 = arith.subf %515, %514 : vector<8x128xf32>
    %517 = math.exp %516 : vector<8x128xf32>
    %cst_127 = arith.constant 1.000000e+00 : f32
    %518 = vector.broadcast %cst_127 : f32 to vector<8x128xf32>
    %519 = arith.addf %518, %517 : vector<8x128xf32>
    %cst_128 = arith.constant 1.000000e+00 : f32
    %520 = vector.broadcast %cst_128 : f32 to vector<8x128xf32>
    %521 = arith.divf %520, %519 : vector<8x128xf32>
    %522 = math.tanh %514 : vector<8x128xf32>
    %523 = vector.extract_strided_slice %521 {offsets = [0, 0], sizes = [8, 32], strides = [1, 1]} : vector<8x128xf32> to vector<8x32xf32>
    %524 = vector.extract_strided_slice %521 {offsets = [0, 32], sizes = [8, 32], strides = [1, 1]} : vector<8x128xf32> to vector<8x32xf32>
    %525 = vector.extract_strided_slice %522 {offsets = [0, 64], sizes = [8, 32], strides = [1, 1]} : vector<8x128xf32> to vector<8x32xf32>
    %526 = vector.extract_strided_slice %521 {offsets = [0, 96], sizes = [8, 32], strides = [1, 1]} : vector<8x128xf32> to vector<8x32xf32>
    %527 = arith.mulf %524, %505 : vector<8x32xf32>
    %528 = arith.mulf %523, %525 : vector<8x32xf32>
    %529 = arith.addf %527, %528 : vector<8x32xf32>
    %530 = math.tanh %529 : vector<8x32xf32>
    %531 = arith.mulf %526, %530 : vector<8x32xf32>
    %c16_i32_129 = arith.constant 16 : i32
    %532 = arith.muli %arg1, %c16_i32_129 : i32
    %c14_i32 = arith.constant 14 : i32
    %533 = arith.addi %532, %c14_i32 : i32
    %534 = vector.broadcast %533 : i32 to vector<8x1xi32>
    %535 = arith.cmpi slt, %534, %4 : vector<8x1xi32>
    %536 = vector.shape_cast %535 : vector<8x1xi1> to vector<8x1xi1>
    %537 = vector.broadcast %536 : vector<8x1xi1> to vector<8x32xi1>
    %538 = arith.select %537, %531, %502 : vector<8x32xi1>, vector<8x32xf32>
    %539 = vector.shape_cast %535 : vector<8x1xi1> to vector<8x1xi1>
    %540 = vector.broadcast %539 : vector<8x1xi1> to vector<8x32xi1>
    %541 = arith.select %540, %529, %505 : vector<8x32xi1>, vector<8x32xf32>
    %cst_130 = arith.constant 0.000000e+00 : f32
    %542 = vector.shape_cast %535 : vector<8x1xi1> to vector<8x1xi1>
    %543 = vector.broadcast %542 : vector<8x1xi1> to vector<8x32xi1>
    %544 = vector.broadcast %cst_130 : f32 to vector<8x32xf32>
    %545 = arith.select %543, %531, %544 : vector<8x32xi1>, vector<8x32xf32>
    %c0_131 = arith.constant 0 : index
    %c448 = arith.constant 448 : index
    %546 = vector.load %arg5[%c0_131, %c448] : memref<8x512xf32, #tpu.memory_space<vmem>>, vector<8x32xf32>
    tpu.vector_store %arg5[%c0_131, %c448], %545 {strides = array<i32>} : memref<8x512xf32, #tpu.memory_space<vmem>>, vector<8x32xf32>,
    %c0_132 = arith.constant 0 : index
    %c1920 = arith.constant 1920 : index
    %547 = vector.load %arg3[%c0_132, %c1920] : memref<8x2048xf32, #tpu.memory_space<vmem>>, vector<8x128xf32>
    %548 = arith.truncf %538 : vector<8x32xf32> to vector<8x32xbf16>
    %cst_133 = arith.constant dense<0.000000e+00> : vector<8x128xf32>
    %549 = tpu.matmul %548, %3, %cst_133 {dimension_numbers = #tpu.dot_dimension_numbers<[1], [0], [0], [1], [0, 0, 1, 1], [], []>} : vector<8x32xbf16>, vector<32x128xbf16>, vector<8x128xf32> -> vector<8x128xf32>
    %550 = arith.addf %547, %549 : vector<8x128xf32>
    %cst_134 = arith.constant 0.000000e+00 : f32
    %551 = vector.broadcast %cst_134 : f32 to vector<8x128xf32>
    %552 = arith.subf %551, %550 : vector<8x128xf32>
    %553 = math.exp %552 : vector<8x128xf32>
    %cst_135 = arith.constant 1.000000e+00 : f32
    %554 = vector.broadcast %cst_135 : f32 to vector<8x128xf32>
    %555 = arith.addf %554, %553 : vector<8x128xf32>
    %cst_136 = arith.constant 1.000000e+00 : f32
    %556 = vector.broadcast %cst_136 : f32 to vector<8x128xf32>
    %557 = arith.divf %556, %555 : vector<8x128xf32>
    %558 = math.tanh %550 : vector<8x128xf32>
    %559 = vector.extract_strided_slice %557 {offsets = [0, 0], sizes = [8, 32], strides = [1, 1]} : vector<8x128xf32> to vector<8x32xf32>
    %560 = vector.extract_strided_slice %557 {offsets = [0, 32], sizes = [8, 32], strides = [1, 1]} : vector<8x128xf32> to vector<8x32xf32>
    %561 = vector.extract_strided_slice %558 {offsets = [0, 64], sizes = [8, 32], strides = [1, 1]} : vector<8x128xf32> to vector<8x32xf32>
    %562 = vector.extract_strided_slice %557 {offsets = [0, 96], sizes = [8, 32], strides = [1, 1]} : vector<8x128xf32> to vector<8x32xf32>
    %563 = arith.mulf %560, %541 : vector<8x32xf32>
    %564 = arith.mulf %559, %561 : vector<8x32xf32>
    %565 = arith.addf %563, %564 : vector<8x32xf32>
    %566 = math.tanh %565 : vector<8x32xf32>
    %567 = arith.mulf %562, %566 : vector<8x32xf32>
    %c16_i32_137 = arith.constant 16 : i32
    %568 = arith.muli %arg1, %c16_i32_137 : i32
    %c15_i32 = arith.constant 15 : i32
    %569 = arith.addi %568, %c15_i32 : i32
    %570 = vector.broadcast %569 : i32 to vector<8x1xi32>
    %571 = arith.cmpi slt, %570, %4 : vector<8x1xi32>
    %572 = vector.shape_cast %571 : vector<8x1xi1> to vector<8x1xi1>
    %573 = vector.broadcast %572 : vector<8x1xi1> to vector<8x32xi1>
    %574 = arith.select %573, %567, %538 : vector<8x32xi1>, vector<8x32xf32>
    %575 = vector.shape_cast %571 : vector<8x1xi1> to vector<8x1xi1>
    %576 = vector.broadcast %575 : vector<8x1xi1> to vector<8x32xi1>
    %577 = arith.select %576, %565, %541 : vector<8x32xi1>, vector<8x32xf32>
    %cst_138 = arith.constant 0.000000e+00 : f32
    %578 = vector.shape_cast %571 : vector<8x1xi1> to vector<8x1xi1>
    %579 = vector.broadcast %578 : vector<8x1xi1> to vector<8x32xi1>
    %580 = vector.broadcast %cst_138 : f32 to vector<8x32xf32>
    %581 = arith.select %579, %567, %580 : vector<8x32xi1>, vector<8x32xf32>
    %c0_139 = arith.constant 0 : index
    %c480 = arith.constant 480 : index
    %582 = vector.load %arg5[%c0_139, %c480] : memref<8x512xf32, #tpu.memory_space<vmem>>, vector<8x32xf32>
    tpu.vector_store %arg5[%c0_139, %c480], %581 {strides = array<i32>} : memref<8x512xf32, #tpu.memory_space<vmem>>, vector<8x32xf32>,
    %c0_140 = arith.constant 0 : index
    %c0_141 = arith.constant 0 : index
    %583 = vector.load %arg6[%c0_140, %c0_141] : memref<8x32xf32, #tpu.memory_space<vmem>>, vector<8x32xf32>
    tpu.vector_store %arg6[%c0_140, %c0_141], %574 {strides = array<i32>} : memref<8x32xf32, #tpu.memory_space<vmem>>, vector<8x32xf32>,
    %c0_142 = arith.constant 0 : index
    %c0_143 = arith.constant 0 : index
    %584 = vector.load %arg7[%c0_142, %c0_143] : memref<8x32xf32, #tpu.memory_space<vmem>>, vector<8x32xf32>
    tpu.vector_store %arg7[%c0_142, %c0_143], %577 {strides = array<i32>} : memref<8x32xf32, #tpu.memory_space<vmem>>, vector<8x32xf32>,
    return
  }
  func.func @transform_0(%arg0: i32, %arg1: i32) -> (i32, i32) {
    %c0_i32 = arith.constant 0 : i32
    %c0_i32_0 = arith.constant 0 : i32
    return %arg0, %c0_i32 : i32, i32
  }
  func.func @transform_1(%arg0: i32, %arg1: i32) -> (i32, i32) {
    %c0_i32 = arith.constant 0 : i32
    return %arg0, %arg1 : i32, i32
  }
  func.func @transform_2(%arg0: i32, %arg1: i32) -> (i32, i32) {
    %c0_i32 = arith.constant 0 : i32
    %c0_i32_0 = arith.constant 0 : i32
    %c0_i32_1 = arith.constant 0 : i32
    return %c0_i32, %c0_i32_0 : i32, i32
  }
  func.func @transform_3(%arg0: i32, %arg1: i32) -> (i32, i32) {
    %c0_i32 = arith.constant 0 : i32
    return %arg0, %arg1 : i32, i32
  }
}

module attributes {stable_mosaic.version = 11 : i64} {
  func.func @_fc_softmax_kernel(%arg0: i32, %arg1: memref<8x32xbf16, #tpu.memory_space<vmem>>, %arg2: memref<32x128xbf16, #tpu.memory_space<vmem>>, %arg3: memref<1x128xf32, #tpu.memory_space<vmem>>, %arg4: memref<8x128xf32, #tpu.memory_space<vmem>>) attributes {dimension_semantics = [#tpu.dimension_semantics<parallel>], iteration_bounds = array<i64: 1>, scalar_prefetch = 0 : i64, scratch_operands = 0 : i64, tpu.core_type = #tpu.core_type<tc>, window_params = [{transform_indices = @transform_0, window_bounds = array<i64: 8, 32>}, {pipeline_mode = #tpu.pipeline_mode<synchronous>, transform_indices = @transform_1, window_bounds = array<i64: 32, 128>}, {pipeline_mode = #tpu.pipeline_mode<synchronous>, transform_indices = @transform_2, window_bounds = array<i64: 1, 128>}, {transform_indices = @transform_3, window_bounds = array<i64: 8, 128>}]} {
    %c0 = arith.constant 0 : index
    %c0_0 = arith.constant 0 : index
    %0 = vector.load %arg1[%c0, %c0_0] : memref<8x32xbf16, #tpu.memory_space<vmem>>, vector<8x32xbf16>
    %c0_1 = arith.constant 0 : index
    %c0_2 = arith.constant 0 : index
    %1 = vector.load %arg2[%c0_1, %c0_2] : memref<32x128xbf16, #tpu.memory_space<vmem>>, vector<32x128xbf16>
    %cst = arith.constant dense<0.000000e+00> : vector<8x128xf32>
    %2 = tpu.matmul %0, %1, %cst {dimension_numbers = #tpu.dot_dimension_numbers<[1], [0], [0], [1], [0, 0, 1, 1], [], []>} : vector<8x32xbf16>, vector<32x128xbf16>, vector<8x128xf32> -> vector<8x128xf32>
    %c0_3 = arith.constant 0 : index
    %c0_4 = arith.constant 0 : index
    %3 = vector.load %arg3[%c0_3, %c0_4] : memref<1x128xf32, #tpu.memory_space<vmem>>, vector<1x128xf32>
    %4 = vector.broadcast %3 : vector<1x128xf32> to vector<8x128xf32>
    %5 = arith.addf %2, %4 : vector<8x128xf32>
    %cst_5 = arith.constant dense<0xFF800000> : vector<8xf32>
    %6 = vector.multi_reduction <maximumf>, %5, %cst_5 [1] : vector<8x128xf32> to vector<8xf32>
    %7 = vector.shape_cast %6 : vector<8xf32> to vector<8x1xf32>
    %8 = vector.broadcast %7 : vector<8x1xf32> to vector<8x128xf32>
    %9 = arith.subf %5, %8 : vector<8x128xf32>
    %10 = math.exp %9 : vector<8x128xf32>
    %cst_6 = arith.constant dense<0.000000e+00> : vector<8xf32>
    %11 = vector.multi_reduction <add>, %10, %cst_6 [1] : vector<8x128xf32> to vector<8xf32>
    %12 = vector.shape_cast %11 : vector<8xf32> to vector<8x1xf32>
    %13 = tpu.reciprocal %12 {approx = true} : vector<8x1xf32> -> vector<8x1xf32>
    %14 = vector.broadcast %13 : vector<8x1xf32> to vector<8x128xf32>
    %15 = arith.mulf %10, %14 : vector<8x128xf32>
    %c0_7 = arith.constant 0 : index
    %c0_8 = arith.constant 0 : index
    %16 = vector.load %arg4[%c0_7, %c0_8] : memref<8x128xf32, #tpu.memory_space<vmem>>, vector<8x128xf32>
    tpu.vector_store %arg4[%c0_7, %c0_8], %15 {strides = array<i32>} : memref<8x128xf32, #tpu.memory_space<vmem>>, vector<8x128xf32>,
    return
  }
  func.func @transform_0(%arg0: i32) -> (i32, i32) {
    %c0_i32 = arith.constant 0 : i32
    %c0_i32_0 = arith.constant 0 : i32
    return %arg0, %c0_i32 : i32, i32
  }
  func.func @transform_1(%arg0: i32) -> (i32, i32) {
    %c0_i32 = arith.constant 0 : i32
    %c0_i32_0 = arith.constant 0 : i32
    %c0_i32_1 = arith.constant 0 : i32
    return %c0_i32, %c0_i32_0 : i32, i32
  }
  func.func @transform_2(%arg0: i32) -> (i32, i32) {
    %c0_i32 = arith.constant 0 : i32
    %c0_i32_0 = arith.constant 0 : i32
    %c0_i32_1 = arith.constant 0 : i32
    return %c0_i32, %c0_i32_0 : i32, i32
  }
  func.func @transform_3(%arg0: i32) -> (i32, i32) {
    %c0_i32 = arith.constant 0 : i32
    %c0_i32_0 = arith.constant 0 : i32
    return %arg0, %c0_i32 : i32, i32
  }
}

</mosaic_0001>

<bundles_post_ra>
// kernel: cnn_lstm_forward.5
= control target key start
LH: loop header
LB: loop body
LE: loop exit
PB: predicated region body
PF: predicated region fallthrough
CT: control target
= control target key end

     0   :  { %s844_s12 = smov 0   ;;  %s846_s13 = smov 0   ;;  %s935_s0 = inlined_call_operand.vmem [shape: bf16[8,4096], index: 0, kind: input, shape index: {}]   ;;  %s936_s1 = inlined_call_operand.vmem [shape: bf16[4096,128], index: 1, kind: input, shape index: {}]   ;;  %s937_s2 = inlined_call_operand.vmem [shape: f32[1,128], index: 2, kind: input, shape index: {}]   ;;  %s938_s3 = inlined_call_operand.vmem [shape: f32[8,128], index: 3, kind: output, shape index: {}]  }
   0x1   :  { %s848_s14 = smov 0  }
   0x2 LB: > { %s22_s15 = sadd.s32 1, %s817_s13  ;;  %p647_p0 = scmp.ge.s32.totalorder %s821_s14, 1  ;;  %s821_s14 = sphi %s848_s14, %s13_s14   ;;  %s817_s13 = sphi %s846_s13, %s940_s13   ;;  %s813_s12 = sphi %s844_s12, %s939_s12  }
   0x3   : > { %p23_p1 = scmp.ge.s32.totalorder %s22_s15, 8  ;;  %p156_p2 = scmp.lt.s32.totalorder %s821_s14, 9 }
   0x5   : > { %s942_s15 = smov (%p23_p1, %s22_s15), 0  ;;  %p157_p3 = pnand %p647_p0, %p156_p2 }
   0x6   : > { %s648_s16 = sshll.u32 (!%p157_p3), %s813_s12, 2  ;;  %p650_p5 = scmp.ne.s32.totalorder (!%p157_p3), %s813_s12, 0 }
   0x7   : > { %160 = sbr.rel (%p157_p3) target bundleno = 270 (0x10e), region = 32  ;;  %p186_p4 = scmp.lt.s32.totalorder (!%p157_p3), %s648_s16, 31 }
   0xc   : > { %s944_s16 = smov (!%p186_p4, %s648_s16), 31  ;;  %201 = sbr.rel (%p650_p5) target bundleno = 19 (0x13), region = 36 }
   0xd   : > { %s649_s17 = sshll.u32 %s944_s16, 2 }
   0xe   : > { %s191_s20 = scalar_lea.vmem %s935_s0, %s649_s17 }
  0x11   : > { %v823_v0 = vmov 0.0  }
  0x12   : > { %202 = vst [vmem:[#allocation2] sm:$0xff] %v823_v0 }
  0x13 PF: > { %s651_s21 = sshll.u32 %s813_s12, 9  ;;  %v870_v1 = vld [vmem:[%s191_s20] sm:$0xff]  ;;  %v872_v2 = vld [vmem:[%s191_s20 + $0x8] sm:$0xff]  ;;  %p689_p6 = scmp.ne.s32.totalorder %s813_s12, 7 }
  0x14   : > { %s207_s22 = sshra.s32 %s651_s21, 3  ;;  %v654_v3 = vcombine.high %v870_v1, %v870_v1  ;;  %v656_v4 = vcombine.high %v872_v2, %v872_v2  ;;  %v653_v37 = vcombine.low %v870_v1, %v870_v1  ;;  %v655_v38 = vcombine.low %v872_v2, %v872_v2 }
  0x15   : > { %s652_s23 = sshll.u32 %s207_s22, 2 }
  0x16   : > { %s881_s26 = scalar_lea.vmem %s936_s1, %s652_s23  ;;  %513 = vmatprep.mubr.bf16.mxu0 %v654_v3  ;;  %553 = vmatprep.mubr.bf16.mxu1 %v656_v4 }
  0x17   : > { %v763_v5 = vld [vmem:[%s881_s26 + $0x78] sm:$0xff]   ;;  %v767_v9 = vld [vmem:[%s881_s26 + $0x70] sm:$0xff]   ;;  %v771_v13 = vld [vmem:[%s881_s26 + $0x68] sm:$0xff]  }
  0x18   : > { %v764_v6 = vld [vmem:[%s881_s26 + $0xf8] sm:$0xff]   ;;  %694 = vmatprep.subr.bf16.mxu0 %v763_v5  ;;  %v768_v10 = vld [vmem:[%s881_s26 + $0xf0] sm:$0xff]   ;;  %v772_v14 = vld [vmem:[%s881_s26 + $0xe8] sm:$0xff]  }
  0x19   : > { %v765_v7 = vld [vmem:[%s881_s26 + $0x38] sm:$0xff]   ;;  %716 = vmatprep.subr.bf16.mxu1 %v764_v6  ;;  %v769_v11 = vld [vmem:[%s881_s26 + $0x30] sm:$0xff]   ;;  %v773_v15 = vld [vmem:[%s881_s26 + $0x28] sm:$0xff]  }
  0x1a   : > { %v766_v8 = vld [vmem:[%s881_s26 + $0xb8] sm:$0xff]   ;;  %695 = vmatpush3.bf16.msra.mxu0 %v765_v7  ;;  %v770_v12 = vld [vmem:[%s881_s26 + $0xb0] sm:$0xff]   ;;  %v774_v16 = vld [vmem:[%s881_s26 + $0xa8] sm:$0xff]  }
  0x1b   : > { %717 = vmatpush3.bf16.msra.mxu1 %v766_v8  ;;  %696 = vmatprep.subr.bf16.mxu0 %v767_v9  ;;  %v775_v17 = vld [vmem:[%s881_s26 + $0x60] sm:$0xff]   ;;  %v779_v21 = vld [vmem:[%s881_s26 + $0x58] sm:$0xff]   ;;  %v783_v25 = vld [vmem:[%s881_s26 + $0x50] sm:$0xff]  }
  0x1c   : > { %718 = vmatprep.subr.bf16.mxu1 %v768_v10  ;;  %v776_v18 = vld [vmem:[%s881_s26 + $0xe0] sm:$0xff]   ;;  %v780_v22 = vld [vmem:[%s881_s26 + $0xd8] sm:$0xff]   ;;  %v784_v26 = vld [vmem:[%s881_s26 + $0xd0] sm:$0xff]  }
  0x1d   : > { %v777_v19 = vld [vmem:[%s881_s26 + $0x20] sm:$0xff]   ;;  %v781_v23 = vld [vmem:[%s881_s26 + $0x18] sm:$0xff]   ;;  %v785_v27 = vld [vmem:[%s881_s26 + $0x10] sm:$0xff]  }
  0x1e   : > { %697 = vmatpush3.bf16.msra.mxu0 %v769_v11  ;;  %v778_v20 = vld [vmem:[%s881_s26 + $0xa0] sm:$0xff]   ;;  %v782_v24 = vld [vmem:[%s881_s26 + $0x98] sm:$0xff]   ;;  %v786_v28 = vld [vmem:[%s881_s26 + $0x90] sm:$0xff]  }
  0x1f   : > { %719 = vmatpush3.bf16.msra.mxu1 %v770_v12  ;;  %698 = vmatprep.subr.bf16.mxu0 %v771_v13  ;;  %v787_v29 = vld [vmem:[%s881_s26 + $0x48] sm:$0xff]   ;;  %v791_v33 = vld [vmem:[%s881_s26 + $0x40] sm:$0xff]  }
  0x20   : > { %720 = vmatprep.subr.bf16.mxu1 %v772_v14  ;;  %v788_v30 = vld [vmem:[%s881_s26 + $0xc8] sm:$0xff]   ;;  %v792_v34 = vld [vmem:[%s881_s26 + $0xc0] sm:$0xff]  }
  0x21   : > { %v789_v31 = vld [vmem:[%s881_s26 + $0x8] sm:$0xff]   ;;  %v793_v35 = vld [vmem:[%s881_s26] sm:$0xff]  }
  0x22   : > { %699 = vmatpush3.bf16.msra.mxu0 %v773_v15  ;;  %v790_v32 = vld [vmem:[%s881_s26 + $0x88] sm:$0xff]   ;;  %v794_v36 = vld [vmem:[%s881_s26 + $0x80] sm:$0xff]  }
  0x23   : > { %721 = vmatpush3.bf16.msra.mxu1 %v774_v16  ;;  %700 = vmatprep.subr.bf16.mxu0 %v775_v17  ;;  %v204_v46 = vld [vmem:[#allocation2] sm:$0xff] }
  0x24   : > { %722 = vmatprep.subr.bf16.mxu1 %v776_v18 }
  0x26   : > { %701 = vmatpush3.bf16.msra.mxu0 %v777_v19 }
  0x27   : > { %723 = vmatpush3.bf16.msra.mxu1 %v778_v20  ;;  %702 = vmatprep.subr.bf16.mxu0 %v779_v21 }
  0x28   : > { %724 = vmatprep.subr.bf16.mxu1 %v780_v22 }
  0x2a   : > { %703 = vmatpush3.bf16.msra.mxu0 %v781_v23 }
  0x2b   : > { %725 = vmatpush3.bf16.msra.mxu1 %v782_v24  ;;  %704 = vmatprep.subr.bf16.mxu0 %v783_v25 }
  0x2c   : > { %726 = vmatprep.subr.bf16.mxu1 %v784_v26 }
  0x2e   : > { %705 = vmatpush3.bf16.msra.mxu0 %v785_v27 }
  0x2f   : > { %727 = vmatpush3.bf16.msra.mxu1 %v786_v28  ;;  %706 = vmatprep.subr.bf16.mxu0 %v787_v29 }
  0x30   : > { %728 = vmatprep.subr.bf16.mxu1 %v788_v30 }
  0x32   : > { %707 = vmatpush3.bf16.msra.mxu0 %v789_v31 }
  0x33   : > { %729 = vmatpush3.bf16.msra.mxu1 %v790_v32  ;;  %708 = vmatprep.subr.bf16.mxu0 %v791_v33 }
  0x34   : > { %730 = vmatprep.subr.bf16.mxu1 %v792_v34 }
  0x36   : > { %709 = vmatpush3.bf16.msra.mxu0 %v793_v35 }
  0x37   : > { %731 = vmatpush3.bf16.msra.mxu1 %v794_v36 }
  0x39   : > { %514 = vmatmul.mubr.bf16.vlgmr.msra.gmra.mxu0 %v653_v37 }
  0x3a   : > { %554 = vmatmul.mubr.bf16.vlgmr.msra.gmra.mxu1 %v655_v38 }
  0xf9   : > { %v710_v39 = vpop.f32.mrf.mxu0 }
  0xfa   : > { %v732_v40 = vpop.f32.mrf.mxu1 }
  0xfb   : > { %v711_v41 = vpop.f32.mrf.mxu0 }
  0xfc   : > { %v712_v42 = vadd.f32 %v711_v41, %v710_v39  ;;  %v733_v43 = vpop.f32.mrf.mxu1 }
  0xfd   : > { %v734_v44 = vadd.f32 %v733_v43, %v732_v40  ;;  %v713_v45 = vpop.f32.mrf.mxu0 }
  0xfe   : > { %v735_v47 = vpop.f32.mrf.mxu1 }
  0xff   : > { %v556_v48 = vadd.f32 %v734_v44, %v712_v42  ;;  %v714_v49 = vpop.f32.mrf.mxu0  ;;  %566 = sbr.rel (%p689_p6) target bundleno = 270 (0x10e), region = 40 }
 0x100   : > { %v736_v50 = vpop.f32.mrf.mxu1 }
 0x101   : > { %v561_v51 = vadd.f32 %v556_v48, %v204_v46 }
 0x103   : > { %562 = vst [vmem:[#allocation2] sm:$0xff] %v561_v51 }
 0x104   : > { %v690_v53 = vld [vmem:[%s937_s2] ss:$0 sm:$0xff] }
 0x10a   : > { %v567_v52 = vld [vmem:[#allocation2] sm:$0xff] }
 0x10b   : > { %v575_v54 = vadd.f32 %v690_v53, %v567_v52 }
 0x10d   : > { %576 = vst [vmem:[%s938_s3] sm:$0xff] %v575_v54 }
 0x10e PF: > { %s13_s14 = sadd.s32 1, %s821_s14   ;;  %s939_s12 = smov %s817_s13 }
 0x10f   : > { %p10_p7 = scmp.ge.s32.totalorder %s13_s14, 10   ;;  %s940_s13 = smov %s942_s15 }
 0x111   :  { %12 = sbr.rel (!%p10_p7) target bundleno = 2 (0x2), region = 71 }

// kernel: cnn_lstm_forward.7
= control target key start
LH: loop header
LB: loop body
LE: loop exit
PB: predicated region body
PF: predicated region fallthrough
CT: control target
= control target key end

     0   :  { %v154_v1 = vmov 0.0   ;;  %vm155_vm0 = vmmov 0   ;;  %s192_s0 = inlined_call_operand.vmem [shape: bf16[8,32], index: 0, kind: input, shape index: {}]   ;;  %s193_s1 = inlined_call_operand.vmem [shape: bf16[32,128], index: 1, kind: input, shape index: {}]   ;;  %s194_s2 = inlined_call_operand.vmem [shape: f32[1,128], index: 2, kind: input, shape index: {}]   ;;  %s195_s3 = inlined_call_operand.hbm [shape: f32[8,128], index: 3, kind: output, shape index: {}]  }
   0x1   :  { %v126_v0 = vld [vmem:[%s193_s1 + $0x8] sm:$0xff]   ;;  %115 = vmatprep.subr.bf16.mxu0 %v154_v1  ;;  %v127_v2 = vld [vmem:[%s193_s1] sm:$0xff]   ;;  %119 = vmatprep.mubr.msk.bf16.mxu0 %vm155_vm0, %v154_v1 }
   0x2   :  { %116 = vmatpush3.bf16.msra.mxu0 %v126_v0 }
   0x3   :  { %117 = vmatprep.subr.bf16.mxu0 %v154_v1 }
   0x4   :  { %8 = vsyncpa [#allocation3], 0  ;;  %v16_v3 = vld [vmem:[%s192_s0] sm:$0xf]  ;;  %vm40_vm1 = vcmask 261120   ;;  %s156_s0 = smov [#allocation2]  }
   0x5   :  { %v108_v4 = vld [vmem:[%s194_s2] ss:$0 sm:$0xff]  ;;  %s100_s1 = sshll.u32 %s156_s0, 4  ;;  %s101_s1 = int_to_ptr.vmem [resolvable:$true] %s100_s1 }
   0x6   :  { %118 = vmatpush3.bf16.msra.mxu0 %v127_v2  ;;  %s132_s2 = scalar_lea.vmem %s101_s1, 128  ;;  %p137_p1 = scmp.lt.s32.totalorder %s101_s1, %s101_s1 }
   0x7   :  { %p133_p0 = scmp.ne.s32.totalorder %s101_s1, %s132_s2  ;;  %p138_p2 = scmp.lt.s32.totalorder %s132_s2, %s132_s2 }
   0x9   :  { %120 = vmatmul.mubr.msk.bf16.vlgmr.msra.gmra.mxu0 %vm40_vm1, %v16_v3  ;;  %p139_p3 = por %p138_p2, %p137_p1 }
   0xb   :  { %p140_p4 = pnand %p139_p3, %p133_p0 }
  0xc9   :  { %v78_v5 = vpop.f32.mrf.mxu0 }
  0xca   :  { %v79_v6 = vadd.f32 %v108_v4, %v78_v5 }
  0xcb   :  { %v121_v7 = vpop.f32.mrf.mxu0 }
  0xcc   :  { %84 = vmax.xlane.f32.xlu0 %v79_v6 }
  0xcd   :  { %v81_v8 = vpop.f32.mrf.mxu0 }
  0xcf   :  { %v122_v9 = vpop.f32.mrf.mxu0 }
 0x155   :  { %v85_v10 = vpop.xlane.xlu0 %84 }
 0x156   :  { %v86_v11 = vsub.f32 %v79_v6, %v85_v10 }
 0x158   :  { %v87_v12 = vmul.f32 1.442695, %v86_v11 }
 0x15a   :  { %128 = vpow2.f32 %v87_v12 }
 0x167   :  { %v129_v13 = vpop.eup %128 }
 0x168   :  { %89 = vadd.xlane.f32.xlu0 %v129_v13 }
 0x1f1   :  { %v90_v14 = vpop.xlane.xlu0 %89 }
 0x1f2   :  { %130 = vrcp.f32 %v90_v14 }
 0x1ff   :  { %v131_v15 = vpop.eup %130 }
 0x200   :  { %v92_v16 = vmul.f32 %v131_v15, %v129_v13 }
 0x202   :  { %93 = vst [vmem:[#allocation2] sm:$0xff] %v92_v16 }
 0x203   :  { %143 = shalt.err (!%p140_p4)
}
 0x204   :  { %103 = dma.vmem_to_hbm [thread:$0]  %s101_s1, 128, %s195_s3, [#allocation3]  }
 0x205   :  { %152 = dma.done.wait [#allocation3], 128  }
 0x206   :  { %153 = vsyncadd [#allocation3], 4294967168 }
 0x207   :  { %107 = vsyncpa [#allocation3], 1 }

// kernel: cnn_lstm_forward.4
= control target key start
LH: loop header
LB: loop body
LE: loop exit
PB: predicated region body
PF: predicated region fallthrough
CT: control target
= control target key end

     0   :  { %vm116_vm0 = vcmask 1043456   ;;  %vm117_vm1 = vcmask 1044480   ;;  %v5825_v2 = vmov 65535   ;;  %v5826_v5 = vmov 0   ;;  %s7215_s0 = inlined_call_operand.vmem [shape: bf16[16,25,1024], index: 0, kind: input, shape index: {}]   ;;  %s7216_s1 = inlined_call_operand.vmem [shape: bf16[16,25], index: 1, kind: input, shape index: {}]   ;;  %s7217_s2 = inlined_call_operand.vmem [shape: f32[16,1], index: 2, kind: input, shape index: {}]   ;;  %s7218_s3 = inlined_call_operand.vmem [shape: bf16[16,16,256], index: 3, kind: output, shape index: {}]  }
   0x1   :  { %v27_v0 = vld [vmem:[%s7215_s0 + $0x40] sm:$0xff]  ;;  %v118_v3 = vsel %vm116_vm0, 4294967295, %v5825_v2  ;;  %v28_v4 = vld [vmem:[%s7215_s0 + $0x48] sm:$0xff]  ;;  %176 = vmatprep.mubr.bf16.mxu0 %v5826_v5  ;;  %219 = vmatprep.mubr.bf16.mxu1 %v5826_v5  ;;  %v29_v19 = vld [vmem:[%s7215_s0 + $0x50] sm:$0xff]  ;;  %vm112_vm2 = vcmask 203776  }
   0x2   :  { %v31_v1 = vld [vmem:[%s7215_s0 + $0x60] sm:$0x11]  ;;  %v5858_v7 = vsel %vm117_vm1, %v118_v3, 0  ;;  %v32_v8 = vld [vmem:[%s7215_s0 + $0x68] sm:$0x11]  ;;  %5821 = vset.pattern.permute.xlu0 %v5826_v5  ;;  %v30_v24 = vld [vmem:[%s7215_s0 + $0x58] sm:$0xff] }
   0x3   :  { %v5174_v6 = vcombine.high %v27_v0, %v31_v1  ;;  %v5173_v9 = vcombine.low %v27_v0, %v31_v1  ;;  %v19_v10 = vld [vmem:[%s7215_s0] sm:$0xff]  ;;  %v5176_v12 = vcombine.high %v28_v4, %v32_v8  ;;  %v5175_v13 = vcombine.low %v28_v4, %v32_v8  ;;  %v20_v14 = vld [vmem:[%s7215_s0 + $0x8] sm:$0xff]  ;;  %v33_v23 = vld [vmem:[%s7215_s0 + $0x70] sm:$0x11] }
   0x4   :  { %v23_v11 = vld [vmem:[%s7215_s0 + $0x20] sm:$0xff]  ;;  %v24_v15 = vld [vmem:[%s7215_s0 + $0x28] sm:$0xff]  ;;  %v34_v25 = vld [vmem:[%s7215_s0 + $0x78] sm:$0x11]  ;;  %v5178_v26 = vcombine.high %v29_v19, %v33_v23  ;;  %v5177_v29 = vcombine.low %v29_v19, %v33_v23 }
   0x5   :  { %v124_v16 = vand.u32 %v5174_v6, %v5858_v7  ;;  %v121_v17 = vand.u32 %v5173_v9, %v5858_v7  ;;  %v5166_v18 = vcombine.high %v19_v10, %v23_v11  ;;  %v130_v20 = vand.u32 %v5176_v12, %v5858_v7  ;;  %v5895_v31 = vld [vmem:[%s7216_s1] sm:$0xff]   ;;  %v21_v34 = vld [vmem:[%s7215_s0 + $0x10] sm:$0xff]  ;;  %v22_v37 = vld [vmem:[%s7215_s0 + $0x18] sm:$0xff] }
   0x6   :  { %v127_v21 = vand.u32 %v5175_v13, %v5858_v7  ;;  %v5168_v22 = vcombine.high %v20_v14, %v24_v15  ;;  %v5180_v27 = vcombine.high %v30_v24, %v34_v25  ;;  %v5165_v28 = vcombine.low %v19_v10, %v23_v11  ;;  %v25_v35 = vld [vmem:[%s7215_s0 + $0x30] sm:$0xff]  ;;  %v5195_v38 = vld [vmem:[%s7215_s0 + $0xc0] sm:$0xff]  ;;  %v26_v40 = vld [vmem:[%s7215_s0 + $0x38] sm:$0xff] }
   0x7   :  { %156 = vmatprep.subr.bf16.mxu0 %v124_v16  ;;  %199 = vmatprep.subr.bf16.mxu1 %v130_v20  ;;  %v5167_v30 = vcombine.low %v20_v14, %v24_v15  ;;  %v136_v32 = vand.u32 %v5178_v26, %v5858_v7  ;;  %v5179_v33 = vcombine.low %v30_v24, %v34_v25  ;;  %v5199_v39 = vld [vmem:[%s7215_s0 + $0xe0] sm:$0x11]  ;;  %v5196_v41 = vld [vmem:[%s7215_s0 + $0xc8] sm:$0xff]  ;;  %v5197_v58 = vld [vmem:[%s7215_s0 + $0xd0] sm:$0xff] }
   0x8   :  { %157 = vmatpush1.bf16.msra.mxu0 %v121_v17  ;;  %200 = vmatpush1.bf16.msra.mxu1 %v127_v21  ;;  %v142_v36 = vand.u32 %v5180_v27, %v5858_v7  ;;  %v5200_v42 = vld [vmem:[%s7215_s0 + $0xe8] sm:$0x11]  ;;  %v133_v43 = vand.u32 %v5177_v29, %v5858_v7  ;;  %v5170_v45 = vcombine.high %v21_v34, %v25_v35  ;;  %v5187_v54 = vld [vmem:[%s7215_s0 + $0x80] sm:$0xff]  ;;  %v5201_v59 = vld [vmem:[%s7215_s0 + $0xf0] sm:$0x11] }
   0x9   :  { %158 = vmatprep.subr.bf16.mxu0 %v5166_v18  ;;  %201 = vmatprep.subr.bf16.mxu1 %v5168_v22  ;;  %v139_v44 = vand.u32 %v5179_v33, %v5858_v7  ;;  %v5212_v46 = vcombine.high %v5195_v38, %v5199_v39  ;;  %v5172_v47 = vcombine.high %v22_v37, %v26_v40  ;;  %v5191_v55 = vld [vmem:[%s7215_s0 + $0xa0] sm:$0xff]  ;;  %v5188_v57 = vld [vmem:[%s7215_s0 + $0x88] sm:$0xff]  ;;  %v5198_v61 = vld [vmem:[%s7215_s0 + $0xd8] sm:$0xff] }
   0xa   :  { %v5214_v48 = vcombine.high %v5196_v41, %v5200_v42  ;;  %v5169_v49 = vcombine.low %v21_v34, %v25_v35  ;;  %v5211_v50 = vcombine.low %v5195_v38, %v5199_v39  ;;  %v5171_v51 = vcombine.low %v22_v37, %v26_v40  ;;  %v5192_v60 = vld [vmem:[%s7215_s0 + $0xa8] sm:$0xff]  ;;  %v5202_v62 = vld [vmem:[%s7215_s0 + $0xf8] sm:$0x11]  ;;  %v5189_v12 = vld [vmem:[%s7215_s0 + $0x90] sm:$0xff] }
   0xb   :  { %v453_v52 = vand.u32 %v5212_v46, %v5858_v7  ;;  %v5213_v53 = vcombine.low %v5196_v41, %v5200_v42  ;;  %v5204_v1 = vcombine.high %v5187_v54, %v5191_v55  ;;  %v5216_v2 = vcombine.high %v5197_v58, %v5201_v59  ;;  %v5193_v13 = vld [vmem:[%s7215_s0 + $0xb0] sm:$0xff]  ;;  %v5190_v15 = vld [vmem:[%s7215_s0 + $0x98] sm:$0xff]  ;;  %v5235_v16 = vld [vmem:[%s7215_s0 + $0x140] sm:$0xff] }
   0xc   :  { %159 = vmatpush1.bf16.msra.mxu0 %v5165_v28  ;;  %202 = vmatpush1.bf16.msra.mxu1 %v5167_v30  ;;  %v459_v56 = vand.u32 %v5214_v48, %v5858_v7  ;;  %v450_v63 = vand.u32 %v5211_v50, %v5858_v7  ;;  %v5206_v3 = vcombine.high %v5188_v57, %v5192_v60  ;;  %v5239_v17 = vld [vmem:[%s7215_s0 + $0x160] sm:$0x11]  ;;  %v5194_v18 = vld [vmem:[%s7215_s0 + $0xb8] sm:$0xff]  ;;  %v5236_v19 = vld [vmem:[%s7215_s0 + $0x148] sm:$0xff] }
   0xd   :  { %242 = vmatprep.subr.bf16.mxu0 %v136_v32  ;;  %285 = vmatprep.subr.bf16.mxu1 %v142_v36  ;;  %v456_v0 = vand.u32 %v5213_v53, %v5858_v7  ;;  %v5218_v4 = vcombine.high %v5198_v61, %v5202_v62  ;;  %v5203_v6 = vcombine.low %v5187_v54, %v5191_v55  ;;  %v5240_v20 = vld [vmem:[%s7215_s0 + $0x168] sm:$0x11]  ;;  %v5227_v33 = vld [vmem:[%s7215_s0 + $0x100] sm:$0xff]  ;;  %v5237_v37 = vld [vmem:[%s7215_s0 + $0x150] sm:$0xff] }
   0xe   :  { %v5215_v8 = vcombine.low %v5197_v58, %v5201_v59  ;;  %v5205_v9 = vcombine.low %v5188_v57, %v5192_v60  ;;  %v465_v10 = vand.u32 %v5216_v2, %v5858_v7  ;;  %v5217_v11 = vcombine.low %v5198_v61, %v5202_v62  ;;  %v5231_v34 = vld [vmem:[%s7215_s0 + $0x120] sm:$0xff]  ;;  %v5228_v36 = vld [vmem:[%s7215_s0 + $0x108] sm:$0xff]  ;;  %v5241_v38 = vld [vmem:[%s7215_s0 + $0x170] sm:$0x11] }
   0xf   :  { %5181 = vmatmul.mubr.msk.bf16.vlgmr.msra.gmra.mxu0 %vm112_vm2, %v5895_v31  ;;  %5182 = vmatmul.mubr.msk.bf16.vlgmr.msra.gmra.mxu1 %vm112_vm2, %v5895_v31  ;;  %v471_v14 = vand.u32 %v5218_v4, %v5858_v7  ;;  %v5208_v23 = vcombine.high %v5189_v12, %v5193_v13  ;;  %v5252_v24 = vcombine.high %v5235_v16, %v5239_v17  ;;  %v5232_v39 = vld [vmem:[%s7215_s0 + $0x128] sm:$0xff]  ;;  %v5238_v40 = vld [vmem:[%s7215_s0 + $0x158] sm:$0xff]  ;;  %v17_v50 = vld [vmem:[%s7217_s2] sm:$0xff] }
  0x10   :  { %243 = vmatpush1.bf16.msra.mxu0 %v133_v43  ;;  %286 = vmatpush1.bf16.msra.mxu1 %v139_v44  ;;  %v462_v21 = vand.u32 %v5215_v8, %v5858_v7  ;;  %v468_v22 = vand.u32 %v5217_v11, %v5858_v7  ;;  %v5210_v25 = vcombine.high %v5190_v15, %v5194_v18  ;;  %v5242_v41 = vld [vmem:[%s7215_s0 + $0x178] sm:$0x11]  ;;  %v5229_v54 = vld [vmem:[%s7215_s0 + $0x110] sm:$0xff]  ;;  %v5275_v58 = vld [vmem:[%s7215_s0 + $0x1c0] sm:$0xff] }
  0x11   :  { %244 = vmatprep.subr.bf16.mxu0 %v5170_v45  ;;  %287 = vmatprep.subr.bf16.mxu1 %v5172_v47  ;;  %v5254_v26 = vcombine.high %v5236_v19, %v5240_v20  ;;  %v5207_v27 = vcombine.low %v5189_v12, %v5193_v13  ;;  %v5251_v28 = vcombine.low %v5235_v16, %v5239_v17  ;;  %v5233_v55 = vld [vmem:[%s7215_s0 + $0x130] sm:$0xff]  ;;  %v5230_v57 = vld [vmem:[%s7215_s0 + $0x118] sm:$0xff]  ;;  %v5279_v59 = vld [vmem:[%s7215_s0 + $0x1e0] sm:$0x11] }
  0x12   :  { %262 = vmatprep.mubr.bf16.mxu0 %v5826_v5  ;;  %305 = vmatprep.mubr.bf16.mxu1 %v5826_v5  ;;  %v5209_v29 = vcombine.low %v5190_v15, %v5194_v18  ;;  %v773_v30 = vand.u32 %v5252_v24, %v5858_v7  ;;  %v5253_v32 = vcombine.low %v5236_v19, %v5240_v20  ;;  %v5234_v60 = vld [vmem:[%s7215_s0 + $0x138] sm:$0xff]  ;;  %v5276_v61 = vld [vmem:[%s7215_s0 + $0x1c8] sm:$0xff]  ;;  %v5267_v13 = vld [vmem:[%s7215_s0 + $0x180] sm:$0xff] }
  0x13   :  { %v779_v35 = vand.u32 %v5254_v26, %v5858_v7  ;;  %v770_v42 = vand.u32 %v5251_v28, %v5858_v7  ;;  %v5244_v44 = vcombine.high %v5227_v33, %v5231_v34  ;;  %v5256_v45 = vcombine.high %v5237_v37, %v5241_v38  ;;  %v5280_v62 = vld [vmem:[%s7215_s0 + $0x1e8] sm:$0x11]  ;;  %330 = vperm.xlu0 %5821, %v17_v50   ;;  %v5277_v17 = vld [vmem:[%s7215_s0 + $0x1d0] sm:$0xff]  ;;  %v5278_v20 = vld [vmem:[%s7215_s0 + $0x1d8] sm:$0xff] }
  0x14   :  { %245 = vmatpush1.bf16.msra.mxu0 %v5169_v49  ;;  %288 = vmatpush1.bf16.msra.mxu1 %v5171_v51  ;;  %v776_v43 = vand.u32 %v5253_v32, %v5858_v7  ;;  %v5246_v46 = vcombine.high %v5228_v36, %v5232_v39  ;;  %v5258_v47 = vcombine.high %v5238_v40, %v5242_v41  ;;  %v5268_v16 = vld [vmem:[%s7215_s0 + $0x188] sm:$0xff]  ;;  %v5281_v18 = vld [vmem:[%s7215_s0 + $0x1f0] sm:$0x11] }
  0x15   :  { %485 = vmatprep.subr.bf16.mxu0 %v453_v52  ;;  %528 = vmatprep.subr.bf16.mxu1 %v459_v56  ;;  %v5243_v48 = vcombine.low %v5227_v33, %v5231_v34  ;;  %v5255_v49 = vcombine.low %v5237_v37, %v5241_v38  ;;  %v5245_v51 = vcombine.low %v5228_v36, %v5232_v39  ;;  %v5272_v19 = vld [vmem:[%s7215_s0 + $0x1a8] sm:$0xff]  ;;  %v5269_v34 = vld [vmem:[%s7215_s0 + $0x190] sm:$0xff]  ;;  %v5270_v37 = vld [vmem:[%s7215_s0 + $0x198] sm:$0xff] }
  0x16   :  { %v785_v52 = vand.u32 %v5256_v45, %v5858_v7  ;;  %v5257_v53 = vcombine.low %v5238_v40, %v5242_v41  ;;  %v791_v56 = vand.u32 %v5258_v47, %v5858_v7  ;;  %v5248_v2 = vcombine.high %v5229_v54, %v5233_v55  ;;  %v5315_v38 = vld [vmem:[%s7215_s0 + $0x240] sm:$0xff]  ;;  %v5274_v40 = vld [vmem:[%s7215_s0 + $0x1b8] sm:$0xff]  ;;  %v5316_v41 = vld [vmem:[%s7215_s0 + $0x248] sm:$0xff] }
  0x17   :  { %5183 = vmatmul.mubr.msk.bf16.vlgmr.msra.gmra.mxu0 %vm112_vm2, %v5895_v31  ;;  %5184 = vmatmul.mubr.msk.bf16.vlgmr.msra.gmra.mxu1 %vm112_vm2, %v5895_v31  ;;  %v5250_v4 = vcombine.high %v5230_v57, %v5234_v60  ;;  %v5247_v8 = vcombine.low %v5229_v54, %v5233_v55  ;;  %v5293_v12 = vcombine.low %v5276_v61, %v5280_v62  ;;  %v5319_v39 = vld [vmem:[%s7215_s0 + $0x260] sm:$0x11] }
  0x18   :  { %486 = vmatpush1.bf16.msra.mxu0 %v450_v63  ;;  %529 = vmatpush1.bf16.msra.mxu1 %v456_v0  ;;  %v782_v63 = vand.u32 %v5255_v49, %v5858_v7  ;;  %v18_v0 = vld [vmem:[%s7217_s2 + $0x8] sm:$0xff]  ;;  %v5286_v26 = vcombine.high %v5268_v16, %v5272_v19  ;;  %v5290_v47 = vcombine.high %v5270_v37, %v5274_v40  ;;  %v5307_v54 = vld [vmem:[%s7215_s0 + $0x200] sm:$0xff] }
  0x19   :  { %487 = vmatprep.subr.bf16.mxu0 %v5204_v1  ;;  %530 = vmatprep.subr.bf16.mxu1 %v5206_v3  ;;  %v788_v1 = vand.u32 %v5257_v53, %v5858_v7  ;;  %v5292_v3 = vcombine.high %v5275_v58, %v5279_v59  ;;  %v5331_v50 = vcombine.low %v5315_v38, %v5319_v39  ;;  %v5311_v55 = vld [vmem:[%s7215_s0 + $0x220] sm:$0xff] }
  0x1a   :  { %505 = vmatprep.mubr.bf16.mxu0 %v5826_v5  ;;  %548 = vmatprep.mubr.bf16.mxu1 %v5826_v5 }
  0x1b   :  { %335 = vperm.xlu0 %5821, %v18_v0   ;;  %v1093_v11 = vand.u32 %v5292_v3, %v5858_v7 }
  0x1c   :  { %488 = vmatpush1.bf16.msra.mxu0 %v5203_v6  ;;  %531 = vmatpush1.bf16.msra.mxu1 %v5205_v9  ;;  %v5294_v6 = vcombine.high %v5276_v61, %v5280_v62  ;;  %v5291_v9 = vcombine.low %v5275_v58, %v5279_v59  ;;  %v5317_v58 = vld [vmem:[%s7215_s0 + $0x250] sm:$0xff]  ;;  %v5318_v61 = vld [vmem:[%s7215_s0 + $0x258] sm:$0xff] }
  0x1d   :  { %571 = vmatprep.subr.bf16.mxu0 %v465_v10  ;;  %614 = vmatprep.subr.bf16.mxu1 %v471_v14  ;;  %v5249_v10 = vcombine.low %v5230_v57, %v5234_v60  ;;  %v5271_v14 = vld [vmem:[%s7215_s0 + $0x1a0] sm:$0xff]  ;;  %v5308_v57 = vld [vmem:[%s7215_s0 + $0x208] sm:$0xff]  ;;  %v5321_v59 = vld [vmem:[%s7215_s0 + $0x270] sm:$0x11] }
  0x1e   :  { %v1099_v15 = vand.u32 %v5294_v6, %v5858_v7  ;;  %v5284_v24 = vcombine.high %v5267_v13, %v5271_v14  ;;  %v5283_v28 = vcombine.low %v5267_v13, %v5271_v14  ;;  %v5312_v60 = vld [vmem:[%s7215_s0 + $0x228] sm:$0xff]  ;;  %v5322_v62 = vld [vmem:[%s7215_s0 + $0x278] sm:$0x11]  ;;  %v5323_v6 = vcombine.low %v5307_v54, %v5311_v55  ;;  %v5313_v13 = vld [vmem:[%s7215_s0 + $0x230] sm:$0xff] }
  0x1f   :  { %5219 = vmatmul.mubr.msk.bf16.vlgmr.msra.gmra.mxu0 %vm112_vm2, %v5895_v31  ;;  %5220 = vmatmul.mubr.msk.bf16.vlgmr.msra.gmra.mxu1 %vm112_vm2, %v5895_v31  ;;  %v5326_v3 = vcombine.high %v5308_v57, %v5312_v60 }
  0x20   :  { %572 = vmatpush1.bf16.msra.mxu0 %v462_v21  ;;  %615 = vmatpush1.bf16.msra.mxu1 %v468_v22  ;;  %v5282_v21 = vld [vmem:[%s7215_s0 + $0x1f8] sm:$0x11]  ;;  %v1090_v22 = vand.u32 %v5291_v9, %v5858_v7  ;;  %v5325_v9 = vcombine.low %v5308_v57, %v5312_v60  ;;  %v5395_v57 = vld [vmem:[%s7215_s0 + $0x340] sm:$0xff]  ;;  %v5396_v60 = vld [vmem:[%s7215_s0 + $0x348] sm:$0xff] }
  0x21   :  { %573 = vmatprep.subr.bf16.mxu0 %v5208_v23  ;;  %616 = vmatprep.subr.bf16.mxu1 %v5210_v25  ;;  %v1096_v23 = vand.u32 %v5293_v12, %v5858_v7  ;;  %v5296_v25 = vcombine.high %v5277_v17, %v5281_v18  ;;  %v5297_v33 = vcombine.low %v5278_v20, %v5282_v21  ;;  %v5309_v12 = vld [vmem:[%s7215_s0 + $0x210] sm:$0xff] }
  0x22   :  { %591 = vmatprep.mubr.bf16.mxu0 %v5826_v5  ;;  %634 = vmatprep.mubr.bf16.mxu1 %v5826_v5 }
  0x23   :  { %v1105_v32 = vand.u32 %v5296_v25, %v5858_v7 }
  0x24   :  { %574 = vmatpush1.bf16.msra.mxu0 %v5207_v27  ;;  %617 = vmatpush1.bf16.msra.mxu1 %v5209_v29  ;;  %v5298_v27 = vcombine.high %v5278_v20, %v5282_v21  ;;  %v5295_v29 = vcombine.low %v5277_v17, %v5281_v18  ;;  %v5359_v17 = vld [vmem:[%s7215_s0 + $0x2e0] sm:$0x11]  ;;  %v5314_v18 = vld [vmem:[%s7215_s0 + $0x238] sm:$0xff]  ;;  %v5360_v20 = vld [vmem:[%s7215_s0 + $0x2e8] sm:$0x11] }
  0x25   :  { %805 = vmatprep.subr.bf16.mxu0 %v773_v30  ;;  %848 = vmatprep.subr.bf16.mxu1 %v779_v35  ;;  %v5285_v30 = vcombine.low %v5268_v16, %v5272_v19  ;;  %v5273_v35 = vld [vmem:[%s7215_s0 + $0x1b0] sm:$0xff]  ;;  %v5355_v16 = vld [vmem:[%s7215_s0 + $0x2c0] sm:$0xff]  ;;  %v5356_v19 = vld [vmem:[%s7215_s0 + $0x2c8] sm:$0xff] }
  0x26   :  { %v1111_v36 = vand.u32 %v5298_v27, %v5858_v7  ;;  %v5288_v45 = vcombine.high %v5269_v34, %v5273_v35  ;;  %v5287_v49 = vcombine.low %v5269_v34, %v5273_v35  ;;  %v5327_v27 = vcombine.low %v5309_v12, %v5313_v13  ;;  %v5351_v34 = vld [vmem:[%s7215_s0 + $0x2a0] sm:$0xff] }
  0x27   :  { %5221 = vmatmul.mubr.msk.bf16.vlgmr.msra.gmra.mxu0 %vm112_vm2, %v5895_v31  ;;  %5222 = vmatmul.mubr.msk.bf16.vlgmr.msra.gmra.mxu1 %vm112_vm2, %v5895_v31 }
  0x28   :  { %806 = vmatpush1.bf16.msra.mxu0 %v770_v42  ;;  %849 = vmatpush1.bf16.msra.mxu1 %v776_v43  ;;  %v5320_v42 = vld [vmem:[%s7215_s0 + $0x268] sm:$0x11]  ;;  %v1102_v43 = vand.u32 %v5295_v29, %v5858_v7 }
  0x29   :  { %807 = vmatprep.subr.bf16.mxu0 %v5244_v44  ;;  %850 = vmatprep.subr.bf16.mxu1 %v5246_v46  ;;  %v1108_v44 = vand.u32 %v5297_v33, %v5858_v7  ;;  %v5332_v46 = vcombine.high %v5315_v38, %v5319_v39  ;;  %v5333_v53 = vcombine.low %v5316_v41, %v5320_v42  ;;  %v5347_v33 = vld [vmem:[%s7215_s0 + $0x280] sm:$0xff]  ;;  %v5361_v38 = vld [vmem:[%s7215_s0 + $0x2f0] sm:$0x11]  ;;  %v5352_v39 = vld [vmem:[%s7215_s0 + $0x2a8] sm:$0xff] }
  0x2a   :  { %825 = vmatprep.mubr.bf16.mxu0 %v5826_v5  ;;  %868 = vmatprep.mubr.bf16.mxu1 %v5826_v5 }
  0x2b   :  { %v1416_v0 = vand.u32 %v5333_v53, %v5858_v7  ;;  %v5349_v53 = vld [vmem:[%s7215_s0 + $0x290] sm:$0xff] }
  0x2c   :  { %808 = vmatpush1.bf16.msra.mxu0 %v5243_v48  ;;  %851 = vmatpush1.bf16.msra.mxu1 %v5245_v51  ;;  %v5334_v48 = vcombine.high %v5316_v41, %v5320_v42  ;;  %v5289_v51 = vcombine.low %v5270_v37, %v5274_v40  ;;  %v5357_v37 = vld [vmem:[%s7215_s0 + $0x2d0] sm:$0xff]  ;;  %v5358_v40 = vld [vmem:[%s7215_s0 + $0x2d8] sm:$0xff] }
  0x2d   :  { %891 = vmatprep.subr.bf16.mxu0 %v785_v52  ;;  %934 = vmatprep.subr.bf16.mxu1 %v791_v56  ;;  %v1413_v52 = vand.u32 %v5332_v46, %v5858_v7  ;;  %v5362_v41 = vld [vmem:[%s7215_s0 + $0x2f8] sm:$0x11] }
  0x2e   :  { %v1419_v56 = vand.u32 %v5334_v48, %v5858_v7  ;;  %v5363_v48 = vcombine.low %v5347_v33, %v5351_v34 }
  0x2f   :  { %5259 = vmatmul.mubr.msk.bf16.vlgmr.msra.gmra.mxu0 %vm112_vm2, %v5895_v31  ;;  %5260 = vmatmul.mubr.msk.bf16.vlgmr.msra.gmra.mxu1 %vm112_vm2, %v5895_v31 }
  0x30   :  { %892 = vmatpush1.bf16.msra.mxu0 %v782_v63  ;;  %935 = vmatpush1.bf16.msra.mxu1 %v788_v1  ;;  %v1410_v63 = vand.u32 %v5331_v50, %v5858_v7  ;;  %v5324_v1 = vcombine.high %v5307_v54, %v5311_v55  ;;  %v5353_v54 = vld [vmem:[%s7215_s0 + $0x2b0] sm:$0xff] }
  0x31   :  { %893 = vmatprep.subr.bf16.mxu0 %v5248_v2  ;;  %936 = vmatprep.subr.bf16.mxu1 %v5250_v4  ;;  %v5336_v2 = vcombine.high %v5317_v58, %v5321_v59  ;;  %v5338_v4 = vcombine.high %v5318_v61, %v5322_v62 }
  0x32   :  { %911 = vmatprep.mubr.bf16.mxu0 %v5826_v5  ;;  %954 = vmatprep.mubr.bf16.mxu1 %v5826_v5 }
  0x33   :  { %v1431_v14 = vand.u32 %v5338_v4, %v5858_v7  ;;  %v5367_v4 = vcombine.low %v5349_v53, %v5353_v54 }
  0x34   :  { %894 = vmatpush1.bf16.msra.mxu0 %v5247_v8  ;;  %937 = vmatpush1.bf16.msra.mxu1 %v5249_v10  ;;  %v5335_v8 = vcombine.low %v5317_v58, %v5321_v59  ;;  %v1425_v10 = vand.u32 %v5336_v2, %v5858_v7  ;;  %v5399_v58 = vld [vmem:[%s7215_s0 + $0x360] sm:$0x11]  ;;  %v5354_v59 = vld [vmem:[%s7215_s0 + $0x2b8] sm:$0xff] }
  0x35   :  { %1125 = vmatprep.subr.bf16.mxu0 %v1093_v11  ;;  %1168 = vmatprep.subr.bf16.mxu1 %v1099_v15  ;;  %v5337_v11 = vcombine.low %v5318_v61, %v5322_v62  ;;  %v5310_v15 = vld [vmem:[%s7215_s0 + $0x218] sm:$0xff]  ;;  %v5400_v61 = vld [vmem:[%s7215_s0 + $0x368] sm:$0x11] }
  0x36   :  { %v1422_v21 = vand.u32 %v5335_v8, %v5858_v7  ;;  %v5330_v25 = vcombine.high %v5310_v15, %v5314_v18  ;;  %v5329_v29 = vcombine.low %v5310_v15, %v5314_v18  ;;  %v5397_v15 = vld [vmem:[%s7215_s0 + $0x350] sm:$0xff]  ;;  %v5398_v18 = vld [vmem:[%s7215_s0 + $0x358] sm:$0xff] }
  0x37   :  { %5261 = vmatmul.mubr.msk.bf16.vlgmr.msra.gmra.mxu0 %vm112_vm2, %v5895_v31  ;;  %5262 = vmatmul.mubr.msk.bf16.vlgmr.msra.gmra.mxu1 %vm112_vm2, %v5895_v31 }
  0x38   :  { %1126 = vmatpush1.bf16.msra.mxu0 %v1090_v22  ;;  %1169 = vmatpush1.bf16.msra.mxu1 %v1096_v23  ;;  %v1428_v22 = vand.u32 %v5337_v11, %v5858_v7  ;;  %v5328_v23 = vcombine.high %v5309_v12, %v5313_v13  ;;  %v5387_v11 = vld [vmem:[%s7215_s0 + $0x300] sm:$0xff] }
  0x39   :  { %1127 = vmatprep.subr.bf16.mxu0 %v5284_v24  ;;  %1170 = vmatprep.subr.bf16.mxu1 %v5286_v26  ;;  %v5372_v24 = vcombine.high %v5355_v16, %v5359_v17  ;;  %v5374_v26 = vcombine.high %v5356_v19, %v5360_v20  ;;  %v5391_v12 = vld [vmem:[%s7215_s0 + $0x320] sm:$0xff] }
  0x3a   :  { %1145 = vmatprep.mubr.bf16.mxu0 %v5826_v5  ;;  %1188 = vmatprep.mubr.bf16.mxu1 %v5826_v5 }
  0x3b   :  { %v1739_v35 = vand.u32 %v5374_v26, %v5858_v7  ;;  %v5403_v26 = vcombine.low %v5387_v11, %v5391_v12 }
  0x3c   :  { %1128 = vmatpush1.bf16.msra.mxu0 %v5283_v28  ;;  %1171 = vmatpush1.bf16.msra.mxu1 %v5285_v30  ;;  %v5371_v28 = vcombine.low %v5355_v16, %v5359_v17  ;;  %v1733_v30 = vand.u32 %v5372_v24, %v5858_v7  ;;  %v5401_v16 = vld [vmem:[%s7215_s0 + $0x370] sm:$0x11]  ;;  %v5392_v17 = vld [vmem:[%s7215_s0 + $0x328] sm:$0xff] }
  0x3d   :  { %1211 = vmatprep.subr.bf16.mxu0 %v1105_v32  ;;  %1254 = vmatprep.subr.bf16.mxu1 %v1111_v36  ;;  %v5373_v32 = vcombine.low %v5356_v19, %v5360_v20  ;;  %v5348_v36 = vld [vmem:[%s7215_s0 + $0x288] sm:$0xff]  ;;  %v5402_v19 = vld [vmem:[%s7215_s0 + $0x378] sm:$0x11] }
  0x3e   :  { %v1730_v42 = vand.u32 %v5371_v28, %v5858_v7  ;;  %v5366_v46 = vcombine.high %v5348_v36, %v5352_v39  ;;  %v5365_v50 = vcombine.low %v5348_v36, %v5352_v39  ;;  %v5435_v36 = vld [vmem:[%s7215_s0 + $0x3c0] sm:$0xff]  ;;  %v5436_v39 = vld [vmem:[%s7215_s0 + $0x3c8] sm:$0xff] }
  0x3f   :  { %5299 = vmatmul.mubr.msk.bf16.vlgmr.msra.gmra.mxu0 %vm112_vm2, %v5895_v31  ;;  %5300 = vmatmul.mubr.msk.bf16.vlgmr.msra.gmra.mxu1 %vm112_vm2, %v5895_v31 }
  0x40   :  { %1212 = vmatpush1.bf16.msra.mxu0 %v1102_v43  ;;  %1255 = vmatpush1.bf16.msra.mxu1 %v1108_v44  ;;  %v1736_v43 = vand.u32 %v5373_v32, %v5858_v7  ;;  %v5364_v44 = vcombine.high %v5347_v33, %v5351_v34  ;;  %v5389_v32 = vld [vmem:[%s7215_s0 + $0x310] sm:$0xff] }
  0x41   :  { %1213 = vmatprep.subr.bf16.mxu0 %v5288_v45  ;;  %1256 = vmatprep.subr.bf16.mxu1 %v5290_v47  ;;  %v5376_v45 = vcombine.high %v5357_v37, %v5361_v38  ;;  %v5378_v47 = vcombine.high %v5358_v40, %v5362_v41  ;;  %v5393_v33 = vld [vmem:[%s7215_s0 + $0x330] sm:$0xff] }
  0x42   :  { %1231 = vmatprep.mubr.bf16.mxu0 %v5826_v5  ;;  %1274 = vmatprep.mubr.bf16.mxu1 %v5826_v5 }
  0x43   :  { %v1751_v55 = vand.u32 %v5378_v47, %v5858_v7  ;;  %v5407_v47 = vcombine.low %v5389_v32, %v5393_v33 }
  0x44   :  { %1214 = vmatpush1.bf16.msra.mxu0 %v5287_v49  ;;  %1257 = vmatpush1.bf16.msra.mxu1 %v5289_v51  ;;  %v5375_v49 = vcombine.low %v5357_v37, %v5361_v38  ;;  %v1745_v51 = vand.u32 %v5376_v45, %v5858_v7  ;;  %v5439_v37 = vld [vmem:[%s7215_s0 + $0x3e0] sm:$0x11]  ;;  %v5394_v38 = vld [vmem:[%s7215_s0 + $0x338] sm:$0xff] }
  0x45   :  { %1445 = vmatprep.subr.bf16.mxu0 %v1413_v52  ;;  %1488 = vmatprep.subr.bf16.mxu1 %v1419_v56  ;;  %v5377_v52 = vcombine.low %v5358_v40, %v5362_v41  ;;  %v5350_v56 = vld [vmem:[%s7215_s0 + $0x298] sm:$0xff]  ;;  %v5440_v40 = vld [vmem:[%s7215_s0 + $0x3e8] sm:$0x11] }
  0x46   :  { %v1742_v62 = vand.u32 %v5375_v49, %v5858_v7  ;;  %v5370_v2 = vcombine.high %v5350_v56, %v5354_v59  ;;  %v5369_v8 = vcombine.low %v5350_v56, %v5354_v59  ;;  %v5437_v56 = vld [vmem:[%s7215_s0 + $0x3d0] sm:$0xff]  ;;  %v5438_v59 = vld [vmem:[%s7215_s0 + $0x3d8] sm:$0xff] }
  0x47   :  { %5301 = vmatmul.mubr.msk.bf16.vlgmr.msra.gmra.mxu0 %vm112_vm2, %v5895_v31  ;;  %5302 = vmatmul.mubr.msk.bf16.vlgmr.msra.gmra.mxu1 %vm112_vm2, %v5895_v31 }
  0x48   :  { %1446 = vmatpush1.bf16.msra.mxu0 %v1410_v63  ;;  %1489 = vmatpush1.bf16.msra.mxu1 %v1416_v0  ;;  %v1748_v63 = vand.u32 %v5377_v52, %v5858_v7  ;;  %v5368_v0 = vcombine.high %v5349_v53, %v5353_v54  ;;  %v5427_v52 = vld [vmem:[%s7215_s0 + $0x380] sm:$0xff] }
  0x49   :  { %1447 = vmatprep.subr.bf16.mxu0 %v5324_v1  ;;  %1490 = vmatprep.subr.bf16.mxu1 %v5326_v3  ;;  %v5412_v1 = vcombine.high %v5395_v57, %v5399_v58  ;;  %v5414_v3 = vcombine.high %v5396_v60, %v5400_v61  ;;  %v5431_v53 = vld [vmem:[%s7215_s0 + $0x3a0] sm:$0xff] }
  0x4a   :  { %1465 = vmatprep.mubr.bf16.mxu0 %v5826_v5  ;;  %1508 = vmatprep.mubr.bf16.mxu1 %v5826_v5 }
  0x4b   :  { %v2059_v13 = vand.u32 %v5414_v3, %v5858_v7  ;;  %v5443_v3 = vcombine.low %v5427_v52, %v5431_v53 }
  0x4c   :  { %1448 = vmatpush1.bf16.msra.mxu0 %v5323_v6  ;;  %1491 = vmatpush1.bf16.msra.mxu1 %v5325_v9  ;;  %v5411_v6 = vcombine.low %v5395_v57, %v5399_v58  ;;  %v2053_v9 = vand.u32 %v5412_v1, %v5858_v7  ;;  %v5441_v57 = vld [vmem:[%s7215_s0 + $0x3f0] sm:$0x11]  ;;  %v5432_v58 = vld [vmem:[%s7215_s0 + $0x3a8] sm:$0xff] }
  0x4d   :  { %1531 = vmatprep.subr.bf16.mxu0 %v1425_v10  ;;  %1574 = vmatprep.subr.bf16.mxu1 %v1431_v14  ;;  %v5413_v10 = vcombine.low %v5396_v60, %v5400_v61  ;;  %v5388_v14 = vld [vmem:[%s7215_s0 + $0x308] sm:$0xff]  ;;  %v5442_v60 = vld [vmem:[%s7215_s0 + $0x3f8] sm:$0x11] }
  0x4e   :  { %v2050_v20 = vand.u32 %v5411_v6, %v5858_v7  ;;  %v5406_v24 = vcombine.high %v5388_v14, %v5392_v17  ;;  %v5405_v28 = vcombine.low %v5388_v14, %v5392_v17  ;;  %v5475_v14 = vld [vmem:[%s7215_s0 + $0x440] sm:$0xff]  ;;  %v5476_v17 = vld [vmem:[%s7215_s0 + $0x448] sm:$0xff] }
  0x4f   :  { %5339 = vmatmul.mubr.msk.bf16.vlgmr.msra.gmra.mxu0 %vm112_vm2, %v5895_v31  ;;  %5340 = vmatmul.mubr.msk.bf16.vlgmr.msra.gmra.mxu1 %vm112_vm2, %v5895_v31 }
  0x50   :  { %1532 = vmatpush1.bf16.msra.mxu0 %v1422_v21  ;;  %1575 = vmatpush1.bf16.msra.mxu1 %v1428_v22  ;;  %v2056_v21 = vand.u32 %v5413_v10, %v5858_v7  ;;  %v5404_v22 = vcombine.high %v5387_v11, %v5391_v12  ;;  %v5429_v10 = vld [vmem:[%s7215_s0 + $0x390] sm:$0xff] }
  0x51   :  { %1533 = vmatprep.subr.bf16.mxu0 %v5328_v23  ;;  %1576 = vmatprep.subr.bf16.mxu1 %v5330_v25  ;;  %v5416_v23 = vcombine.high %v5397_v15, %v5401_v16  ;;  %v5418_v25 = vcombine.high %v5398_v18, %v5402_v19  ;;  %v5433_v11 = vld [vmem:[%s7215_s0 + $0x3b0] sm:$0xff] }
  0x52   :  { %1551 = vmatprep.mubr.bf16.mxu0 %v5826_v5  ;;  %1594 = vmatprep.mubr.bf16.mxu1 %v5826_v5 }
  0x53   :  { %v2071_v34 = vand.u32 %v5418_v25, %v5858_v7  ;;  %v5447_v25 = vcombine.low %v5429_v10, %v5433_v11 }
  0x54   :  { %1534 = vmatpush1.bf16.msra.mxu0 %v5327_v27  ;;  %1577 = vmatpush1.bf16.msra.mxu1 %v5329_v29  ;;  %v5415_v27 = vcombine.low %v5397_v15, %v5401_v16  ;;  %v2065_v29 = vand.u32 %v5416_v23, %v5858_v7  ;;  %v5479_v15 = vld [vmem:[%s7215_s0 + $0x460] sm:$0x11]  ;;  %v5434_v16 = vld [vmem:[%s7215_s0 + $0x3b8] sm:$0xff] }
  0x55   :  { %1765 = vmatprep.subr.bf16.mxu0 %v1733_v30  ;;  %1808 = vmatprep.subr.bf16.mxu1 %v1739_v35  ;;  %v5417_v30 = vcombine.low %v5398_v18, %v5402_v19  ;;  %v5390_v35 = vld [vmem:[%s7215_s0 + $0x318] sm:$0xff]  ;;  %v5480_v18 = vld [vmem:[%s7215_s0 + $0x468] sm:$0x11] }
  0x56   :  { %v2062_v41 = vand.u32 %v5415_v27, %v5858_v7  ;;  %v5410_v45 = vcombine.high %v5390_v35, %v5394_v38  ;;  %v5409_v49 = vcombine.low %v5390_v35, %v5394_v38  ;;  %v5477_v35 = vld [vmem:[%s7215_s0 + $0x450] sm:$0xff]  ;;  %v5478_v38 = vld [vmem:[%s7215_s0 + $0x458] sm:$0xff] }
  0x57   :  { %5341 = vmatmul.mubr.msk.bf16.vlgmr.msra.gmra.mxu0 %vm112_vm2, %v5895_v31  ;;  %5342 = vmatmul.mubr.msk.bf16.vlgmr.msra.gmra.mxu1 %vm112_vm2, %v5895_v31 }
  0x58   :  { %1766 = vmatpush1.bf16.msra.mxu0 %v1730_v42  ;;  %1809 = vmatpush1.bf16.msra.mxu1 %v1736_v43  ;;  %v2068_v42 = vand.u32 %v5417_v30, %v5858_v7  ;;  %v5408_v43 = vcombine.high %v5389_v32, %v5393_v33  ;;  %v5467_v30 = vld [vmem:[%s7215_s0 + $0x400] sm:$0xff] }
  0x59   :  { %1767 = vmatprep.subr.bf16.mxu0 %v5364_v44  ;;  %1810 = vmatprep.subr.bf16.mxu1 %v5366_v46  ;;  %v5452_v44 = vcombine.high %v5435_v36, %v5439_v37  ;;  %v5454_v46 = vcombine.high %v5436_v39, %v5440_v40  ;;  %v5471_v32 = vld [vmem:[%s7215_s0 + $0x420] sm:$0xff] }
  0x5a   :  { %1785 = vmatprep.mubr.bf16.mxu0 %v5826_v5  ;;  %1828 = vmatprep.mubr.bf16.mxu1 %v5826_v5 }
  0x5b   :  { %v2379_v54 = vand.u32 %v5454_v46, %v5858_v7  ;;  %v5483_v46 = vcombine.low %v5467_v30, %v5471_v32 }
  0x5c   :  { %1768 = vmatpush1.bf16.msra.mxu0 %v5363_v48  ;;  %1811 = vmatpush1.bf16.msra.mxu1 %v5365_v50  ;;  %v5451_v48 = vcombine.low %v5435_v36, %v5439_v37  ;;  %v2373_v50 = vand.u32 %v5452_v44, %v5858_v7  ;;  %v5481_v36 = vld [vmem:[%s7215_s0 + $0x470] sm:$0x11]  ;;  %v5472_v37 = vld [vmem:[%s7215_s0 + $0x428] sm:$0xff] }
  0x5d   :  { %1851 = vmatprep.subr.bf16.mxu0 %v1745_v51  ;;  %1894 = vmatprep.subr.bf16.mxu1 %v1751_v55  ;;  %v5453_v51 = vcombine.low %v5436_v39, %v5440_v40  ;;  %v5428_v55 = vld [vmem:[%s7215_s0 + $0x388] sm:$0xff]  ;;  %v5482_v39 = vld [vmem:[%s7215_s0 + $0x478] sm:$0x11] }
  0x5e   :  { %v2370_v61 = vand.u32 %v5451_v48, %v5858_v7  ;;  %v5446_v1 = vcombine.high %v5428_v55, %v5432_v58  ;;  %v5445_v6 = vcombine.low %v5428_v55, %v5432_v58  ;;  %v5519_v55 = vld [vmem:[%s7215_s0 + $0x4e0] sm:$0x11]  ;;  %v5520_v58 = vld [vmem:[%s7215_s0 + $0x4e8] sm:$0x11] }
  0x5f   :  { %5379 = vmatmul.mubr.msk.bf16.vlgmr.msra.gmra.mxu0 %vm112_vm2, %v5895_v31  ;;  %5380 = vmatmul.mubr.msk.bf16.vlgmr.msra.gmra.mxu1 %vm112_vm2, %v5895_v31 }
  0x60   :  { %1852 = vmatpush1.bf16.msra.mxu0 %v1742_v62  ;;  %1895 = vmatpush1.bf16.msra.mxu1 %v1748_v63  ;;  %v2376_v62 = vand.u32 %v5453_v51, %v5858_v7  ;;  %v5444_v63 = vcombine.high %v5427_v52, %v5431_v53  ;;  %v5469_v51 = vld [vmem:[%s7215_s0 + $0x410] sm:$0xff]  ;;  %v5470_v53 = vld [vmem:[%s7215_s0 + $0x418] sm:$0xff] }
  0x61   :  { %1853 = vmatprep.subr.bf16.mxu0 %v5368_v0  ;;  %1896 = vmatprep.subr.bf16.mxu1 %v5370_v2  ;;  %v5456_v0 = vcombine.high %v5437_v56, %v5441_v57  ;;  %v5458_v2 = vcombine.high %v5438_v59, %v5442_v60  ;;  %v5473_v52 = vld [vmem:[%s7215_s0 + $0x430] sm:$0xff] }
  0x62   :  { %1871 = vmatprep.mubr.bf16.mxu0 %v5826_v5  ;;  %1914 = vmatprep.mubr.bf16.mxu1 %v5826_v5 }
  0x63   :  { %v2391_v12 = vand.u32 %v5458_v2, %v5858_v7  ;;  %v5487_v2 = vcombine.low %v5469_v51, %v5473_v52 }
  0x64   :  { %1854 = vmatpush1.bf16.msra.mxu0 %v5367_v4  ;;  %1897 = vmatpush1.bf16.msra.mxu1 %v5369_v8  ;;  %v5455_v4 = vcombine.low %v5437_v56, %v5441_v57  ;;  %v2385_v8 = vand.u32 %v5456_v0, %v5858_v7  ;;  %v5474_v56 = vld [vmem:[%s7215_s0 + $0x438] sm:$0xff]  ;;  %v5516_v57 = vld [vmem:[%s7215_s0 + $0x4c8] sm:$0xff] }
  0x65   :  { %2085 = vmatprep.subr.bf16.mxu0 %v2053_v9  ;;  %2128 = vmatprep.subr.bf16.mxu1 %v2059_v13  ;;  %v5457_v9 = vcombine.low %v5438_v59, %v5442_v60  ;;  %v5430_v13 = vld [vmem:[%s7215_s0 + $0x398] sm:$0xff]  ;;  %v5534_v0 = vcombine.high %v5516_v57, %v5520_v58 }
  0x66   :  { %v2382_v19 = vand.u32 %v5455_v4, %v5858_v7  ;;  %v5450_v23 = vcombine.high %v5430_v13, %v5434_v16  ;;  %v5449_v27 = vcombine.low %v5430_v13, %v5434_v16  ;;  %v5489_v4 = vcombine.low %v5470_v53, %v5474_v56  ;;  %v5517_v13 = vld [vmem:[%s7215_s0 + $0x4d0] sm:$0xff]  ;;  %v5518_v16 = vld [vmem:[%s7215_s0 + $0x4d8] sm:$0xff] }
  0x67   :  { %5381 = vmatmul.mubr.msk.bf16.vlgmr.msra.gmra.mxu0 %vm112_vm2, %v5895_v31  ;;  %5382 = vmatmul.mubr.msk.bf16.vlgmr.msra.gmra.mxu1 %vm112_vm2, %v5895_v31 }
  0x68   :  { %2086 = vmatpush1.bf16.msra.mxu0 %v2050_v20  ;;  %2129 = vmatpush1.bf16.msra.mxu1 %v2056_v21  ;;  %v2388_v20 = vand.u32 %v5457_v9, %v5858_v7  ;;  %v5448_v21 = vcombine.high %v5429_v10, %v5433_v11  ;;  %v5507_v9 = vld [vmem:[%s7215_s0 + $0x480] sm:$0xff]  ;;  %v3019_v11 = vand.u32 %v5534_v0, %v5858_v7 }
  0x69   :  { %2087 = vmatprep.subr.bf16.mxu0 %v5404_v22  ;;  %2130 = vmatprep.subr.bf16.mxu1 %v5406_v24  ;;  %v5492_v22 = vcombine.high %v5475_v14, %v5479_v15  ;;  %v5494_v24 = vcombine.high %v5476_v17, %v5480_v18  ;;  %v5511_v10 = vld [vmem:[%s7215_s0 + $0x4a0] sm:$0xff] }
  0x6a   :  { %2105 = vmatprep.mubr.bf16.mxu0 %v5826_v5  ;;  %2148 = vmatprep.mubr.bf16.mxu1 %v5826_v5 }
  0x6b   :  { %v2699_v33 = vand.u32 %v5494_v24, %v5858_v7  ;;  %v5523_v24 = vcombine.low %v5507_v9, %v5511_v10 }
  0x6c   :  { %2088 = vmatpush1.bf16.msra.mxu0 %v5403_v26  ;;  %2131 = vmatpush1.bf16.msra.mxu1 %v5405_v28  ;;  %v5491_v26 = vcombine.low %v5475_v14, %v5479_v15  ;;  %v2693_v28 = vand.u32 %v5492_v22, %v5858_v7  ;;  %v5521_v14 = vld [vmem:[%s7215_s0 + $0x4f0] sm:$0x11]  ;;  %v5512_v15 = vld [vmem:[%s7215_s0 + $0x4a8] sm:$0xff] }
  0x6d   :  { %2171 = vmatprep.subr.bf16.mxu0 %v2065_v29  ;;  %2214 = vmatprep.subr.bf16.mxu1 %v2071_v34  ;;  %v5493_v29 = vcombine.low %v5476_v17, %v5480_v18  ;;  %v5468_v34 = vld [vmem:[%s7215_s0 + $0x408] sm:$0xff]  ;;  %v5522_v17 = vld [vmem:[%s7215_s0 + $0x4f8] sm:$0x11] }
  0x6e   :  { %v2690_v40 = vand.u32 %v5491_v26, %v5858_v7  ;;  %v5486_v44 = vcombine.high %v5468_v34, %v5472_v37  ;;  %v5485_v48 = vcombine.low %v5468_v34, %v5472_v37  ;;  %v5555_v34 = vld [vmem:[%s7215_s0 + $0x540] sm:$0xff]  ;;  %v5556_v37 = vld [vmem:[%s7215_s0 + $0x548] sm:$0xff] }
  0x6f   :  { %5419 = vmatmul.mubr.msk.bf16.vlgmr.msra.gmra.mxu0 %vm112_vm2, %v5895_v31  ;;  %5420 = vmatmul.mubr.msk.bf16.vlgmr.msra.gmra.mxu1 %vm112_vm2, %v5895_v31 }
  0x70   :  { %2172 = vmatpush1.bf16.msra.mxu0 %v2062_v41  ;;  %2215 = vmatpush1.bf16.msra.mxu1 %v2068_v42  ;;  %v2696_v41 = vand.u32 %v5493_v29, %v5858_v7  ;;  %v5484_v42 = vcombine.high %v5467_v30, %v5471_v32  ;;  %v5509_v29 = vld [vmem:[%s7215_s0 + $0x490] sm:$0xff] }
  0x71   :  { %2173 = vmatprep.subr.bf16.mxu0 %v5408_v43  ;;  %2216 = vmatprep.subr.bf16.mxu1 %v5410_v45  ;;  %v5496_v43 = vcombine.high %v5477_v35, %v5481_v36  ;;  %v5498_v45 = vcombine.high %v5478_v38, %v5482_v39  ;;  %v5513_v30 = vld [vmem:[%s7215_s0 + $0x4b0] sm:$0xff] }
  0x72   :  { %2191 = vmatprep.mubr.bf16.mxu0 %v5826_v5  ;;  %2234 = vmatprep.mubr.bf16.mxu1 %v5826_v5 }
  0x74   :  { %2174 = vmatpush1.bf16.msra.mxu0 %v5407_v47  ;;  %2217 = vmatpush1.bf16.msra.mxu1 %v5409_v49  ;;  %v5495_v47 = vcombine.low %v5477_v35, %v5481_v36  ;;  %v2705_v49 = vand.u32 %v5496_v43, %v5858_v7  ;;  %v5559_v35 = vld [vmem:[%s7215_s0 + $0x560] sm:$0x11]  ;;  %v5514_v36 = vld [vmem:[%s7215_s0 + $0x4b8] sm:$0xff] }
  0x75   :  { %2405 = vmatprep.subr.bf16.mxu0 %v2373_v50  ;;  %2448 = vmatprep.subr.bf16.mxu1 %v2379_v54  ;;  %v5497_v50 = vcombine.low %v5478_v38, %v5482_v39  ;;  %v5515_v54 = vld [vmem:[%s7215_s0 + $0x4c0] sm:$0xff]  ;;  %v5560_v38 = vld [vmem:[%s7215_s0 + $0x568] sm:$0x11] }
  0x76   :  { %v2702_v59 = vand.u32 %v5495_v47, %v5858_v7 }
  0x77   :  { %5421 = vmatmul.mubr.msk.bf16.vlgmr.msra.gmra.mxu0 %vm112_vm2, %v5895_v31  ;;  %5422 = vmatmul.mubr.msk.bf16.vlgmr.msra.gmra.mxu1 %vm112_vm2, %v5895_v31  ;;  %v2708_v60 = vand.u32 %v5497_v50, %v5858_v7  ;;  %v5547_v50 = vld [vmem:[%s7215_s0 + $0x500] sm:$0xff] }
  0x78   :  { %2406 = vmatpush1.bf16.msra.mxu0 %v2370_v61  ;;  %2449 = vmatpush1.bf16.msra.mxu1 %v2376_v62  ;;  %v5488_v61 = vcombine.high %v5469_v51, %v5473_v52  ;;  %v5532_v62 = vcombine.high %v5515_v54, %v5519_v55  ;;  %v5551_v51 = vld [vmem:[%s7215_s0 + $0x520] sm:$0xff] }
  0x79   :  { %2407 = vmatprep.subr.bf16.mxu0 %v5444_v63  ;;  %2450 = vmatprep.subr.bf16.mxu1 %v5446_v1  ;;  %v5490_v63 = vcombine.high %v5470_v53, %v5474_v56  ;;  %v6478_v1 = vld [vmem:[%s7216_s1] sm:$0xff]   ;;  %v5557_v53 = vld [vmem:[%s7215_s0 + $0x550] sm:$0xff]  ;;  %v5558_v56 = vld [vmem:[%s7215_s0 + $0x558] sm:$0xff]  ;;  %v5563_v0 = vcombine.low %v5547_v50, %v5551_v51 }
  0x7a   :  { %2425 = vmatprep.mubr.bf16.mxu0 %v5826_v5  ;;  %2468 = vmatprep.mubr.bf16.mxu1 %v5826_v5 }
  0x7c   :  { %2408 = vmatpush1.bf16.msra.mxu0 %v5443_v3  ;;  %2451 = vmatpush1.bf16.msra.mxu1 %v5445_v6  ;;  %v5531_v3 = vcombine.low %v5515_v54, %v5519_v55  ;;  %v3013_v6 = vand.u32 %v5532_v62, %v5858_v7  ;;  %v5561_v54 = vld [vmem:[%s7215_s0 + $0x570] sm:$0x11]  ;;  %v5552_v55 = vld [vmem:[%s7215_s0 + $0x528] sm:$0xff] }
  0x7d   :  { %2491 = vmatprep.subr.bf16.mxu0 %v2385_v8  ;;  %2534 = vmatprep.subr.bf16.mxu1 %v2391_v12  ;;  %v5533_v8 = vcombine.low %v5516_v57, %v5520_v58  ;;  %v5508_v12 = vld [vmem:[%s7215_s0 + $0x488] sm:$0xff]  ;;  %v5562_v57 = vld [vmem:[%s7215_s0 + $0x578] sm:$0x11] }
  0x7e   :  { %v3010_v18 = vand.u32 %v5531_v3, %v5858_v7  ;;  %v5526_v22 = vcombine.high %v5508_v12, %v5512_v15  ;;  %v5525_v26 = vcombine.low %v5508_v12, %v5512_v15  ;;  %v5595_v12 = vld [vmem:[%s7215_s0 + $0x5c0] sm:$0xff]  ;;  %v5596_v15 = vld [vmem:[%s7215_s0 + $0x5c8] sm:$0xff] }
  0x7f   :  { %5459 = vmatmul.mubr.msk.bf16.vlgmr.msra.gmra.mxu0 %vm112_vm2, %v5895_v31  ;;  %5460 = vmatmul.mubr.msk.bf16.vlgmr.msra.gmra.mxu1 %vm112_vm2, %v5895_v31 }
  0x80   :  { %2492 = vmatpush1.bf16.msra.mxu0 %v2382_v19  ;;  %2535 = vmatpush1.bf16.msra.mxu1 %v2388_v20  ;;  %v3016_v19 = vand.u32 %v5533_v8, %v5858_v7  ;;  %v5524_v20 = vcombine.high %v5507_v9, %v5511_v10  ;;  %v5549_v8 = vld [vmem:[%s7215_s0 + $0x510] sm:$0xff] }
  0x81   :  { %2493 = vmatprep.subr.bf16.mxu0 %v5448_v21  ;;  %2536 = vmatprep.subr.bf16.mxu1 %v5450_v23  ;;  %v5536_v21 = vcombine.high %v5517_v13, %v5521_v14  ;;  %v5538_v23 = vcombine.high %v5518_v16, %v5522_v17  ;;  %v5553_v9 = vld [vmem:[%s7215_s0 + $0x530] sm:$0xff] }
  0x82   :  { %2511 = vmatprep.mubr.bf16.mxu0 %v5826_v5  ;;  %2554 = vmatprep.mubr.bf16.mxu1 %v5826_v5 }
  0x83   :  { %v3031_v32 = vand.u32 %v5538_v23, %v5858_v7  ;;  %v5567_v23 = vcombine.low %v5549_v8, %v5553_v9 }
  0x84   :  { %2494 = vmatpush1.bf16.msra.mxu0 %v5447_v25  ;;  %2537 = vmatpush1.bf16.msra.mxu1 %v5449_v27  ;;  %v5535_v25 = vcombine.low %v5517_v13, %v5521_v14  ;;  %v3025_v27 = vand.u32 %v5536_v21, %v5858_v7  ;;  %v5599_v13 = vld [vmem:[%s7215_s0 + $0x5e0] sm:$0x11]  ;;  %v5554_v14 = vld [vmem:[%s7215_s0 + $0x538] sm:$0xff] }
  0x85   :  { %2725 = vmatprep.subr.bf16.mxu0 %v2693_v28  ;;  %2768 = vmatprep.subr.bf16.mxu1 %v2699_v33  ;;  %v5537_v28 = vcombine.low %v5518_v16, %v5522_v17  ;;  %v5510_v33 = vld [vmem:[%s7215_s0 + $0x498] sm:$0xff]  ;;  %v5600_v16 = vld [vmem:[%s7215_s0 + $0x5e8] sm:$0x11] }
  0x86   :  { %v3022_v39 = vand.u32 %v5535_v25, %v5858_v7  ;;  %v5530_v43 = vcombine.high %v5510_v33, %v5514_v36  ;;  %v5529_v47 = vcombine.low %v5510_v33, %v5514_v36  ;;  %v5597_v33 = vld [vmem:[%s7215_s0 + $0x5d0] sm:$0xff]  ;;  %v5598_v36 = vld [vmem:[%s7215_s0 + $0x5d8] sm:$0xff] }
  0x87   :  { %5461 = vmatmul.mubr.msk.bf16.vlgmr.msra.gmra.mxu0 %vm112_vm2, %v5895_v31  ;;  %5462 = vmatmul.mubr.msk.bf16.vlgmr.msra.gmra.mxu1 %vm112_vm2, %v5895_v31  ;;  %v2711_v31 = vand.u32 %v5498_v45, %v5858_v7  ;;  %v5527_v45 = vcombine.low %v5509_v29, %v5513_v30 }
  0x88   :  { %2726 = vmatpush1.bf16.msra.mxu0 %v2690_v40  ;;  %2769 = vmatpush1.bf16.msra.mxu1 %v2696_v41  ;;  %v3028_v40 = vand.u32 %v5537_v28, %v5858_v7  ;;  %v5528_v41 = vcombine.high %v5509_v29, %v5513_v30  ;;  %v5587_v28 = vld [vmem:[%s7215_s0 + $0x580] sm:$0xff] }
  0x89   :  { %2727 = vmatprep.subr.bf16.mxu0 %v5484_v42  ;;  %2770 = vmatprep.subr.bf16.mxu1 %v5486_v44  ;;  %v5572_v42 = vcombine.high %v5555_v34, %v5559_v35  ;;  %v5574_v44 = vcombine.high %v5556_v37, %v5560_v38  ;;  %v5591_v29 = vld [vmem:[%s7215_s0 + $0x5a0] sm:$0xff] }
  0x8a   :  { %2745 = vmatprep.mubr.bf16.mxu0 %v5826_v5  ;;  %2788 = vmatprep.mubr.bf16.mxu1 %v5826_v5 }
  0x8b   :  { %v3339_v52 = vand.u32 %v5574_v44, %v5858_v7  ;;  %v5603_v44 = vcombine.low %v5587_v28, %v5591_v29 }
  0x8c   :  { %2728 = vmatpush1.bf16.msra.mxu0 %v5483_v46  ;;  %2771 = vmatpush1.bf16.msra.mxu1 %v5485_v48  ;;  %v5571_v46 = vcombine.low %v5555_v34, %v5559_v35  ;;  %v3333_v48 = vand.u32 %v5572_v42, %v5858_v7  ;;  %v5601_v34 = vld [vmem:[%s7215_s0 + $0x5f0] sm:$0x11]  ;;  %v5592_v35 = vld [vmem:[%s7215_s0 + $0x5a8] sm:$0xff] }
  0x8d   :  { %2811 = vmatprep.subr.bf16.mxu0 %v2705_v49  ;;  %2854 = vmatprep.subr.bf16.mxu1 %v2711_v31  ;;  %v5573_v49 = vcombine.low %v5556_v37, %v5560_v38  ;;  %v5548_v31 = vld [vmem:[%s7215_s0 + $0x508] sm:$0xff]  ;;  %v5602_v37 = vld [vmem:[%s7215_s0 + $0x5f8] sm:$0x11] }
  0x8e   :  { %v3330_v58 = vand.u32 %v5571_v46, %v5858_v7  ;;  %v5566_v62 = vcombine.high %v5548_v31, %v5552_v55  ;;  %v5565_v3 = vcombine.low %v5548_v31, %v5552_v55  ;;  %v5635_v31 = vld [vmem:[%s7215_s0 + $0x640] sm:$0xff]  ;;  %v5636_v55 = vld [vmem:[%s7215_s0 + $0x648] sm:$0xff] }
  0x8f   :  { %5499 = vmatmul.mubr.msk.bf16.vlgmr.msra.gmra.mxu0 %vm112_vm2, %v6478_v1  ;;  %5500 = vmatmul.mubr.msk.bf16.vlgmr.msra.gmra.mxu1 %vm112_vm2, %v6478_v1 }
  0x90   :  { %2812 = vmatpush1.bf16.msra.mxu0 %v2702_v59  ;;  %2855 = vmatpush1.bf16.msra.mxu1 %v2708_v60  ;;  %v3336_v59 = vand.u32 %v5573_v49, %v5858_v7  ;;  %v5564_v60 = vcombine.high %v5547_v50, %v5551_v51  ;;  %v5589_v49 = vld [vmem:[%s7215_s0 + $0x590] sm:$0xff] }
  0x91   :  { %2813 = vmatprep.subr.bf16.mxu0 %v5488_v61  ;;  %2856 = vmatprep.subr.bf16.mxu1 %v5490_v63  ;;  %v5576_v61 = vcombine.high %v5557_v53, %v5561_v54  ;;  %v5578_v63 = vcombine.high %v5558_v56, %v5562_v57  ;;  %v5593_v50 = vld [vmem:[%s7215_s0 + $0x5b0] sm:$0xff] }
  0x92   :  { %2831 = vmatprep.mubr.bf16.mxu0 %v5826_v5  ;;  %2874 = vmatprep.mubr.bf16.mxu1 %v5826_v5 }
  0x93   :  { %v3351_v10 = vand.u32 %v5578_v63, %v5858_v7  ;;  %v5607_v63 = vcombine.low %v5589_v49, %v5593_v50 }
  0x94   :  { %2814 = vmatpush1.bf16.msra.mxu0 %v5487_v2  ;;  %2857 = vmatpush1.bf16.msra.mxu1 %v5489_v4  ;;  %v5575_v2 = vcombine.low %v5557_v53, %v5561_v54  ;;  %v3345_v4 = vand.u32 %v5576_v61, %v5858_v7  ;;  %v5639_v53 = vld [vmem:[%s7215_s0 + $0x660] sm:$0x11]  ;;  %v5594_v54 = vld [vmem:[%s7215_s0 + $0x5b8] sm:$0xff] }
  0x95   :  { %3045 = vmatprep.subr.bf16.mxu0 %v3013_v6  ;;  %3088 = vmatprep.subr.bf16.mxu1 %v3019_v11  ;;  %v5577_v6 = vcombine.low %v5558_v56, %v5562_v57  ;;  %v5550_v11 = vld [vmem:[%s7215_s0 + $0x518] sm:$0xff]  ;;  %v5640_v56 = vld [vmem:[%s7215_s0 + $0x668] sm:$0x11] }
  0x96   :  { %v3342_v17 = vand.u32 %v5575_v2, %v5858_v7  ;;  %v5570_v21 = vcombine.high %v5550_v11, %v5554_v14  ;;  %v5569_v25 = vcombine.low %v5550_v11, %v5554_v14  ;;  %v5637_v11 = vld [vmem:[%s7215_s0 + $0x650] sm:$0xff]  ;;  %v5638_v14 = vld [vmem:[%s7215_s0 + $0x658] sm:$0xff] }
  0x97   :  { %5501 = vmatmul.mubr.msk.bf16.vlgmr.msra.gmra.mxu0 %vm112_vm2, %v6478_v1  ;;  %5502 = vmatmul.mubr.msk.bf16.vlgmr.msra.gmra.mxu1 %vm112_vm2, %v6478_v1 }
  0x98   :  { %3046 = vmatpush1.bf16.msra.mxu0 %v3010_v18  ;;  %3089 = vmatpush1.bf16.msra.mxu1 %v3016_v19  ;;  %v3348_v18 = vand.u32 %v5577_v6, %v5858_v7  ;;  %v5568_v19 = vcombine.high %v5549_v8, %v5553_v9  ;;  %v5627_v6 = vld [vmem:[%s7215_s0 + $0x600] sm:$0xff] }
  0x99   :  { %3047 = vmatprep.subr.bf16.mxu0 %v5524_v20  ;;  %3090 = vmatprep.subr.bf16.mxu1 %v5526_v22  ;;  %v5612_v20 = vcombine.high %v5595_v12, %v5599_v13  ;;  %v5614_v22 = vcombine.high %v5596_v15, %v5600_v16  ;;  %v5631_v8 = vld [vmem:[%s7215_s0 + $0x620] sm:$0xff] }
  0x9a   :  { %3065 = vmatprep.mubr.bf16.mxu0 %v5826_v5  ;;  %3108 = vmatprep.mubr.bf16.mxu1 %v5826_v5 }
  0x9b   :  { %v3659_v30 = vand.u32 %v5614_v22, %v5858_v7  ;;  %v5643_v22 = vcombine.low %v5627_v6, %v5631_v8 }
  0x9c   :  { %3048 = vmatpush1.bf16.msra.mxu0 %v5523_v24  ;;  %3091 = vmatpush1.bf16.msra.mxu1 %v5525_v26  ;;  %v5611_v24 = vcombine.low %v5595_v12, %v5599_v13  ;;  %v3653_v26 = vand.u32 %v5612_v20, %v5858_v7  ;;  %v5641_v12 = vld [vmem:[%s7215_s0 + $0x670] sm:$0x11]  ;;  %v5632_v13 = vld [vmem:[%s7215_s0 + $0x628] sm:$0xff] }
  0x9d   :  { %3131 = vmatprep.subr.bf16.mxu0 %v3025_v27  ;;  %3174 = vmatprep.subr.bf16.mxu1 %v3031_v32  ;;  %v5613_v27 = vcombine.low %v5596_v15, %v5600_v16  ;;  %v5588_v32 = vld [vmem:[%s7215_s0 + $0x588] sm:$0xff]  ;;  %v5642_v15 = vld [vmem:[%s7215_s0 + $0x678] sm:$0x11] }
  0x9e   :  { %v3650_v38 = vand.u32 %v5611_v24, %v5858_v7  ;;  %v5606_v42 = vcombine.high %v5588_v32, %v5592_v35  ;;  %v5605_v46 = vcombine.low %v5588_v32, %v5592_v35  ;;  %v5675_v32 = vld [vmem:[%s7215_s0 + $0x6c0] sm:$0xff]  ;;  %v5676_v35 = vld [vmem:[%s7215_s0 + $0x6c8] sm:$0xff] }
  0x9f   :  { %5539 = vmatmul.mubr.msk.bf16.vlgmr.msra.gmra.mxu0 %vm112_vm2, %v6478_v1  ;;  %5540 = vmatmul.mubr.msk.bf16.vlgmr.msra.gmra.mxu1 %vm112_vm2, %v6478_v1 }
  0xa0   :  { %3132 = vmatpush1.bf16.msra.mxu0 %v3022_v39  ;;  %3175 = vmatpush1.bf16.msra.mxu1 %v3028_v40  ;;  %v3656_v39 = vand.u32 %v5613_v27, %v5858_v7  ;;  %v5604_v40 = vcombine.high %v5587_v28, %v5591_v29  ;;  %v5629_v27 = vld [vmem:[%s7215_s0 + $0x610] sm:$0xff] }
  0xa1   :  { %3133 = vmatprep.subr.bf16.mxu0 %v5528_v41  ;;  %3176 = vmatprep.subr.bf16.mxu1 %v5530_v43  ;;  %v5616_v41 = vcombine.high %v5597_v33, %v5601_v34  ;;  %v5618_v43 = vcombine.high %v5598_v36, %v5602_v37  ;;  %v5633_v28 = vld [vmem:[%s7215_s0 + $0x630] sm:$0xff] }
  0xa2   :  { %3151 = vmatprep.mubr.bf16.mxu0 %v5826_v5  ;;  %3194 = vmatprep.mubr.bf16.mxu1 %v5826_v5 }
  0xa3   :  { %v3671_v51 = vand.u32 %v5618_v43, %v5858_v7 }
  0xa4   :  { %3134 = vmatpush1.bf16.msra.mxu0 %v5527_v45  ;;  %3177 = vmatpush1.bf16.msra.mxu1 %v5529_v47  ;;  %v5615_v45 = vcombine.low %v5597_v33, %v5601_v34  ;;  %v3665_v47 = vand.u32 %v5616_v41, %v5858_v7  ;;  %v5679_v33 = vld [vmem:[%s7215_s0 + $0x6e0] sm:$0x11]  ;;  %v5634_v34 = vld [vmem:[%s7215_s0 + $0x638] sm:$0xff] }
  0xa5   :  { %3365 = vmatprep.subr.bf16.mxu0 %v3333_v48  ;;  %3408 = vmatprep.subr.bf16.mxu1 %v3339_v52  ;;  %v5617_v48 = vcombine.low %v5598_v36, %v5602_v37  ;;  %v5590_v52 = vld [vmem:[%s7215_s0 + $0x598] sm:$0xff]  ;;  %v5680_v36 = vld [vmem:[%s7215_s0 + $0x6e8] sm:$0x11] }
  0xa6   :  { %v3662_v57 = vand.u32 %v5615_v45, %v5858_v7  ;;  %v5610_v61 = vcombine.high %v5590_v52, %v5594_v54  ;;  %v5609_v2 = vcombine.low %v5590_v52, %v5594_v54  ;;  %v5647_v45 = vcombine.low %v5629_v27, %v5633_v28  ;;  %v6765_v52 = vld [vmem:[%s7215_s0 + $0x6a0] sm:$0xff] }
  0xa7   :  { %5541 = vmatmul.mubr.msk.bf16.vlgmr.msra.gmra.mxu0 %vm112_vm2, %v6478_v1  ;;  %5542 = vmatmul.mubr.msk.bf16.vlgmr.msra.gmra.mxu1 %vm112_vm2, %v6478_v1 }
  0xa8   :  { %3366 = vmatpush1.bf16.msra.mxu0 %v3330_v58  ;;  %3409 = vmatpush1.bf16.msra.mxu1 %v3336_v59  ;;  %v3668_v58 = vand.u32 %v5617_v48, %v5858_v7  ;;  %v5608_v59 = vcombine.high %v5589_v49, %v5593_v50  ;;  %v5693_v50 = vcombine.low %v5676_v35, %v5680_v36 }
  0xa9   :  { %3367 = vmatprep.subr.bf16.mxu0 %v5564_v60  ;;  %3410 = vmatprep.subr.bf16.mxu1 %v5566_v62  ;;  %v5652_v60 = vcombine.high %v5635_v31, %v5639_v53  ;;  %v5654_v62 = vcombine.high %v5636_v55, %v5640_v56 }
  0xaa   :  { %3385 = vmatprep.mubr.bf16.mxu0 %v5826_v5  ;;  %3428 = vmatprep.mubr.bf16.mxu1 %v5826_v5 }
  0xab   :  { %v3979_v9 = vand.u32 %v5654_v62, %v5858_v7 }
  0xac   :  { %3368 = vmatpush1.bf16.msra.mxu0 %v5563_v0  ;;  %3411 = vmatpush1.bf16.msra.mxu1 %v5565_v3  ;;  %v5651_v0 = vcombine.low %v5635_v31, %v5639_v53  ;;  %v3973_v3 = vand.u32 %v5652_v60, %v5858_v7  ;;  %v5677_v31 = vld [vmem:[%s7215_s0 + $0x6d0] sm:$0xff]  ;;  %v5672_v60 = vld [vmem:[%s7215_s0 + $0x6a8] sm:$0xff] }
  0xad   :  { %3451 = vmatprep.subr.bf16.mxu0 %v3345_v4  ;;  %3494 = vmatprep.subr.bf16.mxu1 %v3351_v10  ;;  %v5653_v4 = vcombine.low %v5636_v55, %v5640_v56  ;;  %v5628_v10 = vld [vmem:[%s7215_s0 + $0x608] sm:$0xff]  ;;  %v5681_v55 = vld [vmem:[%s7215_s0 + $0x6f0] sm:$0x11]  ;;  %v6778_v56 = vld [vmem:[%s7215_s0 + $0x6d8] sm:$0xff] }
  0xae   :  { %v3970_v16 = vand.u32 %v5651_v0, %v5858_v7  ;;  %v5646_v20 = vcombine.high %v5628_v10, %v5632_v13  ;;  %v5645_v24 = vcombine.low %v5628_v10, %v5632_v13  ;;  %v5695_v13 = vcombine.low %v5677_v31, %v5681_v55 }
  0xaf   :  { %5579 = vmatmul.mubr.msk.bf16.vlgmr.msra.gmra.mxu0 %vm112_vm2, %v6478_v1  ;;  %5580 = vmatmul.mubr.msk.bf16.vlgmr.msra.gmra.mxu1 %vm112_vm2, %v6478_v1 }
  0xb0   :  { %3452 = vmatpush1.bf16.msra.mxu0 %v3342_v17  ;;  %3495 = vmatpush1.bf16.msra.mxu1 %v3348_v18  ;;  %v3976_v17 = vand.u32 %v5653_v4, %v5858_v7  ;;  %v5644_v18 = vcombine.high %v5627_v6, %v5631_v8 }
  0xb1   :  { %3453 = vmatprep.subr.bf16.mxu0 %v5568_v19  ;;  %3496 = vmatprep.subr.bf16.mxu1 %v5570_v21  ;;  %v5656_v19 = vcombine.high %v5637_v11, %v5641_v12  ;;  %v5658_v21 = vcombine.high %v5638_v14, %v5642_v15 }
  0xb2   :  { %3471 = vmatprep.mubr.bf16.mxu0 %v5826_v5  ;;  %3514 = vmatprep.mubr.bf16.mxu1 %v5826_v5 }
  0xb3   :  { %v3991_v29 = vand.u32 %v5658_v21, %v5858_v7 }
  0xb4   :  { %3454 = vmatpush1.bf16.msra.mxu0 %v5567_v23  ;;  %3497 = vmatpush1.bf16.msra.mxu1 %v5569_v25  ;;  %v5655_v23 = vcombine.low %v5637_v11, %v5641_v12  ;;  %v3985_v25 = vand.u32 %v5656_v19, %v5858_v7  ;;  %v6800_v11 = vpop.permute.xlu0 %330  ;;  %v6814_v19 = vld [vmem:[%s7215_s0 + $0x6b0] sm:$0xff] }
  0xb5   :  { %3685 = vmatprep.subr.bf16.mxu0 %v3653_v26  ;;  %3728 = vmatprep.subr.bf16.mxu1 %v3659_v30  ;;  %v5657_v26 = vcombine.low %v5638_v14, %v5642_v15  ;;  %v5630_v30 = vld [vmem:[%s7215_s0 + $0x618] sm:$0xff] }
  0xb6   :  { %v3982_v37 = vand.u32 %v5655_v23, %v5858_v7  ;;  %v5650_v41 = vcombine.high %v5630_v30, %v5634_v34  ;;  %v5649_v48 = vcombine.low %v5630_v30, %v5634_v34  ;;  %v6834_v30 = vld [vmem:[%s7215_s0 + $0x740] sm:$0xff]  ;;  %v4302_v34 = vand.u32 %v5695_v13, %v5858_v7  ;;  %v5722_v13 = vld [vmem:[%s7215_s0 + $0x778] sm:$0x11] }
  0xb7   :  { %5581 = vmatmul.mubr.msk.bf16.vlgmr.msra.gmra.mxu0 %vm112_vm2, %v6478_v1  ;;  %5582 = vmatmul.mubr.msk.bf16.vlgmr.msra.gmra.mxu1 %vm112_vm2, %v6478_v1 }
  0xb8   :  { %3686 = vmatpush1.bf16.msra.mxu0 %v3650_v38  ;;  %3729 = vmatpush1.bf16.msra.mxu1 %v3656_v39  ;;  %v3988_v38 = vand.u32 %v5657_v26, %v5858_v7  ;;  %v5648_v39 = vcombine.high %v5629_v27, %v5633_v28 }
  0xb9   :  { %3687 = vmatprep.subr.bf16.mxu0 %v5604_v40  ;;  %3730 = vmatprep.subr.bf16.mxu1 %v5606_v42  ;;  %v5692_v40 = vcombine.high %v5675_v32, %v5679_v33  ;;  %v5694_v42 = vcombine.high %v5676_v35, %v5680_v36  ;;  %v5716_v36 = vld [vmem:[%s7215_s0 + $0x748] sm:$0xff] }
  0xba   :  { %3705 = vmatprep.mubr.bf16.mxu0 %v5826_v5  ;;  %3748 = vmatprep.mubr.bf16.mxu1 %v5826_v5 }
  0xbb   :  { %v4293_v49 = vand.u32 %v5692_v40, %v5858_v7  ;;  %v4299_v54 = vand.u32 %v5694_v42, %v5858_v7 }
  0xbc   :  { %3688 = vmatpush1.bf16.msra.mxu0 %v5603_v44  ;;  %3731 = vmatpush1.bf16.msra.mxu1 %v5605_v46  ;;  %v5691_v46 = vcombine.low %v5675_v32, %v5679_v33  ;;  %v6839_v32 = vld [vmem:[%s7215_s0 + $0x760] sm:$0x11] }
  0xbd   :  { %3771 = vmatprep.subr.bf16.mxu0 %v3665_v47  ;;  %3814 = vmatprep.subr.bf16.mxu1 %v3671_v51  ;;  %v6760_v51 = vld [vmem:[%s7215_s0 + $0x680] sm:$0xff] }
  0xbe   :  { %v4290_v62 = vand.u32 %v5691_v46, %v5858_v7  ;;  %v5683_v12 = vcombine.low %v6760_v51, %v6765_v52 }
  0xbf   :  { %5619 = vmatmul.mubr.msk.bf16.vlgmr.msra.gmra.mxu0 %vm112_vm2, %v6478_v1  ;;  %5620 = vmatmul.mubr.msk.bf16.vlgmr.msra.gmra.mxu1 %vm112_vm2, %v6478_v1 }
  0xc0   :  { %3772 = vmatpush1.bf16.msra.mxu0 %v3662_v57  ;;  %3815 = vmatpush1.bf16.msra.mxu1 %v3668_v58  ;;  %v6783_v57 = vld [vmem:[%s7215_s0 + $0x6f8] sm:$0x11] }
  0xc1   :  { %3773 = vmatprep.subr.bf16.mxu0 %v5608_v59  ;;  %3816 = vmatprep.subr.bf16.mxu1 %v5610_v61  ;;  %v5668_v59 = vld [vmem:[%s7215_s0 + $0x688] sm:$0xff]  ;;  %v5698_v4 = vcombine.high %v6778_v56, %v6783_v57 }
  0xc2   :  { %3791 = vmatprep.mubr.bf16.mxu0 %v5826_v5  ;;  %3834 = vmatprep.mubr.bf16.mxu1 %v5826_v5 }
  0xc3   :  { %v4311_v23 = vand.u32 %v5698_v4, %v5858_v7 }
  0xc4   :  { %3774 = vmatpush1.bf16.msra.mxu0 %v5607_v63  ;;  %3817 = vmatpush1.bf16.msra.mxu1 %v5609_v2  ;;  %v5684_v63 = vcombine.high %v6760_v51, %v6765_v52  ;;  %v4296_v2 = vand.u32 %v5693_v50, %v5858_v7 }
  0xc5   :  { %4005 = vmatprep.subr.bf16.mxu0 %v3973_v3  ;;  %4048 = vmatprep.subr.bf16.mxu1 %v3979_v9  ;;  %v5696_v3 = vcombine.high %v5677_v31, %v5681_v55  ;;  %v5686_v9 = vcombine.high %v5668_v59, %v5672_v60 }
  0xc7   :  { %5621 = vmatmul.mubr.msk.bf16.vlgmr.msra.gmra.mxu0 %vm112_vm2, %v6478_v1  ;;  %5622 = vmatmul.mubr.msk.bf16.vlgmr.msra.gmra.mxu1 %vm112_vm2, %v6478_v1  ;;  %v4305_v21 = vand.u32 %v5696_v3, %v5858_v7  ;;  %v6885_v3 = vld [vmem:[%s7215_s0 + $0x750] sm:$0xff] }
  0xc8   :  { %4006 = vmatpush1.bf16.msra.mxu0 %v3970_v16  ;;  %4049 = vmatpush1.bf16.msra.mxu1 %v3976_v17  ;;  %v5685_v17 = vcombine.low %v5668_v59, %v5672_v60 }
  0xc9   :  { %4007 = vmatprep.subr.bf16.mxu0 %v5644_v18  ;;  %4050 = vmatprep.subr.bf16.mxu1 %v5646_v20  ;;  %v6809_v18 = vld [vmem:[%s7215_s0 + $0x690] sm:$0xff] }
  0xca   :  { %4025 = vmatprep.mubr.bf16.mxu0 %v5826_v5  ;;  %4068 = vmatprep.mubr.bf16.mxu1 %v5826_v5  ;;  %v5688_v35 = vcombine.high %v6809_v18, %v6814_v19 }
  0xcc   :  { %4008 = vmatpush1.bf16.msra.mxu0 %v5643_v22  ;;  %4051 = vmatpush1.bf16.msra.mxu1 %v5645_v24  ;;  %v5697_v22 = vcombine.low %v6778_v56, %v6783_v57  ;;  %v6823_v24 = vld [vmem:[%s7215_s0 + $0x698] sm:$0xff] }
  0xcd   :  { %4091 = vmatprep.subr.bf16.mxu0 %v3985_v25  ;;  %4134 = vmatprep.subr.bf16.mxu1 %v3991_v29  ;;  %v6829_v29 = vld [vmem:[%s7215_s0 + $0x6b8] sm:$0xff] }
  0xce   :  { %v5690_v46 = vcombine.high %v6823_v24, %v6829_v29 }
  0xcf   :  { %v178_v43 = vpop.f32.mrf.mxu0  ;;  %5659 = vmatmul.mubr.msk.bf16.vlgmr.msra.gmra.mxu0 %vm112_vm2, %v6478_v1  ;;  %v221_v44 = vpop.f32.mrf.mxu1  ;;  %5660 = vmatmul.mubr.msk.bf16.vlgmr.msra.gmra.mxu1 %vm112_vm2, %v6478_v1 }
  0xd0   :  { %4092 = vmatpush1.bf16.msra.mxu0 %v3982_v37  ;;  %4135 = vmatpush1.bf16.msra.mxu1 %v3988_v38  ;;  %v316_v6 = vmax.f32 %v178_v43, %v221_v44  ;;  %v5720_v37 = vld [vmem:[%s7215_s0 + $0x768] sm:$0x11]  ;;  %v6852_v44 = vpop.permute.xlu0 %335 }
  0xd1   :  { %v180_v47 = vpop.f32.mrf.mxu0  ;;  %4093 = vmatprep.subr.bf16.mxu0 %v5648_v39  ;;  %v223_v53 = vpop.f32.mrf.mxu1  ;;  %4136 = vmatprep.subr.bf16.mxu1 %v5650_v41  ;;  %v5734_v52 = vcombine.high %v5716_v36, %v5720_v37  ;;  %v5733_v55 = vcombine.low %v5716_v36, %v5720_v37 }
  0xd2   :  { %4111 = vmatprep.mubr.bf16.mxu0 %v5826_v5  ;;  %4154 = vmatprep.mubr.bf16.mxu1 %v5826_v5  ;;  %v317_v14 = vmax.f32 %v180_v47, %v223_v53  ;;  %v5732_v47 = vcombine.high %v6834_v30, %v6839_v32  ;;  %v5687_v53 = vcombine.low %v6809_v18, %v6814_v19 }
  0xd3   :  { %v182_v58 = vpop.f32.mrf.mxu0  ;;  %v225_v61 = vpop.f32.mrf.mxu1 }
  0xd4   :  { %4094 = vmatpush1.bf16.msra.mxu0 %v5647_v45  ;;  %4137 = vmatpush1.bf16.msra.mxu1 %v5649_v48  ;;  %v318_v25 = vmax.f32 %v182_v58, %v225_v61  ;;  %v4308_v45 = vand.u32 %v5697_v22, %v5858_v7 }
  0xd5   :  { %v184_v0 = vpop.f32.mrf.mxu0  ;;  %4325 = vmatprep.subr.bf16.mxu0 %v4293_v49  ;;  %v227_v8 = vpop.f32.mrf.mxu1  ;;  %4368 = vmatprep.subr.bf16.mxu1 %v4299_v54  ;;  %v5731_v54 = vcombine.low %v6834_v30, %v6839_v32 }
  0xd6   :  { %v319_v38 = vmax.f32 %v184_v0, %v227_v8  ;;  %v6875_v0 = vld [vmem:[%s7215_s0 + $0x700] sm:$0xff] }
  0xd7   :  { %v264_v10 = vpop.f32.mrf.mxu0  ;;  %5661 = vmatmul.mubr.msk.bf16.vlgmr.msra.gmra.mxu0 %vm112_vm2, %v6478_v1  ;;  %v307_v16 = vpop.f32.mrf.mxu1  ;;  %5662 = vmatmul.mubr.msk.bf16.vlgmr.msra.gmra.mxu1 %vm112_vm2, %v6478_v1 }
  0xd8   :  { %v320_v15 = vmax.f32 %v316_v6, %v264_v10  ;;  %4326 = vmatpush1.bf16.msra.mxu0 %v4290_v62  ;;  %4369 = vmatpush1.bf16.msra.mxu1 %v4296_v2  ;;  %v5689_v62 = vcombine.low %v6823_v24, %v6829_v29  ;;  %v6880_v2 = vld [vmem:[%s7215_s0 + $0x720] sm:$0xff]  ;;  %v5721_v10 = vld [vmem:[%s7215_s0 + $0x770] sm:$0x11] }
  0xd9   :  { %v266_v20 = vpop.f32.mrf.mxu0  ;;  %4327 = vmatprep.subr.bf16.mxu0 %v5684_v63  ;;  %v309_v28 = vpop.f32.mrf.mxu1  ;;  %4370 = vmatprep.subr.bf16.mxu1 %v5686_v9  ;;  %v4613_v63 = vand.u32 %v5732_v47, %v5858_v7  ;;  %v4619_v9 = vand.u32 %v5734_v52, %v5858_v7  ;;  %v5736_v24 = vcombine.high %v6885_v3, %v5721_v10  ;;  %v6955_v52 = vld [vmem:[%s7215_s0 + $0x7e0] sm:$0x11] }
  0xda   :  { %v324_v26 = vmax.f32 %v320_v15, %v307_v16  ;;  %v321_v27 = vmax.f32 %v317_v14, %v266_v20  ;;  %4345 = vmatprep.mubr.bf16.mxu0 %v5826_v5  ;;  %4388 = vmatprep.mubr.bf16.mxu1 %v5826_v5  ;;  %v5708_v15 = vld [vmem:[%s7215_s0 + $0x708] sm:$0xff]  ;;  %v4610_v20 = vand.u32 %v5731_v54, %v5858_v7 }
  0xdb   :  { %v268_v33 = vpop.f32.mrf.mxu0  ;;  %v311_v42 = vpop.f32.mrf.mxu1  ;;  %v5712_v16 = vld [vmem:[%s7215_s0 + $0x728] sm:$0xff]  ;;  %v5735_v32 = vcombine.low %v6885_v3, %v5721_v10  ;;  %v5723_v37 = vcombine.low %v6875_v0, %v6880_v2 }
  0xdc   :  { %v325_v39 = vmax.f32 %v321_v27, %v309_v28  ;;  %v338_v40 = vadd.f32 %v6800_v11, %v324_v26  ;;  %v322_v41 = vmax.f32 %v318_v25, %v268_v33  ;;  %4328 = vmatpush1.bf16.msra.mxu0 %v5683_v12  ;;  %4371 = vmatpush1.bf16.msra.mxu1 %v5685_v17  ;;  %v5718_v12 = vld [vmem:[%s7215_s0 + $0x758] sm:$0xff] }
  0xdd   :  { %v270_v43 = vpop.f32.mrf.mxu0  ;;  %4411 = vmatprep.subr.bf16.mxu0 %v4305_v21  ;;  %v313_v51 = vpop.f32.mrf.mxu1  ;;  %4454 = vmatprep.subr.bf16.mxu1 %v4311_v23  ;;  %v4616_v21 = vand.u32 %v5733_v55, %v5858_v7  ;;  %v5724_v23 = vcombine.high %v6875_v0, %v6880_v2  ;;  %v5738_v25 = vcombine.high %v5718_v12, %v5722_v13  ;;  %v5756_v55 = vld [vmem:[%s7215_s0 + $0x7c8] sm:$0xff] }
  0xde   :  { %v339_v48 = vadd.f32 %v6800_v11, %v325_v39  ;;  %v326_v49 = vmax.f32 %v322_v41, %v311_v42  ;;  %v323_v50 = vmax.f32 %v319_v38, %v270_v43  ;;  %v342_v56 = vmax.f32 %v338_v40, 0.0  ;;  %v6929_v42 = vld [vmem:[%s7215_s0 + $0x710] sm:$0xff] }
  0xdf   :  { %v507_v31 = vpop.f32.mrf.mxu0  ;;  %5699 = vmatmul.mubr.msk.bf16.vlgmr.msra.gmra.mxu0 %vm112_vm2, %v6478_v1  ;;  %v550_v60 = vpop.f32.mrf.mxu1  ;;  %5700 = vmatmul.mubr.msk.bf16.vlgmr.msra.gmra.mxu1 %vm112_vm2, %v6478_v1  ;;  %v5726_v29 = vcombine.high %v5708_v15, %v5712_v16  ;;  %v5737_v33 = vcombine.low %v5718_v12, %v5722_v13  ;;  %v5725_v39 = vcombine.low %v5708_v15, %v5712_v16  ;;  %v6934_v43 = vld [vmem:[%s7215_s0 + $0x730] sm:$0xff] }
  0xe0   :  { %v343_v57 = vmax.f32 %v339_v48, 0.0  ;;  %v327_v58 = vmax.f32 %v323_v50, %v313_v51  ;;  %v340_v59 = vadd.f32 %v6852_v44, %v326_v49  ;;  %4412 = vmatpush1.bf16.msra.mxu0 %v4302_v34  ;;  %4455 = vmatpush1.bf16.msra.mxu1 %v4308_v45  ;;  %v645_v27 = vmax.f32 %v507_v31, %v550_v60  ;;  %v6939_v45 = vld [vmem:[%s7215_s0 + $0x718] sm:$0xff]  ;;  %v6950_v51 = vld [vmem:[%s7215_s0 + $0x7c0] sm:$0xff] }
  0xe1   :  { %v509_v61 = vpop.f32.mrf.mxu0  ;;  %4413 = vmatprep.subr.bf16.mxu0 %v5688_v35  ;;  %v552_v8 = vpop.f32.mrf.mxu1  ;;  %4456 = vmatprep.subr.bf16.mxu1 %v5690_v46  ;;  %v4625_v40 = vand.u32 %v5736_v24, %v5858_v7  ;;  %v4631_v41 = vand.u32 %v5738_v25, %v5858_v7  ;;  %v6945_v50 = vld [vmem:[%s7215_s0 + $0x738] sm:$0xff]  ;;  %v4628_v54 = vand.u32 %v5737_v33, %v5858_v7  ;;  %v6994_v24 = vld [vmem:[%s7215_s0 + $0x7a0] sm:$0xff]  ;;  %v5757_v25 = vld [vmem:[%s7215_s0 + $0x7d0] sm:$0xff] }
  0xe2   :  { %v5787_v4 = vpack.c.bf16 %v343_v57, %v342_v56  ;;  %v341_v6 = vadd.f32 %v6852_v44, %v327_v58  ;;  %4431 = vmatprep.mubr.bf16.mxu0 %v5826_v5  ;;  %4474 = vmatprep.mubr.bf16.mxu1 %v5826_v5  ;;  %v344_v17 = vmax.f32 %v340_v59, 0.0  ;;  %v646_v34 = vmax.f32 %v509_v61, %v552_v8  ;;  %v5760_v56 = vld [vmem:[%s7215_s0 + $0x7e8] sm:$0x11]  ;;  %v7013_v33 = vld [vmem:[%s7215_s0 + $0x7f8] sm:$0x11] }
  0xe3   :  { %v511_v14 = vpop.f32.mrf.mxu0  ;;  %v554_v19 = vpop.f32.mrf.mxu1  ;;  %v5730_v0 = vcombine.high %v6939_v45, %v6945_v50  ;;  %v5772_v2 = vcombine.high %v6950_v51, %v6955_v52  ;;  %v5727_v12 = vcombine.low %v6929_v42, %v6934_v43  ;;  %v5771_v13 = vcombine.low %v6950_v51, %v6955_v52 }
  0xe4   :  { %358 = vst [vmem:[%s7218_s3] sm:$0xff] %v5787_v4  ;;  %v345_v18 = vmax.f32 %v341_v6, 0.0  ;;  %4414 = vmatpush1.bf16.msra.mxu0 %v5687_v53  ;;  %4457 = vmatpush1.bf16.msra.mxu1 %v5689_v62  ;;  %v647_v46 = vmax.f32 %v511_v14, %v554_v19  ;;  %v4622_v53 = vand.u32 %v5735_v32, %v5858_v7  ;;  %v7008_v32 = vld [vmem:[%s7215_s0 + $0x7d8] sm:$0xff] }
  0xe5   :  { %v513_v22 = vpop.f32.mrf.mxu0  ;;  %4645 = vmatprep.subr.bf16.mxu0 %v4613_v63  ;;  %v556_v28 = vpop.f32.mrf.mxu1  ;;  %4688 = vmatprep.subr.bf16.mxu1 %v4619_v9  ;;  %v5728_v63 = vcombine.high %v6929_v42, %v6934_v43  ;;  %v5774_v9 = vcombine.high %v5756_v55, %v5760_v56  ;;  %v5773_v14 = vcombine.low %v5756_v55, %v5760_v56  ;;  %v7041_v56 = vld [vmem:[%s7216_s1] sm:$0xff]  }
  0xe6   :  { %v5788_v26 = vpack.c.bf16 %v345_v18, %v344_v17  ;;  %v648_v57 = vmax.f32 %v513_v22, %v556_v28  ;;  %v4933_v22 = vand.u32 %v5772_v2, %v5858_v7  ;;  %v5749_v2 = vld [vmem:[%s7215_s0 + $0x790] sm:$0xff] }
  0xe7   :  { %v593_v30 = vpop.f32.mrf.mxu0  ;;  %5701 = vmatmul.mubr.msk.bf16.vlgmr.msra.gmra.mxu0 %vm112_vm2, %v6478_v1  ;;  %v636_v36 = vpop.f32.mrf.mxu1  ;;  %5702 = vmatmul.mubr.msk.bf16.vlgmr.msra.gmra.mxu1 %vm112_vm2, %v6478_v1 }
  0xe8   :  { %359 = vst [vmem:[%s7218_s3 + $0x8] sm:$0xff] %v5788_v26  ;;  %v649_v35 = vmax.f32 %v645_v27, %v593_v30  ;;  %4646 = vmatpush1.bf16.msra.mxu0 %v4610_v20  ;;  %4689 = vmatpush1.bf16.msra.mxu1 %v4616_v21  ;;  %v5729_v21 = vcombine.low %v6939_v45, %v6945_v50  ;;  %v5761_v30 = vld [vmem:[%s7215_s0 + $0x7f0] sm:$0x11] }
  0xe9   :  { %v595_v38 = vpop.f32.mrf.mxu0  ;;  %4647 = vmatprep.subr.bf16.mxu0 %v5724_v23  ;;  %v638_v49 = vpop.f32.mrf.mxu1  ;;  %4690 = vmatprep.subr.bf16.mxu1 %v5726_v29  ;;  %v6989_v23 = vld [vmem:[%s7215_s0 + $0x780] sm:$0xff]  ;;  %v4939_v29 = vand.u32 %v5774_v9, %v5858_v7  ;;  %v5776_v45 = vcombine.high %v5757_v25, %v5761_v30  ;;  %v5754_v9 = vld [vmem:[%s7215_s0 + $0x7b8] sm:$0xff] }
  0xea   :  { %v653_v47 = vmax.f32 %v649_v35, %v636_v36  ;;  %v650_v48 = vmax.f32 %v646_v34, %v595_v38  ;;  %4665 = vmatprep.mubr.bf16.mxu0 %v5826_v5  ;;  %4708 = vmatprep.mubr.bf16.mxu1 %v5826_v5  ;;  %v5748_v35 = vld [vmem:[%s7215_s0 + $0x788] sm:$0xff]  ;;  %v5764_v43 = vcombine.high %v6989_v23, %v6994_v24 }
  0xeb   :  { %v597_v31 = vpop.f32.mrf.mxu0  ;;  %v640_v61 = vpop.f32.mrf.mxu1  ;;  %v5752_v36 = vld [vmem:[%s7215_s0 + $0x7a8] sm:$0xff]  ;;  %v5763_v52 = vcombine.low %v6989_v23, %v6994_v24 }
  0xec   :  { %v657_v58 = vadd.f32 %v653_v47, %v6800_v11  ;;  %v654_v59 = vmax.f32 %v650_v48, %v638_v49  ;;  %v651_v60 = vmax.f32 %v647_v46, %v597_v31  ;;  %4648 = vmatpush1.bf16.msra.mxu0 %v5723_v37  ;;  %4691 = vmatpush1.bf16.msra.mxu1 %v5725_v39 }
  0xed   :  { %v599_v62 = vpop.f32.mrf.mxu0  ;;  %4731 = vmatprep.subr.bf16.mxu0 %v4625_v40  ;;  %v642_v8 = vpop.f32.mrf.mxu1  ;;  %4774 = vmatprep.subr.bf16.mxu1 %v4631_v41  ;;  %v4930_v40 = vand.u32 %v5771_v13, %v5858_v7  ;;  %v4936_v41 = vand.u32 %v5773_v14, %v5858_v7  ;;  %v5778_v46 = vcombine.high %v7008_v32, %v7013_v33 }
  0xee   :  { %v658_v3 = vadd.f32 %v654_v59, %v6800_v11  ;;  %v655_v4 = vmax.f32 %v651_v60, %v640_v61  ;;  %v652_v6 = vmax.f32 %v648_v57, %v599_v62  ;;  %v661_v15 = vmax.f32 %v657_v58, 0.0 }
  0xef   :  { %v827_v10 = vpop.f32.mrf.mxu0  ;;  %5739 = vmatmul.mubr.msk.bf16.vlgmr.msra.gmra.mxu0 %vm112_vm2, %v6478_v1  ;;  %v870_v19 = vpop.f32.mrf.mxu1  ;;  %5740 = vmatmul.mubr.msk.bf16.vlgmr.msra.gmra.mxu1 %vm112_vm2, %v6478_v1  ;;  %v5766_v50 = vcombine.high %v5748_v35, %v5752_v36  ;;  %v5775_v31 = vcombine.low %v5757_v25, %v5761_v30  ;;  %v4945_v58 = vand.u32 %v5776_v45, %v5858_v7 }
  0xf0   :  { %v662_v16 = vmax.f32 %v658_v3, 0.0  ;;  %v659_v17 = vadd.f32 %v655_v4, %v6852_v44  ;;  %v656_v18 = vmax.f32 %v652_v6, %v642_v8  ;;  %4732 = vmatpush1.bf16.msra.mxu0 %v4622_v53  ;;  %4775 = vmatpush1.bf16.msra.mxu1 %v4628_v54  ;;  %v965_v48 = vmax.f32 %v827_v10, %v870_v19  ;;  %v5753_v3 = vld [vmem:[%s7215_s0 + $0x7b0] sm:$0xff]  ;;  %v5750_v8 = vld [vmem:[%s7215_s0 + $0x798] sm:$0xff] }
  0xf1   :  { %v829_v20 = vpop.f32.mrf.mxu0  ;;  %4733 = vmatprep.subr.bf16.mxu0 %v5728_v63  ;;  %v872_v28 = vpop.f32.mrf.mxu1  ;;  %4776 = vmatprep.subr.bf16.mxu1 %v5730_v0  ;;  %v5777_v59 = vcombine.low %v7008_v32, %v7013_v33  ;;  %v4951_v60 = vand.u32 %v5778_v46, %v5858_v7  ;;  %v4942_v6 = vand.u32 %v5775_v31, %v5858_v7 }
  0xf2   :  { %v5789_v26 = vpack.c.bf16 %v662_v16, %v661_v15  ;;  %v660_v27 = vadd.f32 %v656_v18, %v6852_v44  ;;  %4751 = vmatprep.mubr.bf16.mxu0 %v5826_v5  ;;  %4794 = vmatprep.mubr.bf16.mxu1 %v5826_v5  ;;  %v663_v37 = vmax.f32 %v659_v17, 0.0  ;;  %v966_v53 = vmax.f32 %v829_v20, %v872_v28 }
  0xf3   :  { %v831_v34 = vpop.f32.mrf.mxu0  ;;  %v874_v39 = vpop.f32.mrf.mxu1  ;;  %v4948_v17 = vand.u32 %v5777_v59, %v5858_v7  ;;  %v5768_v18 = vcombine.high %v5749_v2, %v5753_v3  ;;  %v5770_v23 = vcombine.high %v5750_v8, %v5754_v9  ;;  %v5767_v25 = vcombine.low %v5749_v2, %v5753_v3 }
  0xf4   :  { %5225 = vst [vmem:[%s7218_s3 + $0x10] sm:$0xff] %v5789_v26  ;;  %v664_v38 = vmax.f32 %v660_v27, 0.0  ;;  %4734 = vmatpush1.bf16.msra.mxu0 %v5727_v12  ;;  %4777 = vmatpush1.bf16.msra.mxu1 %v5729_v21  ;;  %v967_v61 = vmax.f32 %v831_v34, %v874_v39  ;;  %v5769_v32 = vcombine.low %v5750_v8, %v5754_v9 }
  0xf5   :  { %v833_v42 = vpop.f32.mrf.mxu0  ;;  %4965 = vmatprep.subr.bf16.mxu0 %v4933_v22  ;;  %v876_v49 = vpop.f32.mrf.mxu1  ;;  %5008 = vmatprep.subr.bf16.mxu1 %v4939_v29 }
  0xf6   :  { %v5790_v47 = vpack.c.bf16 %v664_v38, %v663_v37  ;;  %v968_v10 = vmax.f32 %v833_v42, %v876_v49 }
  0xf7   :  { %v913_v51 = vpop.f32.mrf.mxu0  ;;  %5741 = vmatmul.mubr.msk.bf16.vlgmr.msra.gmra.mxu0 %vm112_vm2, %v6478_v1  ;;  %v956_v55 = vpop.f32.mrf.mxu1  ;;  %5742 = vmatmul.mubr.msk.bf16.vlgmr.msra.gmra.mxu1 %vm112_vm2, %v7041_v56  ;;  %v5765_v1 = vcombine.low %v5748_v35, %v5752_v36 }
  0xf8   :  { %5226 = vst [vmem:[%s7218_s3 + $0x18] sm:$0xff] %v5790_v47  ;;  %v969_v54 = vmax.f32 %v965_v48, %v913_v51  ;;  %4966 = vmatpush1.bf16.msra.mxu0 %v4930_v40  ;;  %5009 = vmatpush1.bf16.msra.mxu1 %v4936_v41 }
  0xf9   :  { %v915_v57 = vpop.f32.mrf.mxu0  ;;  %4967 = vmatprep.subr.bf16.mxu0 %v5764_v43  ;;  %v958_v0 = vpop.f32.mrf.mxu1  ;;  %5010 = vmatprep.subr.bf16.mxu1 %v5766_v50 }
  0xfa   :  { %v973_v62 = vmax.f32 %v969_v54, %v956_v55  ;;  %v970_v63 = vmax.f32 %v966_v53, %v915_v57  ;;  %4985 = vmatprep.mubr.bf16.mxu0 %v5826_v5  ;;  %5028 = vmatprep.mubr.bf16.mxu1 %v5826_v5 }
  0xfb   :  { %v917_v4 = vpop.f32.mrf.mxu0  ;;  %v960_v15 = vpop.f32.mrf.mxu1 }
  0xfc   :  { %v977_v12 = vadd.f32 %v973_v62, %v6800_v11  ;;  %v974_v13 = vmax.f32 %v970_v63, %v958_v0  ;;  %v971_v14 = vmax.f32 %v967_v61, %v917_v4  ;;  %4968 = vmatpush1.bf16.msra.mxu0 %v5763_v52  ;;  %5011 = vmatpush1.bf16.msra.mxu1 %v5765_v1 }
  0xfd   :  { %v919_v16 = vpop.f32.mrf.mxu0  ;;  %5051 = vmatprep.subr.bf16.mxu0 %v4945_v58  ;;  %v962_v22 = vpop.f32.mrf.mxu1  ;;  %5094 = vmatprep.subr.bf16.mxu1 %v4951_v60 }
  0xfe   :  { %v978_v19 = vadd.f32 %v974_v13, %v6800_v11  ;;  %v975_v20 = vmax.f32 %v971_v14, %v960_v15  ;;  %v972_v21 = vmax.f32 %v968_v10, %v919_v16  ;;  %v981_v26 = vmax.f32 %v977_v12, 0.0 }
  0xff   :  { %v1147_v24 = vpop.f32.mrf.mxu0  ;;  %5779 = vmatmul.mubr.msk.bf16.vlgmr.msra.gmra.mxu0 %vm112_vm2, %v7041_v56  ;;  %v1190_v30 = vpop.f32.mrf.mxu1  ;;  %5780 = vmatmul.mubr.msk.bf16.vlgmr.msra.gmra.mxu1 %vm112_vm2, %v7041_v56 }
 0x100   :  { %v982_v27 = vmax.f32 %v978_v19, 0.0  ;;  %v979_v28 = vadd.f32 %v975_v20, %v6852_v44  ;;  %v976_v29 = vmax.f32 %v972_v21, %v962_v22  ;;  %5052 = vmatpush1.bf16.msra.mxu0 %v4942_v6  ;;  %5095 = vmatpush1.bf16.msra.mxu1 %v4948_v17  ;;  %v1285_v42 = vmax.f32 %v1147_v24, %v1190_v30 }
 0x101   :  { %v1149_v7 = vpop.f32.mrf.mxu0  ;;  %5053 = vmatprep.subr.bf16.mxu0 %v5768_v18  ;;  %v1192_v35 = vpop.f32.mrf.mxu1  ;;  %5096 = vmatprep.subr.bf16.mxu1 %v5770_v23 }
 0x102   :  { %v5791_v33 = vpack.c.bf16 %v982_v27, %v981_v26  ;;  %v980_v34 = vadd.f32 %v976_v29, %v6852_v44  ;;  %5071 = vmatprep.mubr.bf16.mxu0 %v5826_v5  ;;  %5114 = vmatprep.mubr.bf16.mxu1 %v5826_v5  ;;  %v983_v37 = vmax.f32 %v979_v28, 0.0  ;;  %v1286_v5 = vmax.f32 %v1149_v7, %v1192_v35 }
 0x103   :  { %v1151_v36 = vpop.f32.mrf.mxu0  ;;  %v1194_v39 = vpop.f32.mrf.mxu1 }
 0x104   :  { %5265 = vst [vmem:[%s7218_s3 + $0x20] sm:$0xff] %v5791_v33  ;;  %v984_v38 = vmax.f32 %v980_v34, 0.0  ;;  %5054 = vmatpush1.bf16.msra.mxu0 %v5767_v25  ;;  %5097 = vmatpush1.bf16.msra.mxu1 %v5769_v32  ;;  %v1287_v49 = vmax.f32 %v1151_v36, %v1194_v39 }
 0x105   :  { %v1153_v40 = vpop.f32.mrf.mxu0  ;;  %v1196_v43 = vpop.f32.mrf.mxu1 }
 0x106   :  { %v5792_v41 = vpack.c.bf16 %v984_v38, %v983_v37  ;;  %v1288_v53 = vmax.f32 %v1153_v40, %v1196_v43 }
 0x107   :  { %v1233_v45 = vpop.f32.mrf.mxu0  ;;  %5781 = vmatmul.mubr.msk.bf16.vlgmr.msra.gmra.mxu0 %vm112_vm2, %v7041_v56  ;;  %v1276_v47 = vpop.f32.mrf.mxu1  ;;  %5782 = vmatmul.mubr.msk.bf16.vlgmr.msra.gmra.mxu1 %vm112_vm2, %v7041_v56 }
 0x108   :  { %5266 = vst [vmem:[%s7218_s3 + $0x28] sm:$0xff] %v5792_v41  ;;  %v1289_v46 = vmax.f32 %v1285_v42, %v1233_v45 }
 0x109   :  { %v1235_v48 = vpop.f32.mrf.mxu0  ;;  %v1278_v52 = vpop.f32.mrf.mxu1 }
 0x10a   :  { %v1293_v50 = vmax.f32 %v1289_v46, %v1276_v47  ;;  %v1290_v51 = vmax.f32 %v1286_v5, %v1235_v48 }
 0x10b   :  { %v1237_v31 = vpop.f32.mrf.mxu0  ;;  %v1280_v57 = vpop.f32.mrf.mxu1 }
 0x10c   :  { %v1297_v54 = vadd.f32 %v1293_v50, %v6800_v11  ;;  %v1294_v55 = vmax.f32 %v1290_v51, %v1278_v52  ;;  %v1291_v1 = vmax.f32 %v1287_v49, %v1237_v31 }
 0x10d   :  { %v1239_v58 = vpop.f32.mrf.mxu0  ;;  %v1282_v62 = vpop.f32.mrf.mxu1 }
 0x10e   :  { %v1298_v59 = vadd.f32 %v1294_v55, %v6800_v11  ;;  %v1295_v60 = vmax.f32 %v1291_v1, %v1280_v57  ;;  %v1292_v61 = vmax.f32 %v1288_v53, %v1239_v58  ;;  %v1301_v56 = vmax.f32 %v1297_v54, 0.0 }
 0x10f   :  { %v1467_v63 = vpop.f32.mrf.mxu0  ;;  %v1510_v4 = vpop.f32.mrf.mxu1 }
 0x110   :  { %v1302_v0 = vmax.f32 %v1298_v59, 0.0  ;;  %v1299_v2 = vadd.f32 %v1295_v60, %v6852_v44  ;;  %v1296_v3 = vmax.f32 %v1292_v61, %v1282_v62  ;;  %v1605_v18 = vmax.f32 %v1467_v63, %v1510_v4 }
 0x111   :  { %v1469_v6 = vpop.f32.mrf.mxu0  ;;  %v1512_v10 = vpop.f32.mrf.mxu1 }
 0x112   :  { %v5793_v8 = vpack.c.bf16 %v1302_v0, %v1301_v56  ;;  %v1300_v9 = vadd.f32 %v1296_v3, %v6852_v44  ;;  %v1303_v13 = vmax.f32 %v1299_v2, 0.0  ;;  %v1606_v21 = vmax.f32 %v1469_v6, %v1512_v10 }
 0x113   :  { %v1471_v12 = vpop.f32.mrf.mxu0  ;;  %v1514_v15 = vpop.f32.mrf.mxu1 }
 0x114   :  { %5305 = vst [vmem:[%s7218_s3 + $0x30] sm:$0xff] %v5793_v8  ;;  %v1304_v14 = vmax.f32 %v1300_v9, 0.0  ;;  %v1607_v25 = vmax.f32 %v1471_v12, %v1514_v15 }
 0x115   :  { %v1473_v16 = vpop.f32.mrf.mxu0  ;;  %v1516_v19 = vpop.f32.mrf.mxu1 }
 0x116   :  { %v5794_v17 = vpack.c.bf16 %v1304_v14, %v1303_v13  ;;  %v1608_v30 = vmax.f32 %v1473_v16, %v1516_v19 }
 0x117   :  { %v1553_v20 = vpop.f32.mrf.mxu0  ;;  %v1596_v23 = vpop.f32.mrf.mxu1 }
 0x118   :  { %5306 = vst [vmem:[%s7218_s3 + $0x38] sm:$0xff] %v5794_v17  ;;  %v1609_v22 = vmax.f32 %v1605_v18, %v1553_v20 }
 0x119   :  { %v1555_v24 = vpop.f32.mrf.mxu0  ;;  %v1598_v28 = vpop.f32.mrf.mxu1 }
 0x11a   :  { %v1613_v26 = vmax.f32 %v1609_v22, %v1596_v23  ;;  %v1610_v27 = vmax.f32 %v1606_v21, %v1555_v24 }
 0x11b   :  { %v1557_v29 = vpop.f32.mrf.mxu0  ;;  %v1600_v34 = vpop.f32.mrf.mxu1 }
 0x11c   :  { %v1617_v7 = vadd.f32 %v1613_v26, %v6800_v11  ;;  %v1614_v32 = vmax.f32 %v1610_v27, %v1598_v28  ;;  %v1611_v33 = vmax.f32 %v1607_v25, %v1557_v29 }
 0x11d   :  { %v1559_v35 = vpop.f32.mrf.mxu0  ;;  %v1602_v39 = vpop.f32.mrf.mxu1 }
 0x11e   :  { %v1618_v36 = vadd.f32 %v1614_v32, %v6800_v11  ;;  %v1615_v37 = vmax.f32 %v1611_v33, %v1600_v34  ;;  %v1612_v38 = vmax.f32 %v1608_v30, %v1559_v35  ;;  %v1621_v41 = vmax.f32 %v1617_v7, 0.0 }
 0x11f   :  { %v1787_v40 = vpop.f32.mrf.mxu0  ;;  %v1830_v5 = vpop.f32.mrf.mxu1 }
 0x120   :  { %v1622_v42 = vmax.f32 %v1618_v36, 0.0  ;;  %v1619_v43 = vadd.f32 %v1615_v37, %v6852_v44  ;;  %v1616_v45 = vmax.f32 %v1612_v38, %v1602_v39  ;;  %v1925_v55 = vmax.f32 %v1787_v40, %v1830_v5 }
 0x121   :  { %v1789_v46 = vpop.f32.mrf.mxu0  ;;  %v1832_v49 = vpop.f32.mrf.mxu1 }
 0x122   :  { %v5795_v47 = vpack.c.bf16 %v1622_v42, %v1621_v41  ;;  %v1620_v48 = vadd.f32 %v1616_v45, %v6852_v44  ;;  %v1623_v51 = vmax.f32 %v1619_v43, 0.0  ;;  %v1926_v58 = vmax.f32 %v1789_v46, %v1832_v49 }
 0x123   :  { %v1791_v50 = vpop.f32.mrf.mxu0  ;;  %v1834_v31 = vpop.f32.mrf.mxu1 }
 0x124   :  { %5345 = vst [vmem:[%s7218_s3 + $0x40] sm:$0xff] %v5795_v47  ;;  %v1624_v52 = vmax.f32 %v1620_v48, 0.0  ;;  %v1927_v62 = vmax.f32 %v1791_v50, %v1834_v31 }
 0x125   :  { %v1793_v53 = vpop.f32.mrf.mxu0  ;;  %v1836_v1 = vpop.f32.mrf.mxu1 }
 0x126   :  { %v5796_v54 = vpack.c.bf16 %v1624_v52, %v1623_v51  ;;  %v1928_v3 = vmax.f32 %v1793_v53, %v1836_v1 }
 0x127   :  { %v1873_v57 = vpop.f32.mrf.mxu0  ;;  %v1916_v60 = vpop.f32.mrf.mxu1 }
 0x128   :  { %5346 = vst [vmem:[%s7218_s3 + $0x48] sm:$0xff] %v5796_v54  ;;  %v1929_v59 = vmax.f32 %v1925_v55, %v1873_v57 }
 0x129   :  { %v1875_v61 = vpop.f32.mrf.mxu0  ;;  %v1918_v0 = vpop.f32.mrf.mxu1 }
 0x12a   :  { %v1933_v63 = vmax.f32 %v1929_v59, %v1916_v60  ;;  %v1930_v56 = vmax.f32 %v1926_v58, %v1875_v61 }
 0x12b   :  { %v1877_v2 = vpop.f32.mrf.mxu0  ;;  %v1920_v9 = vpop.f32.mrf.mxu1 }
 0x12c   :  { %v1937_v4 = vadd.f32 %v1933_v63, %v6800_v11  ;;  %v1934_v6 = vmax.f32 %v1930_v56, %v1918_v0  ;;  %v1931_v8 = vmax.f32 %v1927_v62, %v1877_v2 }
 0x12d   :  { %v1879_v10 = vpop.f32.mrf.mxu0  ;;  %v1922_v15 = vpop.f32.mrf.mxu1 }
 0x12e   :  { %v1938_v12 = vadd.f32 %v1934_v6, %v6800_v11  ;;  %v1935_v13 = vmax.f32 %v1931_v8, %v1920_v9  ;;  %v1932_v14 = vmax.f32 %v1928_v3, %v1879_v10  ;;  %v1941_v17 = vmax.f32 %v1937_v4, 0.0 }
 0x12f   :  { %v2107_v16 = vpop.f32.mrf.mxu0  ;;  %v2150_v21 = vpop.f32.mrf.mxu1 }
 0x130   :  { %v1942_v18 = vmax.f32 %v1938_v12, 0.0  ;;  %v1939_v19 = vadd.f32 %v1935_v13, %v6852_v44  ;;  %v1936_v20 = vmax.f32 %v1932_v14, %v1922_v15  ;;  %v2245_v32 = vmax.f32 %v2107_v16, %v2150_v21 }
 0x131   :  { %v2109_v22 = vpop.f32.mrf.mxu0  ;;  %v2152_v25 = vpop.f32.mrf.mxu1 }
 0x132   :  { %v5797_v23 = vpack.c.bf16 %v1942_v18, %v1941_v17  ;;  %v1940_v24 = vadd.f32 %v1936_v20, %v6852_v44  ;;  %v1943_v27 = vmax.f32 %v1939_v19, 0.0  ;;  %v2246_v35 = vmax.f32 %v2109_v22, %v2152_v25 }
 0x133   :  { %v2111_v26 = vpop.f32.mrf.mxu0  ;;  %v2154_v29 = vpop.f32.mrf.mxu1 }
 0x134   :  { %5385 = vst [vmem:[%s7218_s3 + $0x50] sm:$0xff] %v5797_v23  ;;  %v1944_v28 = vmax.f32 %v1940_v24, 0.0  ;;  %v2247_v39 = vmax.f32 %v2111_v26, %v2154_v29 }
 0x135   :  { %v2113_v30 = vpop.f32.mrf.mxu0  ;;  %v2156_v33 = vpop.f32.mrf.mxu1 }
 0x136   :  { %v5798_v7 = vpack.c.bf16 %v1944_v28, %v1943_v27  ;;  %v2248_v45 = vmax.f32 %v2113_v30, %v2156_v33 }
 0x137   :  { %v2193_v34 = vpop.f32.mrf.mxu0  ;;  %v2236_v37 = vpop.f32.mrf.mxu1 }
 0x138   :  { %5386 = vst [vmem:[%s7218_s3 + $0x58] sm:$0xff] %v5798_v7  ;;  %v2249_v36 = vmax.f32 %v2245_v32, %v2193_v34 }
 0x139   :  { %v2195_v38 = vpop.f32.mrf.mxu0  ;;  %v2238_v42 = vpop.f32.mrf.mxu1 }
 0x13a   :  { %v2253_v40 = vmax.f32 %v2249_v36, %v2236_v37  ;;  %v2250_v41 = vmax.f32 %v2246_v35, %v2195_v38 }
 0x13b   :  { %v2197_v43 = vpop.f32.mrf.mxu0  ;;  %v2240_v48 = vpop.f32.mrf.mxu1 }
 0x13c   :  { %v2257_v5 = vadd.f32 %v2253_v40, %v6800_v11  ;;  %v2254_v46 = vmax.f32 %v2250_v41, %v2238_v42  ;;  %v2251_v47 = vmax.f32 %v2247_v39, %v2197_v43 }
 0x13d   :  { %v2199_v49 = vpop.f32.mrf.mxu0  ;;  %v2242_v31 = vpop.f32.mrf.mxu1 }
 0x13e   :  { %v2258_v50 = vadd.f32 %v2254_v46, %v6800_v11  ;;  %v2255_v51 = vmax.f32 %v2251_v47, %v2240_v48  ;;  %v2252_v52 = vmax.f32 %v2248_v45, %v2199_v49  ;;  %v2261_v54 = vmax.f32 %v2257_v5, 0.0 }
 0x13f   :  { %v2427_v53 = vpop.f32.mrf.mxu0  ;;  %v2470_v58 = vpop.f32.mrf.mxu1 }
 0x140   :  { %v2262_v55 = vmax.f32 %v2258_v50, 0.0  ;;  %v2259_v1 = vadd.f32 %v2255_v51, %v6852_v44  ;;  %v2256_v57 = vmax.f32 %v2252_v52, %v2242_v31  ;;  %v2565_v6 = vmax.f32 %v2427_v53, %v2470_v58 }
 0x141   :  { %v2429_v59 = vpop.f32.mrf.mxu0  ;;  %v2472_v62 = vpop.f32.mrf.mxu1 }
 0x142   :  { %v5799_v60 = vpack.c.bf16 %v2262_v55, %v2261_v54  ;;  %v2260_v61 = vadd.f32 %v2256_v57, %v6852_v44  ;;  %v2263_v56 = vmax.f32 %v2259_v1, 0.0  ;;  %v2566_v10 = vmax.f32 %v2429_v59, %v2472_v62 }
 0x143   :  { %v2431_v63 = vpop.f32.mrf.mxu0  ;;  %v2474_v2 = vpop.f32.mrf.mxu1 }
 0x144   :  { %5425 = vst [vmem:[%s7218_s3 + $0x60] sm:$0xff] %v5799_v60  ;;  %v2264_v0 = vmax.f32 %v2260_v61, 0.0  ;;  %v2567_v15 = vmax.f32 %v2431_v63, %v2474_v2 }
 0x145   :  { %v2433_v3 = vpop.f32.mrf.mxu0  ;;  %v2476_v8 = vpop.f32.mrf.mxu1 }
 0x146   :  { %v5800_v4 = vpack.c.bf16 %v2264_v0, %v2263_v56  ;;  %v2568_v20 = vmax.f32 %v2433_v3, %v2476_v8 }
 0x147   :  { %v2513_v9 = vpop.f32.mrf.mxu0  ;;  %v2556_v13 = vpop.f32.mrf.mxu1 }
 0x148   :  { %5426 = vst [vmem:[%s7218_s3 + $0x68] sm:$0xff] %v5800_v4  ;;  %v2569_v12 = vmax.f32 %v2565_v6, %v2513_v9 }
 0x149   :  { %v2515_v14 = vpop.f32.mrf.mxu0  ;;  %v2558_v18 = vpop.f32.mrf.mxu1 }
 0x14a   :  { %v2573_v16 = vmax.f32 %v2569_v12, %v2556_v13  ;;  %v2570_v17 = vmax.f32 %v2566_v10, %v2515_v14 }
 0x14b   :  { %v2517_v19 = vpop.f32.mrf.mxu0  ;;  %v2560_v24 = vpop.f32.mrf.mxu1 }
 0x14c   :  { %v2577_v21 = vadd.f32 %v2573_v16, %v6800_v11  ;;  %v2574_v22 = vmax.f32 %v2570_v17, %v2558_v18  ;;  %v2571_v23 = vmax.f32 %v2567_v15, %v2517_v19 }
 0x14d   :  { %v2519_v25 = vpop.f32.mrf.mxu0  ;;  %v2562_v29 = vpop.f32.mrf.mxu1 }
 0x14e   :  { %v2578_v26 = vadd.f32 %v2574_v22, %v6800_v11  ;;  %v2575_v27 = vmax.f32 %v2571_v23, %v2560_v24  ;;  %v2572_v28 = vmax.f32 %v2568_v20, %v2519_v25  ;;  %v2581_v7 = vmax.f32 %v2577_v21, 0.0 }
 0x14f   :  { %v2747_v30 = vpop.f32.mrf.mxu0  ;;  %v2790_v35 = vpop.f32.mrf.mxu1 }
 0x150   :  { %v2582_v32 = vmax.f32 %v2578_v26, 0.0  ;;  %v2579_v33 = vadd.f32 %v2575_v27, %v6852_v44  ;;  %v2576_v34 = vmax.f32 %v2572_v28, %v2562_v29  ;;  %v2885_v46 = vmax.f32 %v2747_v30, %v2790_v35 }
 0x151   :  { %v2749_v36 = vpop.f32.mrf.mxu0  ;;  %v2792_v39 = vpop.f32.mrf.mxu1 }
 0x152   :  { %v5801_v37 = vpack.c.bf16 %v2582_v32, %v2581_v7  ;;  %v2580_v38 = vadd.f32 %v2576_v34, %v6852_v44  ;;  %v2583_v41 = vmax.f32 %v2579_v33, 0.0  ;;  %v2886_v49 = vmax.f32 %v2749_v36, %v2792_v39 }
 0x153   :  { %v2751_v40 = vpop.f32.mrf.mxu0  ;;  %v2794_v43 = vpop.f32.mrf.mxu1 }
 0x154   :  { %5465 = vst [vmem:[%s7218_s3 + $0x70] sm:$0xff] %v5801_v37  ;;  %v2584_v42 = vmax.f32 %v2580_v38, 0.0  ;;  %v2887_v31 = vmax.f32 %v2751_v40, %v2794_v43 }
 0x155   :  { %v2753_v45 = vpop.f32.mrf.mxu0  ;;  %v2796_v47 = vpop.f32.mrf.mxu1 }
 0x156   :  { %v5802_v5 = vpack.c.bf16 %v2584_v42, %v2583_v41  ;;  %v2888_v57 = vmax.f32 %v2753_v45, %v2796_v47 }
 0x157   :  { %v2833_v48 = vpop.f32.mrf.mxu0  ;;  %v2876_v51 = vpop.f32.mrf.mxu1 }
 0x158   :  { %5466 = vst [vmem:[%s7218_s3 + $0x78] sm:$0xff] %v5802_v5  ;;  %v2889_v50 = vmax.f32 %v2885_v46, %v2833_v48 }
 0x159   :  { %v2835_v52 = vpop.f32.mrf.mxu0  ;;  %v2878_v55 = vpop.f32.mrf.mxu1 }
 0x15a   :  { %v2893_v53 = vmax.f32 %v2889_v50, %v2876_v51  ;;  %v2890_v54 = vmax.f32 %v2886_v49, %v2835_v52 }
 0x15b   :  { %v2837_v1 = vpop.f32.mrf.mxu0  ;;  %v2880_v61 = vpop.f32.mrf.mxu1 }
 0x15c   :  { %v2897_v58 = vadd.f32 %v2893_v53, %v6800_v11  ;;  %v2894_v59 = vmax.f32 %v2890_v54, %v2878_v55  ;;  %v2891_v60 = vmax.f32 %v2887_v31, %v2837_v1 }
 0x15d   :  { %v2839_v62 = vpop.f32.mrf.mxu0  ;;  %v2882_v2 = vpop.f32.mrf.mxu1 }
 0x15e   :  { %v2898_v63 = vadd.f32 %v2894_v59, %v6800_v11  ;;  %v2895_v56 = vmax.f32 %v2891_v60, %v2880_v61  ;;  %v2892_v0 = vmax.f32 %v2888_v57, %v2839_v62  ;;  %v2901_v4 = vmax.f32 %v2897_v58, 0.0 }
 0x15f   :  { %v3067_v3 = vpop.f32.mrf.mxu0  ;;  %v3110_v10 = vpop.f32.mrf.mxu1 }
 0x160   :  { %v2902_v6 = vmax.f32 %v2898_v63, 0.0  ;;  %v2899_v8 = vadd.f32 %v2895_v56, %v6852_v44  ;;  %v2896_v9 = vmax.f32 %v2892_v0, %v2882_v2  ;;  %v3205_v22 = vmax.f32 %v3067_v3, %v3110_v10 }
 0x161   :  { %v3069_v12 = vpop.f32.mrf.mxu0  ;;  %v3112_v15 = vpop.f32.mrf.mxu1 }
 0x162   :  { %v5803_v13 = vpack.c.bf16 %v2902_v6, %v2901_v4  ;;  %v2900_v14 = vadd.f32 %v2896_v9, %v6852_v44  ;;  %v2903_v17 = vmax.f32 %v2899_v8, 0.0  ;;  %v3206_v25 = vmax.f32 %v3069_v12, %v3112_v15 }
 0x163   :  { %v3071_v16 = vpop.f32.mrf.mxu0  ;;  %v3114_v19 = vpop.f32.mrf.mxu1 }
 0x164   :  { %5505 = vst [vmem:[%s7218_s3 + $0x80] sm:$0xff] %v5803_v13  ;;  %v2904_v18 = vmax.f32 %v2900_v14, 0.0  ;;  %v3207_v29 = vmax.f32 %v3071_v16, %v3114_v19 }
 0x165   :  { %v3073_v20 = vpop.f32.mrf.mxu0  ;;  %v3116_v23 = vpop.f32.mrf.mxu1 }
 0x166   :  { %v5804_v21 = vpack.c.bf16 %v2904_v18, %v2903_v17  ;;  %v3208_v34 = vmax.f32 %v3073_v20, %v3116_v23 }
 0x167   :  { %v3153_v24 = vpop.f32.mrf.mxu0  ;;  %v3196_v27 = vpop.f32.mrf.mxu1 }
 0x168   :  { %5506 = vst [vmem:[%s7218_s3 + $0x88] sm:$0xff] %v5804_v21  ;;  %v3209_v26 = vmax.f32 %v3205_v22, %v3153_v24 }
 0x169   :  { %v3155_v28 = vpop.f32.mrf.mxu0  ;;  %v3198_v32 = vpop.f32.mrf.mxu1 }
 0x16a   :  { %v3213_v30 = vmax.f32 %v3209_v26, %v3196_v27  ;;  %v3210_v7 = vmax.f32 %v3206_v25, %v3155_v28 }
 0x16b   :  { %v3157_v33 = vpop.f32.mrf.mxu0  ;;  %v3200_v38 = vpop.f32.mrf.mxu1 }
 0x16c   :  { %v3217_v35 = vadd.f32 %v3213_v30, %v6800_v11  ;;  %v3214_v36 = vmax.f32 %v3210_v7, %v3198_v32  ;;  %v3211_v37 = vmax.f32 %v3207_v29, %v3157_v33 }
 0x16d   :  { %v3159_v39 = vpop.f32.mrf.mxu0  ;;  %v3202_v43 = vpop.f32.mrf.mxu1 }
 0x16e   :  { %v3218_v40 = vadd.f32 %v3214_v36, %v6800_v11  ;;  %v3215_v41 = vmax.f32 %v3211_v37, %v3200_v38  ;;  %v3212_v42 = vmax.f32 %v3208_v34, %v3159_v39  ;;  %v3221_v5 = vmax.f32 %v3217_v35, 0.0 }
 0x16f   :  { %v3387_v45 = vpop.f32.mrf.mxu0  ;;  %v3430_v49 = vpop.f32.mrf.mxu1 }
 0x170   :  { %v3222_v46 = vmax.f32 %v3218_v40, 0.0  ;;  %v3219_v47 = vadd.f32 %v3215_v41, %v6852_v44  ;;  %v3216_v48 = vmax.f32 %v3212_v42, %v3202_v43  ;;  %v3525_v59 = vmax.f32 %v3387_v45, %v3430_v49 }
 0x171   :  { %v3389_v50 = vpop.f32.mrf.mxu0  ;;  %v3432_v31 = vpop.f32.mrf.mxu1 }
 0x172   :  { %v5805_v51 = vpack.c.bf16 %v3222_v46, %v3221_v5  ;;  %v3220_v52 = vadd.f32 %v3216_v48, %v6852_v44  ;;  %v3223_v54 = vmax.f32 %v3219_v47, 0.0  ;;  %v3526_v62 = vmax.f32 %v3389_v50, %v3432_v31 }
 0x173   :  { %v3391_v53 = vpop.f32.mrf.mxu0  ;;  %v3434_v1 = vpop.f32.mrf.mxu1 }
 0x174   :  { %5545 = vst [vmem:[%s7218_s3 + $0x90] sm:$0xff] %v5805_v51  ;;  %v3224_v55 = vmax.f32 %v3220_v52, 0.0  ;;  %v3527_v2 = vmax.f32 %v3391_v53, %v3434_v1 }
 0x175   :  { %v3393_v57 = vpop.f32.mrf.mxu0  ;;  %v3436_v60 = vpop.f32.mrf.mxu1 }
 0x176   :  { %v5806_v58 = vpack.c.bf16 %v3224_v55, %v3223_v54  ;;  %v3528_v9 = vmax.f32 %v3393_v57, %v3436_v60 }
 0x177   :  { %v3473_v61 = vpop.f32.mrf.mxu0  ;;  %v3516_v56 = vpop.f32.mrf.mxu1 }
 0x178   :  { %5546 = vst [vmem:[%s7218_s3 + $0x98] sm:$0xff] %v5806_v58  ;;  %v3529_v63 = vmax.f32 %v3525_v59, %v3473_v61 }
 0x179   :  { %v3475_v0 = vpop.f32.mrf.mxu0  ;;  %v3518_v6 = vpop.f32.mrf.mxu1 }
 0x17a   :  { %v3533_v3 = vmax.f32 %v3529_v63, %v3516_v56  ;;  %v3530_v4 = vmax.f32 %v3526_v62, %v3475_v0 }
 0x17b   :  { %v3477_v8 = vpop.f32.mrf.mxu0  ;;  %v3520_v14 = vpop.f32.mrf.mxu1 }
 0x17c   :  { %v3537_v10 = vadd.f32 %v3533_v3, %v6800_v11  ;;  %v3534_v12 = vmax.f32 %v3530_v4, %v3518_v6  ;;  %v3531_v13 = vmax.f32 %v3527_v2, %v3477_v8 }
 0x17d   :  { %v3479_v15 = vpop.f32.mrf.mxu0  ;;  %v3522_v19 = vpop.f32.mrf.mxu1 }
 0x17e   :  { %v3538_v16 = vadd.f32 %v3534_v12, %v6800_v11  ;;  %v3535_v17 = vmax.f32 %v3531_v13, %v3520_v14  ;;  %v3532_v18 = vmax.f32 %v3528_v9, %v3479_v15  ;;  %v3541_v21 = vmax.f32 %v3537_v10, 0.0 }
 0x17f   :  { %v3707_v20 = vpop.f32.mrf.mxu0  ;;  %v3750_v25 = vpop.f32.mrf.mxu1 }
 0x180   :  { %v3542_v22 = vmax.f32 %v3538_v16, 0.0  ;;  %v3539_v23 = vadd.f32 %v3535_v17, %v6852_v44  ;;  %v3536_v24 = vmax.f32 %v3532_v18, %v3522_v19  ;;  %v3845_v36 = vmax.f32 %v3707_v20, %v3750_v25 }
 0x181   :  { %v3709_v26 = vpop.f32.mrf.mxu0  ;;  %v3752_v29 = vpop.f32.mrf.mxu1 }
 0x182   :  { %v5807_v27 = vpack.c.bf16 %v3542_v22, %v3541_v21  ;;  %v3540_v28 = vadd.f32 %v3536_v24, %v6852_v44  ;;  %v3543_v7 = vmax.f32 %v3539_v23, 0.0  ;;  %v3846_v39 = vmax.f32 %v3709_v26, %v3752_v29 }
 0x183   :  { %v3711_v30 = vpop.f32.mrf.mxu0  ;;  %v3754_v33 = vpop.f32.mrf.mxu1 }
 0x184   :  { %5585 = vst [vmem:[%s7218_s3 + $0xa0] sm:$0xff] %v5807_v27  ;;  %v3544_v32 = vmax.f32 %v3540_v28, 0.0  ;;  %v3847_v43 = vmax.f32 %v3711_v30, %v3754_v33 }
 0x185   :  { %v3713_v34 = vpop.f32.mrf.mxu0  ;;  %v3756_v37 = vpop.f32.mrf.mxu1 }
 0x186   :  { %v5808_v35 = vpack.c.bf16 %v3544_v32, %v3543_v7  ;;  %v3848_v48 = vmax.f32 %v3713_v34, %v3756_v37 }
 0x187   :  { %v3793_v38 = vpop.f32.mrf.mxu0  ;;  %v3836_v41 = vpop.f32.mrf.mxu1 }
 0x188   :  { %5586 = vst [vmem:[%s7218_s3 + $0xa8] sm:$0xff] %v5808_v35  ;;  %v3849_v40 = vmax.f32 %v3845_v36, %v3793_v38 }
 0x189   :  { %v3795_v42 = vpop.f32.mrf.mxu0  ;;  %v3838_v46 = vpop.f32.mrf.mxu1 }
 0x18a   :  { %v3853_v45 = vmax.f32 %v3849_v40, %v3836_v41  ;;  %v3850_v5 = vmax.f32 %v3846_v39, %v3795_v42 }
 0x18b   :  { %v3797_v47 = vpop.f32.mrf.mxu0  ;;  %v3840_v52 = vpop.f32.mrf.mxu1 }
 0x18c   :  { %v3857_v49 = vadd.f32 %v3853_v45, %v6800_v11  ;;  %v3854_v50 = vmax.f32 %v3850_v5, %v3838_v46  ;;  %v3851_v51 = vmax.f32 %v3847_v43, %v3797_v47 }
 0x18d   :  { %v3799_v31 = vpop.f32.mrf.mxu0  ;;  %v3842_v1 = vpop.f32.mrf.mxu1 }
 0x18e   :  { %v3858_v53 = vadd.f32 %v3854_v50, %v6800_v11  ;;  %v3855_v54 = vmax.f32 %v3851_v51, %v3840_v52  ;;  %v3852_v55 = vmax.f32 %v3848_v48, %v3799_v31  ;;  %v3861_v58 = vmax.f32 %v3857_v49, 0.0 }
 0x18f   :  { %v4027_v57 = vpop.f32.mrf.mxu0  ;;  %v4070_v62 = vpop.f32.mrf.mxu1 }
 0x190   :  { %v3862_v59 = vmax.f32 %v3858_v53, 0.0  ;;  %v3859_v60 = vadd.f32 %v3855_v54, %v6852_v44  ;;  %v3856_v61 = vmax.f32 %v3852_v55, %v3842_v1  ;;  %v4165_v12 = vmax.f32 %v4027_v57, %v4070_v62 }
 0x191   :  { %v4029_v63 = vpop.f32.mrf.mxu0  ;;  %v4072_v2 = vpop.f32.mrf.mxu1 }
 0x192   :  { %v5809_v56 = vpack.c.bf16 %v3862_v59, %v3861_v58  ;;  %v3860_v0 = vadd.f32 %v3856_v61, %v6852_v44  ;;  %v3863_v4 = vmax.f32 %v3859_v60, 0.0  ;;  %v4166_v15 = vmax.f32 %v4029_v63, %v4072_v2 }
 0x193   :  { %v4031_v3 = vpop.f32.mrf.mxu0  ;;  %v4074_v8 = vpop.f32.mrf.mxu1 }
 0x194   :  { %5625 = vst [vmem:[%s7218_s3 + $0xb0] sm:$0xff] %v5809_v56  ;;  %v3864_v6 = vmax.f32 %v3860_v0, 0.0  ;;  %v4167_v19 = vmax.f32 %v4031_v3, %v4074_v8 }
 0x195   :  { %v4033_v9 = vpop.f32.mrf.mxu0  ;;  %v4076_v13 = vpop.f32.mrf.mxu1 }
 0x196   :  { %v5810_v10 = vpack.c.bf16 %v3864_v6, %v3863_v4  ;;  %v4168_v24 = vmax.f32 %v4033_v9, %v4076_v13 }
 0x197   :  { %v4113_v14 = vpop.f32.mrf.mxu0  ;;  %v4156_v17 = vpop.f32.mrf.mxu1 }
 0x198   :  { %5626 = vst [vmem:[%s7218_s3 + $0xb8] sm:$0xff] %v5810_v10  ;;  %v4169_v16 = vmax.f32 %v4165_v12, %v4113_v14 }
 0x199   :  { %v4115_v18 = vpop.f32.mrf.mxu0  ;;  %v4158_v22 = vpop.f32.mrf.mxu1 }
 0x19a   :  { %v4173_v20 = vmax.f32 %v4169_v16, %v4156_v17  ;;  %v4170_v21 = vmax.f32 %v4166_v15, %v4115_v18 }
 0x19b   :  { %v4117_v23 = vpop.f32.mrf.mxu0  ;;  %v4160_v28 = vpop.f32.mrf.mxu1 }
 0x19c   :  { %v4177_v25 = vadd.f32 %v4173_v20, %v6800_v11  ;;  %v4174_v26 = vmax.f32 %v4170_v21, %v4158_v22  ;;  %v4171_v27 = vmax.f32 %v4167_v19, %v4117_v23 }
 0x19d   :  { %v4119_v29 = vpop.f32.mrf.mxu0  ;;  %v4162_v33 = vpop.f32.mrf.mxu1 }
 0x19e   :  { %v4178_v30 = vadd.f32 %v4174_v26, %v6800_v11  ;;  %v4175_v7 = vmax.f32 %v4171_v27, %v4160_v28  ;;  %v4172_v32 = vmax.f32 %v4168_v24, %v4119_v29  ;;  %v4181_v35 = vmax.f32 %v4177_v25, 0.0 }
 0x19f   :  { %v4347_v34 = vpop.f32.mrf.mxu0  ;;  %v4390_v39 = vpop.f32.mrf.mxu1 }
 0x1a0   :  { %v4182_v36 = vmax.f32 %v4178_v30, 0.0  ;;  %v4179_v37 = vadd.f32 %v4175_v7, %v6852_v44  ;;  %v4176_v38 = vmax.f32 %v4172_v32, %v4162_v33  ;;  %v4485_v50 = vmax.f32 %v4347_v34, %v4390_v39 }
 0x1a1   :  { %v4349_v40 = vpop.f32.mrf.mxu0  ;;  %v4392_v43 = vpop.f32.mrf.mxu1 }
 0x1a2   :  { %v5811_v41 = vpack.c.bf16 %v4182_v36, %v4181_v35  ;;  %v4180_v42 = vadd.f32 %v4176_v38, %v6852_v44  ;;  %v4183_v5 = vmax.f32 %v4179_v37, 0.0  ;;  %v4486_v31 = vmax.f32 %v4349_v40, %v4392_v43 }
 0x1a3   :  { %v4351_v45 = vpop.f32.mrf.mxu0  ;;  %v4394_v47 = vpop.f32.mrf.mxu1 }
 0x1a4   :  { %5665 = vst [vmem:[%s7218_s3 + $0xc0] sm:$0xff] %v5811_v41  ;;  %v4184_v46 = vmax.f32 %v4180_v42, 0.0  ;;  %v4487_v1 = vmax.f32 %v4351_v45, %v4394_v47 }
 0x1a5   :  { %v4353_v48 = vpop.f32.mrf.mxu0  ;;  %v4396_v51 = vpop.f32.mrf.mxu1 }
 0x1a6   :  { %v5812_v49 = vpack.c.bf16 %v4184_v46, %v4183_v5  ;;  %v4488_v61 = vmax.f32 %v4353_v48, %v4396_v51 }
 0x1a7   :  { %v4433_v52 = vpop.f32.mrf.mxu0  ;;  %v4476_v54 = vpop.f32.mrf.mxu1 }
 0x1a8   :  { %5666 = vst [vmem:[%s7218_s3 + $0xc8] sm:$0xff] %v5812_v49  ;;  %v4489_v53 = vmax.f32 %v4485_v50, %v4433_v52 }
 0x1a9   :  { %v4435_v55 = vpop.f32.mrf.mxu0  ;;  %v4478_v59 = vpop.f32.mrf.mxu1 }
 0x1aa   :  { %v4493_v57 = vmax.f32 %v4489_v53, %v4476_v54  ;;  %v4490_v58 = vmax.f32 %v4486_v31, %v4435_v55 }
 0x1ab   :  { %v4437_v60 = vpop.f32.mrf.mxu0  ;;  %v4480_v0 = vpop.f32.mrf.mxu1 }
 0x1ac   :  { %v4497_v62 = vadd.f32 %v4493_v57, %v6800_v11  ;;  %v4494_v63 = vmax.f32 %v4490_v58, %v4478_v59  ;;  %v4491_v56 = vmax.f32 %v4487_v1, %v4437_v60 }
 0x1ad   :  { %v4439_v2 = vpop.f32.mrf.mxu0  ;;  %v4482_v8 = vpop.f32.mrf.mxu1 }
 0x1ae   :  { %v4498_v3 = vadd.f32 %v4494_v63, %v6800_v11  ;;  %v4495_v4 = vmax.f32 %v4491_v56, %v4480_v0  ;;  %v4492_v6 = vmax.f32 %v4488_v61, %v4439_v2  ;;  %v4501_v10 = vmax.f32 %v4497_v62, 0.0 }
 0x1af   :  { %v4667_v9 = vpop.f32.mrf.mxu0  ;;  %v4710_v15 = vpop.f32.mrf.mxu1 }
 0x1b0   :  { %v4502_v12 = vmax.f32 %v4498_v3, 0.0  ;;  %v4499_v13 = vadd.f32 %v4495_v4, %v6852_v44  ;;  %v4496_v14 = vmax.f32 %v4492_v6, %v4482_v8  ;;  %v4805_v26 = vmax.f32 %v4667_v9, %v4710_v15 }
 0x1b1   :  { %v4669_v16 = vpop.f32.mrf.mxu0  ;;  %v4712_v19 = vpop.f32.mrf.mxu1 }
 0x1b2   :  { %v5813_v17 = vpack.c.bf16 %v4502_v12, %v4501_v10  ;;  %v4500_v18 = vadd.f32 %v4496_v14, %v6852_v44  ;;  %v4503_v21 = vmax.f32 %v4499_v13, 0.0  ;;  %v4806_v29 = vmax.f32 %v4669_v16, %v4712_v19 }
 0x1b3   :  { %v4671_v20 = vpop.f32.mrf.mxu0  ;;  %v4714_v23 = vpop.f32.mrf.mxu1 }
 0x1b4   :  { %5705 = vst [vmem:[%s7218_s3 + $0xd0] sm:$0xff] %v5813_v17  ;;  %v4504_v22 = vmax.f32 %v4500_v18, 0.0  ;;  %v4807_v33 = vmax.f32 %v4671_v20, %v4714_v23 }
 0x1b5   :  { %v4673_v24 = vpop.f32.mrf.mxu0  ;;  %v4716_v27 = vpop.f32.mrf.mxu1 }
 0x1b6   :  { %v5814_v25 = vpack.c.bf16 %v4504_v22, %v4503_v21  ;;  %v4808_v38 = vmax.f32 %v4673_v24, %v4716_v27 }
 0x1b7   :  { %v4753_v28 = vpop.f32.mrf.mxu0  ;;  %v4796_v7 = vpop.f32.mrf.mxu1 }
 0x1b8   :  { %5706 = vst [vmem:[%s7218_s3 + $0xd8] sm:$0xff] %v5814_v25  ;;  %v4809_v30 = vmax.f32 %v4805_v26, %v4753_v28 }
 0x1b9   :  { %v4755_v32 = vpop.f32.mrf.mxu0  ;;  %v4798_v36 = vpop.f32.mrf.mxu1 }
 0x1ba   :  { %v4813_v34 = vmax.f32 %v4809_v30, %v4796_v7  ;;  %v4810_v35 = vmax.f32 %v4806_v29, %v4755_v32 }
 0x1bb   :  { %v4757_v37 = vpop.f32.mrf.mxu0  ;;  %v4800_v42 = vpop.f32.mrf.mxu1 }
 0x1bc   :  { %v4817_v39 = vadd.f32 %v4813_v34, %v6800_v11  ;;  %v4814_v40 = vmax.f32 %v4810_v35, %v4798_v36  ;;  %v4811_v41 = vmax.f32 %v4807_v33, %v4757_v37 }
 0x1bd   :  { %v4759_v43 = vpop.f32.mrf.mxu0  ;;  %v4802_v47 = vpop.f32.mrf.mxu1 }
 0x1be   :  { %v4818_v45 = vadd.f32 %v4814_v40, %v6800_v11  ;;  %v4815_v5 = vmax.f32 %v4811_v41, %v4800_v42  ;;  %v4812_v46 = vmax.f32 %v4808_v38, %v4759_v43  ;;  %v4821_v49 = vmax.f32 %v4817_v39, 0.0 }
 0x1bf   :  { %v4987_v48 = vpop.f32.mrf.mxu0  ;;  %v5030_v31 = vpop.f32.mrf.mxu1 }
 0x1c0   :  { %v4822_v50 = vmax.f32 %v4818_v45, 0.0  ;;  %v4819_v51 = vadd.f32 %v4815_v5, %v6852_v44  ;;  %v4816_v52 = vmax.f32 %v4812_v46, %v4802_v47  ;;  %v5125_v63 = vmax.f32 %v4987_v48, %v5030_v31 }
 0x1c1   :  { %v4989_v53 = vpop.f32.mrf.mxu0  ;;  %v5032_v1 = vpop.f32.mrf.mxu1 }
 0x1c2   :  { %v5815_v54 = vpack.c.bf16 %v4822_v50, %v4821_v49  ;;  %v4820_v55 = vadd.f32 %v4816_v52, %v6852_v44  ;;  %v4823_v58 = vmax.f32 %v4819_v51, 0.0  ;;  %v5126_v2 = vmax.f32 %v4989_v53, %v5032_v1 }
 0x1c3   :  { %v4991_v57 = vpop.f32.mrf.mxu0  ;;  %v5034_v60 = vpop.f32.mrf.mxu1 }
 0x1c4   :  { %5745 = vst [vmem:[%s7218_s3 + $0xe0] sm:$0xff] %v5815_v54  ;;  %v4824_v59 = vmax.f32 %v4820_v55, 0.0  ;;  %v5127_v8 = vmax.f32 %v4991_v57, %v5034_v60 }
 0x1c5   :  { %v4993_v61 = vpop.f32.mrf.mxu0  ;;  %v5036_v56 = vpop.f32.mrf.mxu1 }
 0x1c6   :  { %v5816_v62 = vpack.c.bf16 %v4824_v59, %v4823_v58  ;;  %v5128_v14 = vmax.f32 %v4993_v61, %v5036_v56 }
 0x1c7   :  { %v5073_v0 = vpop.f32.mrf.mxu0  ;;  %v5116_v4 = vpop.f32.mrf.mxu1 }
 0x1c8   :  { %5746 = vst [vmem:[%s7218_s3 + $0xe8] sm:$0xff] %v5816_v62  ;;  %v5129_v3 = vmax.f32 %v5125_v63, %v5073_v0 }
 0x1c9   :  { %v5075_v6 = vpop.f32.mrf.mxu0  ;;  %v5118_v12 = vpop.f32.mrf.mxu1 }
 0x1ca   :  { %v5133_v9 = vmax.f32 %v5129_v3, %v5116_v4  ;;  %v5130_v10 = vmax.f32 %v5126_v2, %v5075_v6 }
 0x1cb   :  { %v5077_v13 = vpop.f32.mrf.mxu0  ;;  %v5120_v18 = vpop.f32.mrf.mxu1 }
 0x1cc   :  { %v5137_v15 = vadd.f32 %v5133_v9, %v6800_v11  ;;  %v5134_v16 = vmax.f32 %v5130_v10, %v5118_v12  ;;  %v5131_v17 = vmax.f32 %v5127_v8, %v5077_v13 }
 0x1cd   :  { %v5079_v19 = vpop.f32.mrf.mxu0  ;;  %v5122_v23 = vpop.f32.mrf.mxu1 }
 0x1ce   :  { %v5138_v20 = vadd.f32 %v5134_v16, %v6800_v11  ;;  %v5135_v21 = vmax.f32 %v5131_v17, %v5120_v18  ;;  %v5132_v22 = vmax.f32 %v5128_v14, %v5079_v19  ;;  %v5141_v24 = vmax.f32 %v5137_v15, 0.0 }
 0x1d0   :  { %v5142_v25 = vmax.f32 %v5138_v20, 0.0  ;;  %v5139_v26 = vadd.f32 %v5135_v21, %v6852_v44  ;;  %v5136_v27 = vmax.f32 %v5132_v22, %v5122_v23 }
 0x1d2   :  { %v5817_v28 = vpack.c.bf16 %v5142_v25, %v5141_v24  ;;  %v5140_v29 = vadd.f32 %v5136_v27, %v6852_v44  ;;  %v5143_v30 = vmax.f32 %v5139_v26, 0.0 }
 0x1d4   :  { %5785 = vst [vmem:[%s7218_s3 + $0xf0] sm:$0xff] %v5817_v28  ;;  %v5144_v7 = vmax.f32 %v5140_v29, 0.0 }
 0x1d6   :  { %v5818_v32 = vpack.c.bf16 %v5144_v7, %v5143_v30 }
 0x1d8   :  { %5786 = vst [vmem:[%s7218_s3 + $0xf8] sm:$0xff] %v5818_v32 }

// kernel: cnn_lstm_forward.6
= control target key start
LH: loop header
LB: loop body
LE: loop exit
PB: predicated region body
PF: predicated region fallthrough
CT: control target
= control target key end

     0   :  { %vm19_vm0 = vcmask 261120   ;;  %v1823_v0 = vmov 0.0   ;;  %vm1824_vm1 = vmmov 0   ;;  %v1825_v11 = vmov 0   ;;  %s1826_s18 = smov 64   ;;  %s1827_s19 = smov 32   ;;  %s2425_s2 = inlined_call_operand.vmem [shape: bf16[32,128], index: 2, kind: input, shape index: {}]   ;;  %s2426_s1 = inlined_call_operand.vmem [shape: f32[8,2048], index: 1, kind: input, shape index: {}]   ;;  %s2427_s0 = inlined_call_operand.vmem [shape: s32[8,1], index: 0, kind: input, shape index: {}]   ;;  %s2428_s3 = inlined_call_operand.vmem [shape: f32[8,512], index: 3, kind: output, shape index: {}]  }
   0x1   :  { %1554 = vmatprep.subr.bf16.mxu0 %v1823_v0  ;;  %v1853_v1 = vld [vmem:[%s2425_s2 + $0x8] sm:$0xff]   ;;  %1558 = vmatprep.mubr.msk.bf16.mxu0 %vm1824_vm1, %v1823_v0  ;;  %20 = vst.msk [vmem:[#allocation2] sm:$0xff] %vm19_vm0, %v1823_v0  ;;  %21 = vst.msk [vmem:[#allocation3] sm:$0xff] %vm19_vm0, %v1823_v0  ;;  %v1868_v2 = vld [vmem:[%s2425_s2] sm:$0xff]   ;;  %s1828_s22 = smov 96  }
   0x2   :  { %1562 = vmatprep.subr.bf16.mxu1 %v1823_v0  ;;  %1566 = vmatprep.mubr.msk.bf16.mxu1 %vm1824_vm1, %v1823_v0  ;;  %v29_v5 = vld [vmem:[%s2426_s1] sm:$0xff]  ;;  %v136_v35 = vld [vmem:[%s2426_s1 + $0x8] sm:$0xff]  ;;  %v226_v61 = vld [vmem:[%s2426_s1 + $0x10] sm:$0xff] }
   0x3   :  { %1555 = vmatpush3.bf16.msra.mxu0 %v1853_v1  ;;  %1563 = vmatpush3.bf16.msra.mxu1 %v1853_v1  ;;  %v1894_v18 = vld [vmem:[%s2427_s0] sm:$0xff] }
   0x4   :  { %1556 = vmatprep.subr.bf16.mxu0 %v1823_v0  ;;  %1564 = vmatprep.subr.bf16.mxu1 %v1823_v0  ;;  %vm1475_vm2 = vcmp.gt.s32.totalorder %v1894_v18, 0  ;;  %vm1477_vm4 = vcmp.gt.s32.totalorder %v1894_v18, 1  ;;  %vm1479_vm6 = vcmp.gt.s32.totalorder %v1894_v18, 2  ;;  %vm1481_vm8 = vcmp.gt.s32.totalorder %v1894_v18, 3 }
   0x5   :  { %1688 = vset.pattern.permute.xlu1 %v1825_v11  ;;  %1689 = vset.pattern.permute.xlu0 %v1825_v11  ;;  %v119_v22 = vsel %vm1475_vm2, 1, %v1825_v11  ;;  %v212_v42 = vsel %vm1477_vm4, 1, %v1825_v11  ;;  %vm1483_vm10 = vcmp.gt.s32.totalorder %v1894_v18, 4  ;;  %vm1485_vm12 = vcmp.gt.s32.totalorder %v1894_v18, 5 }
   0x6   :  { %vm1487_vm14 = vcmp.gt.s32.totalorder %v1894_v18, 6  ;;  %vm1489_vm2 = vcmp.gt.s32.totalorder %v1894_v18, 7 }
   0x7   :  { %1557 = vmatpush3.bf16.msra.mxu0 %v1868_v2  ;;  %1565 = vmatpush3.bf16.msra.mxu1 %v1868_v2 }
   0x8   :  { %v27_v3 = vld [vmem:[#allocation2] sm:$0xff]  ;;  %1570 = vmatprep.subr.bf16.mxu0 %v1823_v0  ;;  %1578 = vmatprep.subr.bf16.mxu1 %v1823_v0  ;;  %v28_v13 = vld [vmem:[#allocation3] sm:$0xff] }
   0x9   :  { %v30_v4 = vpack.c.bf16 %v27_v3, %v27_v3 }
   0xb   :  { %1559 = vmatmul.mubr.msk.bf16.vlgmr.msra.gmra.mxu0 %vm19_vm0, %v30_v4 }
   0xc   :  { %1571 = vmatpush3.bf16.msra.mxu0 %v1853_v1  ;;  %1574 = vmatprep.mubr.msk.bf16.mxu0 %vm1824_vm1, %v1823_v0 }
   0xd   :  { %1572 = vmatprep.subr.bf16.mxu0 %v1823_v0 }
  0x10   :  { %1573 = vmatpush3.bf16.msra.mxu0 %v1868_v2 }
  0x11   :  { %1586 = vmatprep.subr.bf16.mxu0 %v1823_v0 }
  0xcb   :  { %v81_v6 = vpop.f32.mrf.mxu0 }
  0xcc   :  { %v87_v7 = vadd.f32 %v81_v6, %v29_v5 }
  0xcd   :  { %v1560_v8 = vpop.f32.mrf.mxu0 }
  0xce   :  { %1692 = vtanh.f32 %v87_v7  ;;  %v88_v14 = vsub.f32 0.0, %v87_v7  ;;  %v302_v7 = vsel %vm1479_vm6, 1, %v1825_v11  ;;  %vm1491_vm6 = vcmp.gt.s32.totalorder %v1894_v18, 8 }
  0xcf   :  { %v84_v9 = vpop.f32.mrf.mxu0 }
  0xd0   :  { %v89_v15 = vmul.f32 1.442695, %v88_v14 }
  0xd1   :  { %v1561_v10 = vpop.f32.mrf.mxu0 }
  0xd2   :  { %1694 = vpow2.f32 %v89_v15 }
  0xdb   :  { %v1693_v12 = vpop.eup %1692 }
  0xdc   :  { %101 = vrot.lane.b32.xlu0 %v1693_v12, %s1826_s18 }
  0xdf   :  { %v1695_v16 = vpop.eup %1694 }
  0xe0   :  { %96 = vrot.lane.b32.xlu0 %v28_v13, %s1827_s19  ;;  %v91_v17 = vadd.f32 1.0, %v1695_v16 }
  0xe2   :  { %1696 = vrcp.f32 %v91_v17 }
  0xef   :  { %v1697_v19 = vpop.eup %1696 }
 0x14e   :  { %v102_v20 = vpop.permute.xlu0 %101 }
 0x14f   :  { %v104_v21 = vmul.f32 %v1697_v19, %v102_v20 }
 0x151   :  { %106 = vrot.lane.b32.xlu1 %v104_v21, %s1827_s19 }
 0x152   :  { %v97_v23 = vpop.permute.xlu0 %96 }
 0x153   :  { %v99_v24 = vmul.f32 %v1697_v19, %v97_v23 }
 0x155   :  { %121 = vperm.xlu1 %1688, %v119_v22  }
 0x159   :  { %125 = vrot.lane.b32.xlu1 %v27_v3, %s1828_s22 }
 0x1c3   :  { %v107_v25 = vpop.permute.xlu1 %106 }
 0x1c4   :  { %v109_v26 = vadd.f32 %v107_v25, %v99_v24 }
 0x1c6   :  { %1698 = vtanh.f32 %v109_v26 }
 0x1d0   :  { %v1901_v28 = vpop.permute.xlu1 %121 }
 0x1d1   :  { %vm123_vm3 = vcmp.eq.s32.totalorder %v1901_v28, 1 }
 0x1d2   :  { %v129_v50 = vsel %vm123_vm3, %v109_v26, %v97_v23 }
 0x1d3   :  { %v1699_v27 = vpop.eup %1698 }
 0x1d4   :  { %112 = vrot.lane.b32.xlu0 %v1699_v27, %s1826_s18  ;;  %v126_v30 = vpop.permute.xlu1 %125 }
 0x246   :  { %v113_v29 = vpop.permute.xlu0 %112 }
 0x247   :  { %v1903_v31 = vmul.f32 %v1697_v19, %v113_v29  ;;  %v316_v29 = vld [vmem:[%s2426_s1 + $0x18] sm:$0xff] }
 0x249   :  { %v128_v32 = vsel %vm123_vm3, %v1903_v31, %v126_v30 }
 0x24a   :  { %v137_v33 = vpack.c.bf16 %v128_v32, %v128_v32 }
 0x24c   :  { %139 = vrot.lane.b32.xlu0 %v137_v33, %s1827_s19 }
 0x2be   :  { %v140_v34 = vpop.permute.xlu0 %139 }
 0x2bf   :  { %1567 = vmatmul.mubr.msk.bf16.vlgmr.msra.gmra.mxu1 %vm19_vm0, %v140_v34 }
 0x2c0   :  { %1579 = vmatpush3.bf16.msra.mxu1 %v1853_v1  ;;  %1582 = vmatprep.mubr.msk.bf16.mxu1 %vm1824_vm1, %v1823_v0 }
 0x2c1   :  { %1580 = vmatprep.subr.bf16.mxu1 %v1823_v0 }
 0x2c4   :  { %1581 = vmatpush3.bf16.msra.mxu1 %v1868_v2 }
 0x2c5   :  { %1594 = vmatprep.subr.bf16.mxu1 %v1823_v0 }
 0x37f   :  { %v178_v36 = vpop.f32.mrf.mxu1 }
 0x380   :  { %v184_v37 = vadd.f32 %v178_v36, %v136_v35 }
 0x381   :  { %v1568_v38 = vpop.f32.mrf.mxu1 }
 0x382   :  { %1700 = vtanh.f32 %v184_v37  ;;  %v185_v43 = vsub.f32 0.0, %v184_v37  ;;  %v392_v37 = vsel %vm1481_vm8, 1, %v1825_v11 }
 0x383   :  { %v181_v39 = vpop.f32.mrf.mxu1 }
 0x384   :  { %v186_v44 = vmul.f32 1.442695, %v185_v43 }
 0x385   :  { %v1569_v40 = vpop.f32.mrf.mxu1 }
 0x386   :  { %1702 = vpow2.f32 %v186_v44 }
 0x38f   :  { %v1701_v41 = vpop.eup %1700 }
 0x390   :  { %194 = vrot.lane.b32.xlu1 %v1701_v41, %s1826_s18 }
 0x393   :  { %v1703_v45 = vpop.eup %1702 }
 0x394   :  { %214 = vperm.xlu1 %1688, %v212_v42   ;;  %v188_v46 = vadd.f32 1.0, %v1703_v45 }
 0x396   :  { %1704 = vrcp.f32 %v188_v46 }
 0x3a3   :  { %v1705_v47 = vpop.eup %1704 }
 0x3a4   :  { %v192_v51 = vmul.f32 %v1705_v47, %v129_v50 }
 0x402   :  { %v195_v48 = vpop.permute.xlu1 %194 }
 0x403   :  { %v197_v49 = vmul.f32 %v1705_v47, %v195_v48 }
 0x405   :  { %199 = vrot.lane.b32.xlu0 %v197_v49, %s1827_s19 }
 0x40f   :  { %v1927_v55 = vpop.permute.xlu1 %214 }
 0x410   :  { %vm216_vm5 = vcmp.eq.s32.totalorder %v1927_v55, 1 }
 0x477   :  { %v200_v52 = vpop.permute.xlu0 %199 }
 0x478   :  { %v202_v53 = vadd.f32 %v200_v52, %v192_v51 }
 0x47a   :  { %1706 = vtanh.f32 %v202_v53  ;;  %v218_v16 = vsel %vm216_vm5, %v202_v53, %v129_v50 }
 0x487   :  { %v1707_v54 = vpop.eup %1706 }
 0x488   :  { %205 = vrot.lane.b32.xlu0 %v1707_v54, %s1826_s18 }
 0x4fa   :  { %v206_v56 = vpop.permute.xlu0 %205 }
 0x4fb   :  { %v1929_v57 = vmul.f32 %v1705_v47, %v206_v56 }
 0x4fd   :  { %v217_v58 = vsel %vm216_vm5, %v1929_v57, %v128_v32 }
 0x4fe   :  { %v227_v59 = vpack.c.bf16 %v217_v58, %v217_v58 }
 0x500   :  { %229 = vrot.lane.b32.xlu1 %v227_v59, %s1827_s19 }
 0x572   :  { %v230_v60 = vpop.permute.xlu1 %229 }
 0x573   :  { %1575 = vmatmul.mubr.msk.bf16.vlgmr.msra.gmra.mxu0 %vm19_vm0, %v230_v60 }
 0x574   :  { %1587 = vmatpush3.bf16.msra.mxu0 %v1853_v1  ;;  %1590 = vmatprep.mubr.msk.bf16.mxu0 %vm1824_vm1, %v1823_v0 }
 0x575   :  { %1588 = vmatprep.subr.bf16.mxu0 %v1823_v0 }
 0x578   :  { %1589 = vmatpush3.bf16.msra.mxu0 %v1868_v2 }
 0x579   :  { %1602 = vmatprep.subr.bf16.mxu0 %v1823_v0 }
 0x633   :  { %v268_v62 = vpop.f32.mrf.mxu0 }
 0x634   :  { %v274_v63 = vadd.f32 %v268_v62, %v226_v61 }
 0x635   :  { %v1576_v3 = vpop.f32.mrf.mxu0 }
 0x636   :  { %1708 = vtanh.f32 %v274_v63  ;;  %v275_v8 = vsub.f32 0.0, %v274_v63 }
 0x637   :  { %v271_v4 = vpop.f32.mrf.mxu0 }
 0x638   :  { %v276_v9 = vmul.f32 1.442695, %v275_v8  ;;  %v478_v4 = vsel %vm1483_vm10, 1, %v1825_v11  ;;  %vm1493_vm10 = vcmp.gt.s32.totalorder %v1894_v18, 9 }
 0x639   :  { %v1577_v5 = vpop.f32.mrf.mxu0 }
 0x63a   :  { %1710 = vpow2.f32 %v276_v9 }
 0x643   :  { %v1709_v6 = vpop.eup %1708 }
 0x644   :  { %284 = vrot.lane.b32.xlu0 %v1709_v6, %s1826_s18 }
 0x647   :  { %v1711_v10 = vpop.eup %1710 }
 0x648   :  { %304 = vperm.xlu0 %1689, %v302_v7   ;;  %v278_v12 = vadd.f32 1.0, %v1711_v10 }
 0x64a   :  { %1712 = vrcp.f32 %v278_v12 }
 0x657   :  { %v1713_v13 = vpop.eup %1712 }
 0x658   :  { %v282_v17 = vmul.f32 %v1713_v13, %v218_v16 }
 0x6b6   :  { %v285_v14 = vpop.permute.xlu0 %284 }
 0x6b7   :  { %v287_v15 = vmul.f32 %v1713_v13, %v285_v14 }
 0x6b9   :  { %289 = vrot.lane.b32.xlu1 %v287_v15, %s1827_s19 }
 0x6c3   :  { %v1953_v22 = vpop.permute.xlu0 %304 }
 0x6c4   :  { %vm306_vm7 = vcmp.eq.s32.totalorder %v1953_v22, 1 }
 0x72b   :  { %v290_v19 = vpop.permute.xlu1 %289 }
 0x72c   :  { %v292_v20 = vadd.f32 %v290_v19, %v282_v17 }
 0x72e   :  { %1714 = vtanh.f32 %v292_v20  ;;  %v308_v45 = vsel %vm306_vm7, %v292_v20, %v218_v16 }
 0x73b   :  { %v1715_v21 = vpop.eup %1714 }
 0x73c   :  { %295 = vrot.lane.b32.xlu1 %v1715_v21, %s1826_s18 }
 0x7ae   :  { %v296_v23 = vpop.permute.xlu1 %295 }
 0x7af   :  { %v1955_v24 = vmul.f32 %v1713_v13, %v296_v23 }
 0x7b1   :  { %v307_v25 = vsel %vm306_vm7, %v1955_v24, %v217_v58  ;;  %v402_v58 = vld [vmem:[%s2426_s1 + $0x20] sm:$0xff]  ;;  %v309_v28 = vsel %vm306_vm7, %v1955_v24, 0.0  ;;  %vm400_vm7 = vcmask 1048320  }
 0x7b2   :  { %v317_v26 = vpack.c.bf16 %v307_v25, %v307_v25 }
 0x7b4   :  { %319 = vrot.lane.b32.xlu1 %v317_v26, %s1827_s19 }
 0x826   :  { %v320_v27 = vpop.permute.xlu1 %319 }
 0x827   :  { %1583 = vmatmul.mubr.msk.bf16.vlgmr.msra.gmra.mxu1 %vm19_vm0, %v320_v27  ;;  %v491_v27 = vld [vmem:[%s2426_s1 + $0x28] sm:$0xff] }
 0x828   :  { %1595 = vmatpush3.bf16.msra.mxu1 %v1853_v1  ;;  %1598 = vmatprep.mubr.msk.bf16.mxu1 %vm1824_vm1, %v1823_v0 }
 0x829   :  { %1596 = vmatprep.subr.bf16.mxu1 %v1823_v0 }
 0x82c   :  { %1597 = vmatpush3.bf16.msra.mxu1 %v1868_v2 }
 0x82d   :  { %1610 = vmatprep.subr.bf16.mxu1 %v1823_v0 }
 0x8e7   :  { %v358_v30 = vpop.f32.mrf.mxu1 }
 0x8e8   :  { %v364_v32 = vadd.f32 %v358_v30, %v316_v29 }
 0x8e9   :  { %v1584_v33 = vpop.f32.mrf.mxu1 }
 0x8ea   :  { %1716 = vtanh.f32 %v364_v32  ;;  %v365_v38 = vsub.f32 0.0, %v364_v32 }
 0x8eb   :  { %v361_v34 = vpop.f32.mrf.mxu1 }
 0x8ec   :  { %v366_v39 = vmul.f32 1.442695, %v365_v38 }
 0x8ed   :  { %v1585_v35 = vpop.f32.mrf.mxu1 }
 0x8ee   :  { %1718 = vpow2.f32 %v366_v39 }
 0x8f7   :  { %v1717_v36 = vpop.eup %1716 }
 0x8f8   :  { %374 = vrot.lane.b32.xlu0 %v1717_v36, %s1826_s18  ;;  %v567_v36 = vsel %vm1485_vm12, 1, %v1825_v11 }
 0x8fb   :  { %v1719_v40 = vpop.eup %1718 }
 0x8fc   :  { %394 = vperm.xlu0 %1689, %v392_v37   ;;  %v368_v41 = vadd.f32 1.0, %v1719_v40 }
 0x8fe   :  { %1720 = vrcp.f32 %v368_v41 }
 0x90b   :  { %v1721_v42 = vpop.eup %1720 }
 0x90c   :  { %v372_v46 = vmul.f32 %v1721_v42, %v308_v45 }
 0x96a   :  { %v375_v43 = vpop.permute.xlu0 %374 }
 0x96b   :  { %v377_v44 = vmul.f32 %v1721_v42, %v375_v43 }
 0x96d   :  { %379 = vrot.lane.b32.xlu1 %v377_v44, %s1827_s19 }
 0x977   :  { %v1979_v50 = vpop.permute.xlu0 %394 }
 0x978   :  { %vm396_vm9 = vcmp.eq.s32.totalorder %v1979_v50, 1 }
 0x9df   :  { %v380_v47 = vpop.permute.xlu1 %379 }
 0x9e0   :  { %v382_v48 = vadd.f32 %v380_v47, %v372_v46 }
 0x9e2   :  { %1722 = vtanh.f32 %v382_v48  ;;  %v398_v13 = vsel %vm396_vm9, %v382_v48, %v308_v45 }
 0x9ef   :  { %v1723_v49 = vpop.eup %1722 }
 0x9f0   :  { %385 = vrot.lane.b32.xlu1 %v1723_v49, %s1826_s18 }
 0xa62   :  { %v386_v51 = vpop.permute.xlu1 %385 }
 0xa63   :  { %v1981_v52 = vmul.f32 %v1721_v42, %v386_v51 }
 0xa65   :  { %v397_v53 = vsel %vm396_vm9, %v1981_v52, %v307_v25 }
 0xa66   :  { %v403_v54 = vpack.c.bf16 %v397_v53, %v397_v53 }
 0xa68   :  { %405 = vrot.lane.b32.xlu0 %v403_v54, %s1827_s19 }
 0xada   :  { %v406_v56 = vpop.permute.xlu0 %405 }
 0xadb   :  { %1591 = vmatmul.mubr.msk.bf16.vlgmr.msra.gmra.mxu0 %vm19_vm0, %v406_v56 }
 0xadc   :  { %1603 = vmatpush3.bf16.msra.mxu0 %v1853_v1  ;;  %1606 = vmatprep.mubr.msk.bf16.mxu0 %vm1824_vm1, %v1823_v0 }
 0xadd   :  { %1604 = vmatprep.subr.bf16.mxu0 %v1823_v0 }
 0xae0   :  { %1605 = vmatpush3.bf16.msra.mxu0 %v1868_v2 }
 0xae1   :  { %1618 = vmatprep.subr.bf16.mxu0 %v1823_v0 }
 0xb9b   :  { %v444_v59 = vpop.f32.mrf.mxu0 }
 0xb9c   :  { %v450_v60 = vadd.f32 %v444_v59, %v402_v58  ;;  %v580_v59 = vld [vmem:[%s2426_s1 + $0x30] sm:$0xff] }
 0xb9d   :  { %v1592_v61 = vpop.f32.mrf.mxu0 }
 0xb9e   :  { %1724 = vtanh.f32 %v450_v60  ;;  %v451_v5 = vsub.f32 0.0, %v450_v60 }
 0xb9f   :  { %v447_v62 = vpop.f32.mrf.mxu0 }
 0xba0   :  { %v452_v6 = vmul.f32 1.442695, %v451_v5  ;;  %v656_v5 = vsel %vm1487_vm14, 1, %v1825_v11  ;;  %vm1495_vm14 = vcmp.gt.s32.totalorder %v1894_v18, 10 }
 0xba1   :  { %v1593_v63 = vpop.f32.mrf.mxu0 }
 0xba2   :  { %1726 = vpow2.f32 %v452_v6 }
 0xbab   :  { %v1725_v3 = vpop.eup %1724 }
 0xbac   :  { %460 = vrot.lane.b32.xlu1 %v1725_v3, %s1826_s18 }
 0xbaf   :  { %v1727_v7 = vpop.eup %1726 }
 0xbb0   :  { %480 = vperm.xlu1 %1688, %v478_v4   ;;  %v454_v8 = vadd.f32 1.0, %v1727_v7 }
 0xbb2   :  { %1728 = vrcp.f32 %v454_v8 }
 0xbbf   :  { %v1729_v9 = vpop.eup %1728 }
 0xbc0   :  { %v458_v14 = vmul.f32 %v1729_v9, %v398_v13 }
 0xc1e   :  { %v461_v10 = vpop.permute.xlu1 %460 }
 0xc1f   :  { %v463_v12 = vmul.f32 %v1729_v9, %v461_v10 }
 0xc21   :  { %465 = vrot.lane.b32.xlu0 %v463_v12, %s1827_s19 }
 0xc2b   :  { %v2005_v19 = vpop.permute.xlu1 %480 }
 0xc2c   :  { %vm482_vm11 = vcmp.eq.s32.totalorder %v2005_v19, 1 }
 0xc93   :  { %v466_v15 = vpop.permute.xlu0 %465 }
 0xc94   :  { %v468_v16 = vadd.f32 %v466_v15, %v458_v14 }
 0xc96   :  { %1730 = vtanh.f32 %v468_v16  ;;  %v484_v44 = vsel %vm482_vm11, %v468_v16, %v398_v13 }
 0xca3   :  { %v1731_v17 = vpop.eup %1730 }
 0xca4   :  { %471 = vrot.lane.b32.xlu0 %v1731_v17, %s1826_s18 }
 0xd16   :  { %v472_v20 = vpop.permute.xlu0 %471 }
 0xd17   :  { %v2007_v21 = vmul.f32 %v1729_v9, %v472_v20 }
 0xd19   :  { %v483_v23 = vsel %vm482_vm11, %v2007_v21, %v397_v53 }
 0xd1a   :  { %v492_v25 = vpack.c.bf16 %v483_v23, %v483_v23 }
 0xd1c   :  { %494 = vrot.lane.b32.xlu1 %v492_v25, %s1827_s19 }
 0xd8e   :  { %v495_v26 = vpop.permute.xlu1 %494 }
 0xd8f   :  { %1599 = vmatmul.mubr.msk.bf16.vlgmr.msra.gmra.mxu1 %vm19_vm0, %v495_v26 }
 0xd90   :  { %1611 = vmatpush3.bf16.msra.mxu1 %v1853_v1  ;;  %1614 = vmatprep.mubr.msk.bf16.mxu1 %vm1824_vm1, %v1823_v0 }
 0xd91   :  { %1612 = vmatprep.subr.bf16.mxu1 %v1823_v0 }
 0xd94   :  { %1613 = vmatpush3.bf16.msra.mxu1 %v1868_v2 }
 0xd95   :  { %1626 = vmatprep.subr.bf16.mxu1 %v1823_v0 }
 0xe4f   :  { %v533_v29 = vpop.f32.mrf.mxu1 }
 0xe50   :  { %v539_v30 = vadd.f32 %v533_v29, %v491_v27 }
 0xe51   :  { %v1600_v32 = vpop.f32.mrf.mxu1 }
 0xe52   :  { %1732 = vtanh.f32 %v539_v30  ;;  %v540_v37 = vsub.f32 0.0, %v539_v30  ;;  %v669_v32 = vld [vmem:[%s2426_s1 + $0x38] sm:$0xff] }
 0xe53   :  { %v536_v33 = vpop.f32.mrf.mxu1 }
 0xe54   :  { %v541_v38 = vmul.f32 1.442695, %v540_v37 }
 0xe55   :  { %v1601_v34 = vpop.f32.mrf.mxu1 }
 0xe56   :  { %1734 = vpow2.f32 %v541_v38 }
 0xe5f   :  { %v1733_v35 = vpop.eup %1732 }
 0xe60   :  { %549 = vrot.lane.b32.xlu0 %v1733_v35, %s1826_s18 }
 0xe63   :  { %v1735_v39 = vpop.eup %1734 }
 0xe64   :  { %569 = vperm.xlu0 %1689, %v567_v36   ;;  %v543_v40 = vadd.f32 1.0, %v1735_v39  ;;  %v745_v39 = vsel %vm1489_vm2, 1, %v1825_v11 }
 0xe66   :  { %1736 = vrcp.f32 %v543_v40 }
 0xe73   :  { %v1737_v41 = vpop.eup %1736 }
 0xe74   :  { %v547_v45 = vmul.f32 %v1737_v41, %v484_v44 }
 0xed2   :  { %v550_v42 = vpop.permute.xlu0 %549 }
 0xed3   :  { %v552_v43 = vmul.f32 %v1737_v41, %v550_v42 }
 0xed5   :  { %554 = vrot.lane.b32.xlu1 %v552_v43, %s1827_s19 }
 0xedf   :  { %v2031_v49 = vpop.permute.xlu0 %569 }
 0xee0   :  { %vm571_vm13 = vcmp.eq.s32.totalorder %v2031_v49, 1 }
 0xf47   :  { %v555_v46 = vpop.permute.xlu1 %554 }
 0xf48   :  { %v557_v47 = vadd.f32 %v555_v46, %v547_v45 }
 0xf4a   :  { %1738 = vtanh.f32 %v557_v47  ;;  %v573_v14 = vsel %vm571_vm13, %v557_v47, %v484_v44 }
 0xf57   :  { %v1739_v48 = vpop.eup %1738 }
 0xf58   :  { %560 = vrot.lane.b32.xlu1 %v1739_v48, %s1826_s18 }
 0xfca   :  { %v561_v51 = vpop.permute.xlu1 %560 }
 0xfcb   :  { %v2033_v53 = vmul.f32 %v1737_v41, %v561_v51 }
 0xfcd   :  { %v572_v54 = vsel %vm571_vm13, %v2033_v53, %v483_v23 }
 0xfce   :  { %v581_v56 = vpack.c.bf16 %v572_v54, %v572_v54 }
 0xfd0   :  { %583 = vrot.lane.b32.xlu0 %v581_v56, %s1827_s19 }
0x1042   :  { %v584_v58 = vpop.permute.xlu0 %583 }
0x1043   :  { %1607 = vmatmul.mubr.msk.bf16.vlgmr.msra.gmra.mxu0 %vm19_vm0, %v584_v58 }
0x1044   :  { %1619 = vmatpush3.bf16.msra.mxu0 %v1853_v1  ;;  %1622 = vmatprep.mubr.msk.bf16.mxu0 %vm1824_vm1, %v1823_v0 }
0x1045   :  { %1620 = vmatprep.subr.bf16.mxu0 %v1823_v0 }
0x1048   :  { %1621 = vmatpush3.bf16.msra.mxu0 %v1868_v2 }
0x1049   :  { %1634 = vmatprep.subr.bf16.mxu0 %v1823_v0 }
0x1103   :  { %v622_v60 = vpop.f32.mrf.mxu0 }
0x1104   :  { %v628_v61 = vadd.f32 %v622_v60, %v580_v59 }
0x1105   :  { %v1608_v62 = vpop.f32.mrf.mxu0 }
0x1106   :  { %1740 = vtanh.f32 %v628_v61  ;;  %v629_v6 = vsub.f32 0.0, %v628_v61 }
0x1107   :  { %v625_v63 = vpop.f32.mrf.mxu0 }
0x1108   :  { %v630_v7 = vmul.f32 1.442695, %v629_v6 }
0x1109   :  { %v1609_v3 = vpop.f32.mrf.mxu0 }
0x110a   :  { %1742 = vpow2.f32 %v630_v7  ;;  %v754_v3 = vld [vmem:[%s2426_s1 + $0x40] sm:$0xff] }
0x1113   :  { %v1741_v4 = vpop.eup %1740 }
0x1114   :  { %638 = vrot.lane.b32.xlu1 %v1741_v4, %s1826_s18 }
0x1117   :  { %v1743_v8 = vpop.eup %1742 }
0x1118   :  { %658 = vperm.xlu1 %1688, %v656_v5   ;;  %v632_v9 = vadd.f32 1.0, %v1743_v8 }
0x111a   :  { %1744 = vrcp.f32 %v632_v9 }
0x1127   :  { %v1745_v10 = vpop.eup %1744 }
0x1128   :  { %v636_v15 = vmul.f32 %v1745_v10, %v573_v14 }
0x1186   :  { %v639_v12 = vpop.permute.xlu1 %638 }
0x1187   :  { %v641_v13 = vmul.f32 %v1745_v10, %v639_v12 }
0x1189   :  { %643 = vrot.lane.b32.xlu0 %v641_v13, %s1827_s19 }
0x1193   :  { %v2057_v23 = vpop.permute.xlu1 %658 }
0x1194   :  { %vm660_vm15 = vcmp.eq.s32.totalorder %v2057_v23, 1 }
0x11fb   :  { %v644_v16 = vpop.permute.xlu0 %643 }
0x11fc   :  { %v646_v17 = vadd.f32 %v644_v16, %v636_v15 }
0x11fe   :  { %1746 = vtanh.f32 %v646_v17  ;;  %v662_v47 = vsel %vm660_vm15, %v646_v17, %v573_v14 }
0x120b   :  { %v1747_v20 = vpop.eup %1746 }
0x120c   :  { %649 = vrot.lane.b32.xlu0 %v1747_v20, %s1826_s18 }
0x127e   :  { %v650_v25 = vpop.permute.xlu0 %649 }
0x127f   :  { %v2059_v26 = vmul.f32 %v1745_v10, %v650_v25  ;;  %v830_v10 = vsel %vm1491_vm6, 1, %v1825_v11  ;;  %vm1497_vm6 = vcmp.gt.s32.totalorder %v1894_v18, 11 }
0x1281   :  { %v661_v27 = vsel %vm660_vm15, %v2059_v26, %v572_v54  ;;  %v663_v19 = vsel %vm660_vm15, %v2059_v26, 0.0 }
0x1282   :  { %v670_v29 = vpack.c.bf16 %v661_v27, %v661_v27 }
0x1284   :  { %672 = vrot.lane.b32.xlu1 %v670_v29, %s1827_s19 }
0x12f6   :  { %v673_v30 = vpop.permute.xlu1 %672 }
0x12f7   :  { %1615 = vmatmul.mubr.msk.bf16.vlgmr.msra.gmra.mxu1 %vm19_vm0, %v673_v30 }
0x12f8   :  { %1627 = vmatpush3.bf16.msra.mxu1 %v1853_v1  ;;  %1630 = vmatprep.mubr.msk.bf16.mxu1 %vm1824_vm1, %v1823_v0 }
0x12f9   :  { %1628 = vmatprep.subr.bf16.mxu1 %v1823_v0 }
0x12fc   :  { %1629 = vmatpush3.bf16.msra.mxu1 %v1868_v2 }
0x12fd   :  { %1642 = vmatprep.subr.bf16.mxu1 %v1823_v0 }
0x13b7   :  { %v711_v33 = vpop.f32.mrf.mxu1 }
0x13b8   :  { %v717_v34 = vadd.f32 %v711_v33, %v669_v32 }
0x13b9   :  { %v1616_v35 = vpop.f32.mrf.mxu1 }
0x13ba   :  { %1748 = vtanh.f32 %v717_v34  ;;  %v718_v40 = vsub.f32 0.0, %v717_v34 }
0x13bb   :  { %v714_v36 = vpop.f32.mrf.mxu1 }
0x13bc   :  { %v719_v41 = vmul.f32 1.442695, %v718_v40 }
0x13bd   :  { %v1617_v37 = vpop.f32.mrf.mxu1 }
0x13be   :  { %1750 = vpow2.f32 %v719_v41 }
0x13c7   :  { %v1749_v38 = vpop.eup %1748 }
0x13c8   :  { %727 = vrot.lane.b32.xlu0 %v1749_v38, %s1826_s18 }
0x13cb   :  { %v1751_v42 = vpop.eup %1750 }
0x13cc   :  { %747 = vperm.xlu0 %1689, %v745_v39   ;;  %v721_v43 = vadd.f32 1.0, %v1751_v42  ;;  %v843_v39 = vld [vmem:[%s2426_s1 + $0x48] sm:$0xff] }
0x13ce   :  { %1752 = vrcp.f32 %v721_v43 }
0x13db   :  { %v1753_v44 = vpop.eup %1752 }
0x13dc   :  { %v725_v48 = vmul.f32 %v1753_v44, %v662_v47 }
0x143a   :  { %v728_v45 = vpop.permute.xlu0 %727 }
0x143b   :  { %v730_v46 = vmul.f32 %v1753_v44, %v728_v45 }
0x143d   :  { %732 = vrot.lane.b32.xlu1 %v730_v46, %s1827_s19  ;;  %v919_v46 = vsel %vm1493_vm10, 1, %v1825_v11 }
0x1447   :  { %v2083_v58 = vpop.permute.xlu0 %747 }
0x1448   :  { %vm2429_vm4 = vcmp.eq.s32.totalorder %v2083_v58, 1 }
0x14af   :  { %v733_v51 = vpop.permute.xlu1 %732 }
0x14b0   :  { %v735_v54 = vadd.f32 %v733_v51, %v725_v48 }
0x14b2   :  { %1754 = vtanh.f32 %v735_v54  ;;  %v751_v25 = vsel %vm2429_vm4, %v735_v54, %v662_v47 }
0x14bf   :  { %v1755_v56 = vpop.eup %1754 }
0x14c0   :  { %738 = vrot.lane.b32.xlu1 %v1755_v56, %s1826_s18 }
0x1532   :  { %v739_v59 = vpop.permute.xlu1 %738 }
0x1533   :  { %v2085_v60 = vmul.f32 %v1753_v44, %v739_v59 }
0x1535   :  { %v750_v61 = vsel %vm2429_vm4, %v2085_v60, %v661_v27 }
0x1536   :  { %v755_v62 = vpack.c.bf16 %v750_v61, %v750_v61 }
0x1538   :  { %757 = vrot.lane.b32.xlu0 %v755_v62, %s1827_s19 }
0x15aa   :  { %v758_v63 = vpop.permute.xlu0 %757 }
0x15ab   :  { %1623 = vmatmul.mubr.msk.bf16.vlgmr.msra.gmra.mxu0 %vm19_vm0, %v758_v63 }
0x15ac   :  { %1635 = vmatpush3.bf16.msra.mxu0 %v1853_v1  ;;  %1638 = vmatprep.mubr.msk.bf16.mxu0 %vm1824_vm1, %v1823_v0 }
0x15ad   :  { %1636 = vmatprep.subr.bf16.mxu0 %v1823_v0 }
0x15b0   :  { %1637 = vmatpush3.bf16.msra.mxu0 %v1868_v2 }
0x15b1   :  { %1650 = vmatprep.subr.bf16.mxu0 %v1823_v0 }
0x166b   :  { %v796_v4 = vpop.f32.mrf.mxu0 }
0x166c   :  { %v802_v5 = vadd.f32 %v796_v4, %v754_v3 }
0x166d   :  { %v1624_v6 = vpop.f32.mrf.mxu0 }
0x166e   :  { %1756 = vtanh.f32 %v802_v5  ;;  %v803_v12 = vsub.f32 0.0, %v802_v5 }
0x166f   :  { %v799_v7 = vpop.f32.mrf.mxu0 }
0x1670   :  { %v804_v13 = vmul.f32 1.442695, %v803_v12 }
0x1671   :  { %v1625_v8 = vpop.f32.mrf.mxu0 }
0x1672   :  { %1758 = vpow2.f32 %v804_v13  ;;  %v932_v13 = vld [vmem:[%s2426_s1 + $0x50] sm:$0xff] }
0x167b   :  { %v1757_v9 = vpop.eup %1756 }
0x167c   :  { %812 = vrot.lane.b32.xlu1 %v1757_v9, %s1826_s18 }
0x167f   :  { %v1759_v14 = vpop.eup %1758 }
0x1680   :  { %832 = vperm.xlu1 %1688, %v830_v10   ;;  %v806_v15 = vadd.f32 1.0, %v1759_v14 }
0x1682   :  { %1760 = vrcp.f32 %v806_v15 }
0x168f   :  { %v1761_v16 = vpop.eup %1760 }
0x1690   :  { %v810_v27 = vmul.f32 %v1761_v16, %v751_v25 }
0x16ee   :  { %v813_v17 = vpop.permute.xlu1 %812 }
0x16ef   :  { %v815_v20 = vmul.f32 %v1761_v16, %v813_v17 }
0x16f1   :  { %817 = vrot.lane.b32.xlu0 %v815_v20, %s1827_s19 }
0x16fb   :  { %v2109_v33 = vpop.permute.xlu1 %832 }
0x16fc   :  { %vm834_vm8 = vcmp.eq.s32.totalorder %v2109_v33, 1 }
0x1763   :  { %v818_v29 = vpop.permute.xlu0 %817 }
0x1764   :  { %v820_v30 = vadd.f32 %v818_v29, %v810_v27  ;;  %v1008_v27 = vsel %vm1495_vm14, 1, %v1825_v11  ;;  %vm1499_vm14 = vcmp.gt.s32.totalorder %v1894_v18, 12 }
0x1766   :  { %1762 = vtanh.f32 %v820_v30  ;;  %v836_v62 = vsel %vm834_vm8, %v820_v30, %v751_v25 }
0x1773   :  { %v1763_v32 = vpop.eup %1762 }
0x1774   :  { %823 = vrot.lane.b32.xlu0 %v1763_v32, %s1826_s18 }
0x17e6   :  { %v824_v34 = vpop.permute.xlu0 %823 }
0x17e7   :  { %v2111_v35 = vmul.f32 %v1761_v16, %v824_v34 }
0x17e9   :  { %v835_v36 = vsel %vm834_vm8, %v2111_v35, %v750_v61 }
0x17ea   :  { %v844_v37 = vpack.c.bf16 %v835_v36, %v835_v36 }
0x17ec   :  { %846 = vrot.lane.b32.xlu1 %v844_v37, %s1827_s19 }
0x185e   :  { %v847_v38 = vpop.permute.xlu1 %846 }
0x185f   :  { %1631 = vmatmul.mubr.msk.bf16.vlgmr.msra.gmra.mxu1 %vm19_vm0, %v847_v38 }
0x1860   :  { %1643 = vmatpush3.bf16.msra.mxu1 %v1853_v1  ;;  %1646 = vmatprep.mubr.msk.bf16.mxu1 %vm1824_vm1, %v1823_v0 }
0x1861   :  { %1644 = vmatprep.subr.bf16.mxu1 %v1823_v0 }
0x1864   :  { %1645 = vmatpush3.bf16.msra.mxu1 %v1868_v2 }
0x1865   :  { %1658 = vmatprep.subr.bf16.mxu1 %v1823_v0 }
0x191f   :  { %v885_v40 = vpop.f32.mrf.mxu1 }
0x1920   :  { %v891_v41 = vadd.f32 %v885_v40, %v843_v39 }
0x1921   :  { %v1632_v42 = vpop.f32.mrf.mxu1 }
0x1922   :  { %1764 = vtanh.f32 %v891_v41  ;;  %v892_v47 = vsub.f32 0.0, %v891_v41 }
0x1923   :  { %v888_v43 = vpop.f32.mrf.mxu1 }
0x1924   :  { %v893_v48 = vmul.f32 1.442695, %v892_v47 }
0x1925   :  { %v1633_v44 = vpop.f32.mrf.mxu1 }
0x1926   :  { %1766 = vpow2.f32 %v893_v48 }
0x192f   :  { %v1765_v45 = vpop.eup %1764 }
0x1930   :  { %901 = vrot.lane.b32.xlu0 %v1765_v45, %s1826_s18 }
0x1933   :  { %v1767_v51 = vpop.eup %1766 }
0x1934   :  { %921 = vperm.xlu0 %1689, %v919_v46   ;;  %v895_v54 = vadd.f32 1.0, %v1767_v51 }
0x1936   :  { %1768 = vrcp.f32 %v895_v54  ;;  %v1021_v54 = vld [vmem:[%s2426_s1 + $0x58] sm:$0xff] }
0x1943   :  { %v1769_v56 = vpop.eup %1768 }
0x1944   :  { %v899_v63 = vmul.f32 %v1769_v56, %v836_v62 }
0x19a2   :  { %v902_v59 = vpop.permute.xlu0 %901 }
0x19a3   :  { %v904_v61 = vmul.f32 %v1769_v56, %v902_v59 }
0x19a5   :  { %906 = vrot.lane.b32.xlu1 %v904_v61, %s1827_s19 }
0x19af   :  { %v2135_v6 = vpop.permute.xlu0 %921 }
0x19b0   :  { %vm923_vm12 = vcmp.eq.s32.totalorder %v2135_v6, 1 }
0x1a17   :  { %v907_v3 = vpop.permute.xlu1 %906 }
0x1a18   :  { %v909_v4 = vadd.f32 %v907_v3, %v899_v63  ;;  %v1097_v3 = vsel %vm1497_vm6, 1, %v1825_v11 }
0x1a1a   :  { %1770 = vtanh.f32 %v909_v4  ;;  %v925_v39 = vsel %vm923_vm12, %v909_v4, %v836_v62 }
0x1a27   :  { %v1771_v5 = vpop.eup %1770 }
0x1a28   :  { %912 = vrot.lane.b32.xlu1 %v1771_v5, %s1826_s18 }
0x1a9a   :  { %v913_v7 = vpop.permute.xlu1 %912 }
0x1a9b   :  { %v2137_v8 = vmul.f32 %v1769_v56, %v913_v7 }
0x1a9d   :  { %v924_v9 = vsel %vm923_vm12, %v2137_v8, %v835_v36 }
0x1a9e   :  { %v933_v10 = vpack.c.bf16 %v924_v9, %v924_v9 }
0x1aa0   :  { %935 = vrot.lane.b32.xlu0 %v933_v10, %s1827_s19 }
0x1b12   :  { %v936_v12 = vpop.permute.xlu0 %935 }
0x1b13   :  { %1639 = vmatmul.mubr.msk.bf16.vlgmr.msra.gmra.mxu0 %vm19_vm0, %v936_v12 }
0x1b14   :  { %1651 = vmatpush3.bf16.msra.mxu0 %v1853_v1  ;;  %1654 = vmatprep.mubr.msk.bf16.mxu0 %vm1824_vm1, %v1823_v0 }
0x1b15   :  { %1652 = vmatprep.subr.bf16.mxu0 %v1823_v0 }
0x1b18   :  { %1653 = vmatpush3.bf16.msra.mxu0 %v1868_v2 }
0x1b19   :  { %1666 = vmatprep.subr.bf16.mxu0 %v1823_v0 }
0x1bd3   :  { %v974_v14 = vpop.f32.mrf.mxu0 }
0x1bd4   :  { %v980_v15 = vadd.f32 %v974_v14, %v932_v13 }
0x1bd5   :  { %v1640_v16 = vpop.f32.mrf.mxu0 }
0x1bd6   :  { %1772 = vtanh.f32 %v980_v15  ;;  %v981_v29 = vsub.f32 0.0, %v980_v15 }
0x1bd7   :  { %v977_v17 = vpop.f32.mrf.mxu0 }
0x1bd8   :  { %v982_v30 = vmul.f32 1.442695, %v981_v29 }
0x1bd9   :  { %v1641_v20 = vpop.f32.mrf.mxu0 }
0x1bda   :  { %1774 = vpow2.f32 %v982_v30 }
0x1be3   :  { %v1773_v25 = vpop.eup %1772 }
0x1be4   :  { %990 = vrot.lane.b32.xlu1 %v1773_v25, %s1826_s18 }
0x1be7   :  { %v1775_v32 = vpop.eup %1774 }
0x1be8   :  { %1010 = vperm.xlu1 %1688, %v1008_v27   ;;  %v984_v34 = vadd.f32 1.0, %v1775_v32 }
0x1bea   :  { %1776 = vrcp.f32 %v984_v34  ;;  %v1820_v34 = vld [vmem:[%s2425_s2 + $0x8] sm:$0xff]  }
0x1bf7   :  { %v1777_v36 = vpop.eup %1776 }
0x1bf8   :  { %v988_v40 = vmul.f32 %v1777_v36, %v925_v39 }
0x1c56   :  { %v991_v37 = vpop.permute.xlu1 %990 }
0x1c57   :  { %v993_v38 = vmul.f32 %v1777_v36, %v991_v37  ;;  %v1106_v37 = vld [vmem:[%s2426_s1 + $0x60] sm:$0xff] }
0x1c59   :  { %995 = vrot.lane.b32.xlu0 %v993_v38, %s1827_s19 }
0x1c63   :  { %v2161_v44 = vpop.permute.xlu1 %1010 }
0x1c64   :  { %vm1012_vm2 = vcmp.eq.s32.totalorder %v2161_v44, 1 }
0x1ccb   :  { %v996_v41 = vpop.permute.xlu0 %995 }
0x1ccc   :  { %v998_v42 = vadd.f32 %v996_v41, %v988_v40 }
0x1cce   :  { %1778 = vtanh.f32 %v998_v42  ;;  %v1014_v13 = vsel %vm1012_vm2, %v998_v42, %v925_v39 }
0x1cdb   :  { %v1779_v43 = vpop.eup %1778 }
0x1cdc   :  { %1001 = vrot.lane.b32.xlu0 %v1779_v43, %s1826_s18 }
0x1d4e   :  { %v1002_v45 = vpop.permute.xlu0 %1001 }
0x1d4f   :  { %v2163_v46 = vmul.f32 %v1777_v36, %v1002_v45  ;;  %v1821_v36 = vld [vmem:[%s2425_s2] sm:$0xff]   ;;  %v1182_v45 = vsel %vm1499_vm14, 1, %v1825_v11 }
0x1d51   :  { %v1013_v47 = vsel %vm1012_vm2, %v2163_v46, %v924_v9 }
0x1d52   :  { %v1022_v48 = vpack.c.bf16 %v1013_v47, %v1013_v47 }
0x1d54   :  { %1024 = vrot.lane.b32.xlu1 %v1022_v48, %s1827_s19 }
0x1dc6   :  { %v1025_v51 = vpop.permute.xlu1 %1024 }
0x1dc7   :  { %1647 = vmatmul.mubr.msk.bf16.vlgmr.msra.gmra.mxu1 %vm19_vm0, %v1025_v51 }
0x1dc8   :  { %1659 = vmatpush3.bf16.msra.mxu1 %v1853_v1  ;;  %1662 = vmatprep.mubr.msk.bf16.mxu1 %vm1824_vm1, %v1823_v0 }
0x1dc9   :  { %1660 = vmatprep.subr.bf16.mxu1 %v1823_v0 }
0x1dcc   :  { %1661 = vmatpush3.bf16.msra.mxu1 %v1868_v2 }
0x1dcd   :  { %1674 = vmatprep.subr.bf16.mxu1 %v1823_v0 }
0x1e87   :  { %v1063_v56 = vpop.f32.mrf.mxu1 }
0x1e88   :  { %v1069_v59 = vadd.f32 %v1063_v56, %v1021_v54 }
0x1e89   :  { %v1648_v61 = vpop.f32.mrf.mxu1 }
0x1e8a   :  { %1780 = vtanh.f32 %v1069_v59  ;;  %v1070_v2 = vsub.f32 0.0, %v1069_v59 }
0x1e8b   :  { %v1066_v62 = vpop.f32.mrf.mxu1 }
0x1e8c   :  { %v1071_v4 = vmul.f32 1.442695, %v1070_v2 }
0x1e8d   :  { %v1649_v63 = vpop.f32.mrf.mxu1 }
0x1e8e   :  { %1782 = vpow2.f32 %v1071_v4 }
0x1e97   :  { %v1781_v1 = vpop.eup %1780 }
0x1e98   :  { %1079 = vrot.lane.b32.xlu0 %v1781_v1, %s1826_s18 }
0x1e9b   :  { %v1783_v5 = vpop.eup %1782 }
0x1e9c   :  { %1099 = vperm.xlu0 %1689, %v1097_v3   ;;  %v1073_v7 = vadd.f32 1.0, %v1783_v5 }
0x1e9e   :  { %1784 = vrcp.f32 %v1073_v7 }
0x1eab   :  { %v1785_v9 = vpop.eup %1784 }
0x1eac   :  { %v1077_v14 = vmul.f32 %v1785_v9, %v1014_v13 }
0x1f0a   :  { %v1080_v10 = vpop.permute.xlu0 %1079 }
0x1f0b   :  { %v1082_v12 = vmul.f32 %v1785_v9, %v1080_v10 }
0x1f0d   :  { %1084 = vrot.lane.b32.xlu1 %v1082_v12, %s1827_s19  ;;  %v1195_v12 = vld [vmem:[%s2426_s1 + $0x68] sm:$0xff] }
0x1f17   :  { %v2187_v20 = vpop.permute.xlu0 %1099 }
0x1f18   :  { %vm1101_vm10 = vcmp.eq.s32.totalorder %v2187_v20, 1 }
0x1f7f   :  { %v1085_v15 = vpop.permute.xlu1 %1084 }
0x1f80   :  { %v1087_v16 = vadd.f32 %v1085_v15, %v1077_v14 }
0x1f82   :  { %1786 = vtanh.f32 %v1087_v16  ;;  %v1103_v18 = vsel %vm1101_vm10, %v1087_v16, %v1014_v13 }
0x1f8f   :  { %v1787_v17 = vpop.eup %1786 }
0x1f90   :  { %1090 = vrot.lane.b32.xlu1 %v1787_v17, %s1826_s18 }
0x2002   :  { %v1091_v25 = vpop.permute.xlu1 %1090 }
0x2003   :  { %v2189_v27 = vmul.f32 %v1785_v9, %v1091_v25  ;;  %v2235_v25 = vld [vmem:[%s2427_s0] sm:$0xff] }
0x2004   :  { %vm1505_vm4 = vcmp.gt.s32.totalorder %v2235_v25, 15 }
0x2005   :  { %v1102_v29 = vsel %vm1101_vm10, %v2189_v27, %v1013_v47 }
0x2006   :  { %v1107_v30 = vpack.c.bf16 %v1102_v29, %v1102_v29 }
0x2008   :  { %1109 = vrot.lane.b32.xlu0 %v1107_v30, %s1827_s19 }
0x207a   :  { %v1110_v32 = vpop.permute.xlu0 %1109 }
0x207b   :  { %1655 = vmatmul.mubr.msk.bf16.vlgmr.msra.gmra.mxu0 %vm19_vm0, %v1110_v32 }
0x207c   :  { %1667 = vmatpush3.bf16.msra.mxu0 %v1820_v34  ;;  %1670 = vmatprep.mubr.msk.bf16.mxu0 %vm1824_vm1, %v1823_v0 }
0x207d   :  { %1668 = vmatprep.subr.bf16.mxu0 %v1823_v0 }
0x2080   :  { %1669 = vmatpush3.bf16.msra.mxu0 %v1821_v36 }
0x213b   :  { %v1148_v38 = vpop.f32.mrf.mxu0 }
0x213c   :  { %v1154_v39 = vadd.f32 %v1148_v38, %v1106_v37 }
0x213d   :  { %v1656_v40 = vpop.f32.mrf.mxu0 }
0x213e   :  { %1788 = vtanh.f32 %v1154_v39  ;;  %v1155_v47 = vsub.f32 0.0, %v1154_v39 }
0x213f   :  { %v1151_v41 = vpop.f32.mrf.mxu0 }
0x2140   :  { %v1156_v48 = vmul.f32 1.442695, %v1155_v47 }
0x2141   :  { %v1657_v42 = vpop.f32.mrf.mxu0 }
0x2142   :  { %1790 = vpow2.f32 %v1156_v48 }
0x214b   :  { %v1789_v43 = vpop.eup %1788 }
0x214c   :  { %1164 = vrot.lane.b32.xlu1 %v1789_v43, %s1826_s18 }
0x214f   :  { %v1791_v51 = vpop.eup %1790 }
0x2150   :  { %1184 = vperm.xlu1 %1688, %v1182_v45   ;;  %v1158_v54 = vadd.f32 1.0, %v1791_v51 }
0x2152   :  { %1792 = vrcp.f32 %v1158_v54 }
0x215f   :  { %v1793_v56 = vpop.eup %1792 }
0x2160   :  { %v1162_v62 = vmul.f32 %v1793_v56, %v1103_v18 }
0x21be   :  { %v1165_v59 = vpop.permute.xlu1 %1164 }
0x21bf   :  { %v1167_v61 = vmul.f32 %v1793_v56, %v1165_v59 }
0x21c1   :  { %1169 = vrot.lane.b32.xlu0 %v1167_v61, %s1827_s19  ;;  %v1284_v61 = vld [vmem:[%s2426_s1 + $0x70] sm:$0xff] }
0x21cb   :  { %v2216_v2 = vpop.permute.xlu1 %1184 }
0x21cc   :  { %vm1186_vm6 = vcmp.eq.s32.totalorder %v2216_v2, 1 }
0x2233   :  { %v1170_v63 = vpop.permute.xlu0 %1169 }
0x2234   :  { %v1172_v1 = vadd.f32 %v1170_v63, %v1162_v62 }
0x2236   :  { %1794 = vtanh.f32 %v1172_v1  ;;  %v1188_v40 = vsel %vm1186_vm6, %v1172_v1, %v1103_v18 }
0x2243   :  { %v1795_v3 = vpop.eup %1794 }
0x2244   :  { %1175 = vrot.lane.b32.xlu0 %v1795_v3, %s1826_s18 }
0x22b6   :  { %v1176_v4 = vpop.permute.xlu0 %1175 }
0x22b7   :  { %v2218_v5 = vmul.f32 %v1793_v56, %v1176_v4 }
0x22b9   :  { %v1187_v7 = vsel %vm1186_vm6, %v2218_v5, %v1102_v29 }
0x22ba   :  { %v1196_v9 = vpack.c.bf16 %v1187_v7, %v1187_v7 }
0x22bc   :  { %1198 = vrot.lane.b32.xlu1 %v1196_v9, %s1827_s19 }
0x232e   :  { %v1199_v10 = vpop.permute.xlu1 %1198 }
0x232f   :  { %1663 = vmatmul.mubr.msk.bf16.vlgmr.msra.gmra.mxu1 %vm19_vm0, %v1199_v10 }
0x2330   :  { %1675 = vmatpush3.bf16.msra.mxu1 %v1820_v34  ;;  %1678 = vmatprep.mubr.msk.bf16.mxu1 %vm1824_vm1, %v1823_v0  ;;  %vm1501_vm1 = vcmp.gt.s32.totalorder %v2235_v25, 13 }
0x2331   :  { %1676 = vmatprep.subr.bf16.mxu1 %v1823_v0  ;;  %v1271_v0 = vsel %vm1501_vm1, 1, %v1825_v11  ;;  %vm1503_vm1 = vcmp.gt.s32.totalorder %v2235_v25, 14  ;;  %v219_v25 = vsel %vm216_vm5, %v1929_v57, 0.0  ;;  %vm314_vm5 = vcmask 785920  }
0x2334   :  { %1677 = vmatpush3.bf16.msra.mxu1 %v1821_v36 }
0x23ef   :  { %v1237_v13 = vpop.f32.mrf.mxu1 }
0x23f0   :  { %v1243_v14 = vadd.f32 %v1237_v13, %v1195_v12 }
0x23f1   :  { %v1664_v15 = vpop.f32.mrf.mxu1 }
0x23f2   :  { %1796 = vtanh.f32 %v1243_v14  ;;  %v1244_v30 = vsub.f32 0.0, %v1243_v14 }
0x23f3   :  { %v1240_v16 = vpop.f32.mrf.mxu1 }
0x23f4   :  { %v1245_v32 = vmul.f32 1.442695, %v1244_v30 }
0x23f5   :  { %v1665_v17 = vpop.f32.mrf.mxu1 }
0x23f6   :  { %1798 = vpow2.f32 %v1245_v32 }
0x23ff   :  { %v1797_v29 = vpop.eup %1796 }
0x2400   :  { %1253 = vrot.lane.b32.xlu0 %v1797_v29, %s1826_s18 }
0x2403   :  { %v1799_v34 = vpop.eup %1798 }
0x2404   :  { %1273 = vperm.xlu0 %1689, %v1271_v0   ;;  %v1247_v36 = vadd.f32 1.0, %v1799_v34 }
0x2406   :  { %1800 = vrcp.f32 %v1247_v36 }
0x2413   :  { %v1801_v37 = vpop.eup %1800 }
0x2414   :  { %v1251_v41 = vmul.f32 %v1801_v37, %v1188_v40 }
0x2472   :  { %v1254_v38 = vpop.permute.xlu0 %1253 }
0x2473   :  { %v1256_v39 = vmul.f32 %v1801_v37, %v1254_v38 }
0x2475   :  { %1258 = vrot.lane.b32.xlu1 %v1256_v39, %s1827_s19 }
0x247f   :  { %v2244_v47 = vpop.permute.xlu0 %1273 }
0x2480   :  { %vm1275_vm14 = vcmp.eq.s32.totalorder %v2244_v47, 1 }
0x24e7   :  { %v1259_v42 = vpop.permute.xlu1 %1258 }
0x24e8   :  { %v1261_v43 = vadd.f32 %v1259_v42, %v1251_v41  ;;  %v1373_v41 = vld [vmem:[%s2426_s1 + $0x78] sm:$0xff] }
0x24ea   :  { %1802 = vtanh.f32 %v1261_v43  ;;  %v2263_v17 = vsel %vm1275_vm14, %v1261_v43, %v1188_v40 }
0x24f7   :  { %v1803_v45 = vpop.eup %1802 }
0x24f8   :  { %1264 = vrot.lane.b32.xlu1 %v1803_v45, %s1826_s18 }
0x256a   :  { %v1265_v48 = vpop.permute.xlu1 %1264 }
0x256b   :  { %v2246_v51 = vmul.f32 %v1801_v37, %v1265_v48 }
0x256d   :  { %v1276_v54 = vsel %vm1275_vm14, %v2246_v51, %v1187_v7  ;;  %v1360_v7 = vsel %vm1503_vm1, 1, %v1825_v11 }
0x256e   :  { %v1285_v56 = vpack.c.bf16 %v1276_v54, %v1276_v54 }
0x2570   :  { %1287 = vrot.lane.b32.xlu0 %v1285_v56, %s1827_s19 }
0x25e2   :  { %v1288_v59 = vpop.permute.xlu0 %1287 }
0x25e3   :  { %1671 = vmatmul.mubr.msk.bf16.vlgmr.msra.gmra.mxu0 %vm19_vm0, %v1288_v59  ;;  %v1449_v59 = vsel %vm1505_vm4, 1, %v1825_v11  ;;  %v926_v11 = vsel %vm923_vm12, %v2137_v8, 0.0 }
0x26a3   :  { %v1326_v18 = vpop.f32.mrf.mxu0 }
0x26a4   :  { %v1332_v62 = vadd.f32 %v1326_v18, %v1284_v61  ;;  %v130_v61 = vsel %vm123_vm3, %v1903_v31, 0.0  ;;  %v837_v18 = vsel %vm834_vm8, %v2111_v35, 0.0  ;;  %v1015_v31 = vsel %vm1012_vm2, %v2163_v46, 0.0 }
0x26a5   :  { %v1672_v63 = vpop.f32.mrf.mxu0  ;;  %vm224_vm3 = vcmask 523520  }
0x26a6   :  { %1804 = vtanh.f32 %v1332_v62  ;;  %v1333_v9 = vsub.f32 0.0, %v1332_v62 }
0x26a7   :  { %v1329_v1 = vpop.f32.mrf.mxu0 }
0x26a8   :  { %v1334_v10 = vmul.f32 1.442695, %v1333_v9 }
0x26a9   :  { %v1673_v3 = vpop.f32.mrf.mxu0 }
0x26aa   :  { %1806 = vpow2.f32 %v1334_v10  ;;  %v399_v3 = vsel %vm396_vm9, %v1981_v52, 0.0 }
0x26b3   :  { %v1805_v4 = vpop.eup %1804 }
0x26b4   :  { %1342 = vrot.lane.b32.xlu1 %v1805_v4, %s1826_s18 }
0x26b7   :  { %v1807_v12 = vpop.eup %1806 }
0x26b8   :  { %1362 = vperm.xlu1 %1688, %v1360_v7   ;;  %v1336_v13 = vadd.f32 1.0, %v1807_v12  ;;  %v1104_v7 = vsel %vm1101_vm10, %v2189_v27, 0.0  ;;  %v485_v27 = vsel %vm482_vm11, %v2007_v21, 0.0  ;;  %v1189_v12 = vsel %vm1186_vm6, %v2218_v5, 0.0 }
0x26b9   :  { %vm2430_vm11 = vcmp.eq.s32.totalorder %v2083_v58, 1 }
0x26ba   :  { %1808 = vrcp.f32 %v1336_v13  ;;  %v574_v13 = vsel %vm571_vm13, %v2033_v53, 0.0 }
0x26c7   :  { %v1809_v14 = vpop.eup %1808 }
0x26c8   :  { %v1340_v29 = vmul.f32 %v1809_v14, %v2263_v17 }
0x2726   :  { %v1343_v15 = vpop.permute.xlu1 %1342 }
0x2727   :  { %v1345_v16 = vmul.f32 %v1809_v14, %v1343_v15 }
0x2729   :  { %1347 = vrot.lane.b32.xlu0 %v1345_v16, %s1827_s19  ;;  %v752_v16 = vsel %vm2430_vm11, %v2085_v60, 0.0 }
0x2733   :  { %v2270_v34 = vpop.permute.xlu1 %1362 }
0x2734   :  { %vm1364_vm1 = vcmp.eq.s32.totalorder %v2270_v34, 1 }
0x279b   :  { %v1348_v0 = vpop.permute.xlu0 %1347 }
0x279c   :  { %v2266_v30 = vadd.f32 %v1348_v0, %v1340_v29 }
0x279e   :  { %1810 = vtanh.f32 %v2266_v30  ;;  %v1366_v50 = vsel %vm1364_vm1, %v2266_v30, %v2263_v17 }
0x27ab   :  { %v1811_v32 = vpop.eup %1810 }
0x27ac   :  { %1353 = vrot.lane.b32.xlu0 %v1811_v32, %s1826_s18 }
0x281e   :  { %v1354_v36 = vpop.permute.xlu0 %1353 }
0x281f   :  { %v2272_v37 = vmul.f32 %v1809_v14, %v1354_v36  ;;  %v1278_v14 = vsel %vm1275_vm14, %v2246_v51, 0.0 }
0x2821   :  { %v2278_v38 = vsel %vm1364_vm1, %v2272_v37, %v1276_v54  ;;  %v1367_v21 = vsel %vm1364_vm1, %v2272_v37, 0.0 }
0x2822   :  { %v1374_v39 = vpack.c.bf16 %v2278_v38, %v2278_v38 }
0x2824   :  { %1376 = vrot.lane.b32.xlu1 %v1374_v39, %s1827_s19 }
0x2896   :  { %v1377_v40 = vpop.permute.xlu1 %1376 }
0x2897   :  { %1679 = vmatmul.mubr.msk.bf16.vlgmr.msra.gmra.mxu1 %vm19_vm0, %v1377_v40 }
0x2957   :  { %v1415_v42 = vpop.f32.mrf.mxu1 }
0x2958   :  { %v1421_v43 = vadd.f32 %v1415_v42, %v1373_v41 }
0x2959   :  { %v1680_v45 = vpop.f32.mrf.mxu1 }
0x295a   :  { %1812 = vtanh.f32 %v1421_v43  ;;  %v1422_v55 = vsub.f32 0.0, %v1421_v43 }
0x295b   :  { %v1418_v48 = vpop.f32.mrf.mxu1 }
0x295c   :  { %v1423_v57 = vmul.f32 1.442695, %v1422_v55 }
0x295d   :  { %v1681_v56 = vpop.f32.mrf.mxu1 }
0x295e   :  { %1814 = vpow2.f32 %v1423_v57 }
0x2967   :  { %v1813_v54 = vpop.eup %1812 }
0x2968   :  { %1431 = vrot.lane.b32.xlu0 %v1813_v54, %s1826_s18 }
0x296b   :  { %v1815_v33 = vpop.eup %1814 }
0x296c   :  { %1451 = vperm.xlu0 %1689, %v1449_v59   ;;  %v1425_v35 = vadd.f32 1.0, %v1815_v33 }
0x296e   :  { %1816 = vrcp.f32 %v1425_v35 }
0x2970   :  { %132 = vrot.lane.b32.xlu0 %v130_v61, %s1827_s19 }
0x2974   :  { %839 = vrot.lane.b32.xlu0 %v837_v18, %s1827_s19 }
0x2978   :  { %221 = vrot.lane.b32.xlu0 %v219_v25, %s1826_s18 }
0x297b   :  { %v1817_v6 = vpop.eup %1816 }
0x297c   :  { %928 = vrot.lane.b32.xlu0 %v926_v11, %s1826_s18  ;;  %v1429_v52 = vmul.f32 %v1817_v6, %v1366_v50 }
0x2980   :  { %311 = vrot.lane.b32.xlu0 %v309_v28, %s1828_s22 }
0x2984   :  { %1017 = vrot.lane.b32.xlu0 %v1015_v31, %s1828_s22 }
0x29da   :  { %v1432_v8 = vpop.permute.xlu0 %1431 }
0x29db   :  { %v1434_v62 = vmul.f32 %v1817_v6, %v1432_v8 }
0x29dd   :  { %1436 = vrot.lane.b32.xlu1 %v1434_v62, %s1827_s19 }
0x29e7   :  { %v1452_v22 = vpop.permute.xlu0 %1451 }
0x29e8   :  { %vm1453_vm9 = vcmp.eq.s32.totalorder %v1452_v22, 1 }
0x29eb   :  { %v133_v24 = vpop.permute.xlu0 %132 }
0x29ec   :  { %135 = vst.msk [vmem:[%s2428_s3] sm:$0xff] %vm19_vm0, %v133_v24 }
0x29ef   :  { %v840_v44 = vpop.permute.xlu0 %839 }
0x29f0   :  { %842 = vst.msk [vmem:[%s2428_s3 + $0x10] sm:$0xff] %vm19_vm0, %v840_v44 }
0x29f3   :  { %v222_v46 = vpop.permute.xlu0 %221 }
0x29f4   :  { %225 = vst.msk [vmem:[%s2428_s3] sm:$0xff] %vm224_vm3, %v222_v46 }
0x29f7   :  { %v929_v63 = vpop.permute.xlu0 %928 }
0x29f8   :  { %931 = vst.msk [vmem:[%s2428_s3 + $0x10] sm:$0xff] %vm224_vm3, %v929_v63 }
0x29fb   :  { %v312_v1 = vpop.permute.xlu0 %311 }
0x29fc   :  { %315 = vst.msk [vmem:[%s2428_s3] sm:$0xff] %vm314_vm5, %v312_v1 }
0x29fd   :  { %401 = vst.msk [vmem:[%s2428_s3] sm:$0xff] %vm400_vm7, %v399_v3 }
0x29ff   :  { %v1018_v4 = vpop.permute.xlu0 %1017 }
0x2a00   :  { %1020 = vst.msk [vmem:[%s2428_s3 + $0x10] sm:$0xff] %vm314_vm5, %v1018_v4 }
0x2a01   :  { %1105 = vst.msk [vmem:[%s2428_s3 + $0x10] sm:$0xff] %vm400_vm7, %v1104_v7 }
0x2a4f   :  { %v1437_v9 = vpop.permute.xlu1 %1436 }
0x2a50   :  { %v1439_v10 = vadd.f32 %v1437_v9, %v1429_v52 }
0x2a52   :  { %1818 = vtanh.f32 %v1439_v10  ;;  %v1455_v49 = vsel %vm1453_vm9, %v1439_v10, %v1366_v50 }
0x2a5f   :  { %v1819_v20 = vpop.eup %1818 }
0x2a60   :  { %1442 = vrot.lane.b32.xlu1 %v1819_v20, %s1826_s18 }
0x2a64   :  { %487 = vrot.lane.b32.xlu1 %v485_v27, %s1827_s19 }
0x2a68   :  { %1191 = vrot.lane.b32.xlu1 %v1189_v12, %s1827_s19 }
0x2a6c   :  { %576 = vrot.lane.b32.xlu1 %v574_v13, %s1826_s18 }
0x2a70   :  { %1280 = vrot.lane.b32.xlu1 %v1278_v14, %s1826_s18 }
0x2a74   :  { %665 = vrot.lane.b32.xlu1 %v663_v19, %s1828_s22 }
0x2a78   :  { %1369 = vrot.lane.b32.xlu1 %v1367_v21, %s1828_s22 }
0x2a7c   :  { %1464 = vrot.lane.b32.xlu1 %v1455_v49, %s1828_s22 }
0x2ad2   :  { %v1443_v53 = vpop.permute.xlu1 %1442 }
0x2ad3   :  { %v1445_v2 = vmul.f32 %v1817_v6, %v1443_v53 }
0x2ad5   :  { %v1454_v5 = vsel %vm1453_vm9, %v1445_v2, %v2278_v38  ;;  %v1456_v29 = vsel %vm1453_vm9, %v1445_v2, 0.0 }
0x2ad6   :  { %1459 = vrot.lane.b32.xlu0 %v1454_v5, %s1827_s19  ;;  %v488_v23 = vpop.permute.xlu1 %487 }
0x2ad7   :  { %490 = vst.msk [vmem:[%s2428_s3 + $0x8] sm:$0xff] %vm19_vm0, %v488_v23 }
0x2ada   :  { %v1192_v26 = vpop.permute.xlu1 %1191 }
0x2adb   :  { %1194 = vst.msk [vmem:[%s2428_s3 + $0x18] sm:$0xff] %vm19_vm0, %v1192_v26 }
0x2ade   :  { %v577_v47 = vpop.permute.xlu1 %576 }
0x2adf   :  { %579 = vst.msk [vmem:[%s2428_s3 + $0x8] sm:$0xff] %vm224_vm3, %v577_v47 }
0x2ae2   :  { %v1281_v51 = vpop.permute.xlu1 %1280 }
0x2ae3   :  { %1283 = vst.msk [vmem:[%s2428_s3 + $0x18] sm:$0xff] %vm224_vm3, %v1281_v51 }
0x2ae6   :  { %v666_v15 = vpop.permute.xlu1 %665 }
0x2ae7   :  { %668 = vst.msk [vmem:[%s2428_s3 + $0x8] sm:$0xff] %vm314_vm5, %v666_v15 }
0x2ae8   :  { %753 = vst.msk [vmem:[%s2428_s3 + $0x8] sm:$0xff] %vm400_vm7, %v752_v16 }
0x2aea   :  { %v1370_v17 = vpop.permute.xlu1 %1369 }
0x2aeb   :  { %1372 = vst.msk [vmem:[%s2428_s3 + $0x18] sm:$0xff] %vm314_vm5, %v1370_v17 }
0x2aec   :  { %1457 = vst.msk [vmem:[%s2428_s3 + $0x18] sm:$0xff] %vm400_vm7, %v1456_v29 }
0x2aee   :  { %v1465_v58 = vpop.permute.xlu1 %1464 }
0x2aef   :  { %1467 = vst.msk [vmem:[#allocation3] sm:$0xff] %vm19_vm0, %v1465_v58 }
0x2b48   :  { %v1460_v60 = vpop.permute.xlu0 %1459 }
0x2b49   :  { %1462 = vst.msk [vmem:[#allocation2] sm:$0xff] %vm19_vm0, %v1460_v60 }

</bundles_post_ra>
